<compile_context>
chip_gen: v5e
topology: v5e:2x2
jax: 0.10.0
libtpu: 0.0.40
codegen_flags: <defaults>
</compile_context>

<pallas_src>
import functools
import math

import jax
import jax.numpy as jnp
from jax.experimental import pallas as pl
from jax.experimental.pallas import tpu as pltpu


# ------------------------------ tiling helper --------------------------------

def _pick_tile(m, target=512):
    """Largest tile <= target that divides m and is a multiple of 8, else m."""
    if m <= target:
        return m
    t = (target // 8) * 8
    while t >= 8:
        if m % t == 0:
            return t
        t -= 8
    return m


# --------------------------- fused linear kernel ------------------------------
# optional pre-LayerNorm -> optional GELU -> bf16 MXU matmul (+bias)
# -> optional post-LayerNorm -> optional residual add.
# Pre-LN fusion requires the full K (=d_model/d_ff) in the block, so we tile M
# only and keep full K/N per block (K, N here are small multiples of 32-128).
# TODO(synk): for very large K/N, add a (M,N,K) grid with an fp32 VMEM scratch
# accumulator instead of the single-block K.

def _fused_linear_kernel(*refs, pre_ln, pre_gelu, post_ln, residual,
                         emit_xln, eps):
    it = iter(refs)
    x_ref, w_ref, b_ref = next(it), next(it), next(it)
    pre_g = next(it) if pre_ln else None
    pre_b = next(it) if pre_ln else None
    post_g = next(it) if post_ln else None
    post_b = next(it) if post_ln else None
    res_ref = next(it) if residual else None
    o_ref = next(it)
    xln_ref = next(it) if emit_xln else None

    x = x_ref[...]
    if pre_ln:
        mu = jnp.mean(x, axis=-1, keepdims=True)
        var = jnp.mean(jnp.square(x - mu), axis=-1, keepdims=True)
        x = (x - mu) * jax.lax.rsqrt(var + eps) * pre_g[...] + pre_b[...]
    if emit_xln:
        xln_ref[...] = x
    if pre_gelu:
        x = jax.nn.gelu(x, approximate=True)
    y = jnp.dot(x.astype(jnp.bfloat16), w_ref[...].astype(jnp.bfloat16),
                preferred_element_type=jnp.float32) + b_ref[...]
    if post_ln:
        mu = jnp.mean(y, axis=-1, keepdims=True)
        var = jnp.mean(jnp.square(y - mu), axis=-1, keepdims=True)
        y = (y - mu) * jax.lax.rsqrt(var + eps) * post_g[...] + post_b[...]
    if residual:
        y = y + res_ref[...]
    o_ref[...] = y


def fused_linear(x, w, b, *, pre_ln=None, pre_gelu=False, post_ln=None,
                 residual=None, emit_xln=False, eps=1e-5, tile_m=512):
    M, K = x.shape
    N = w.shape[1]
    tm = _pick_tile(M, tile_m)
    grid = (M // tm,)

    row_spec_k = pl.BlockSpec((tm, K), lambda i: (i, 0))
    row_spec_n = pl.BlockSpec((tm, N), lambda i: (i, 0))
    full_w = pl.BlockSpec((K, N), lambda i: (0, 0))
    vec_k = pl.BlockSpec((1, K), lambda i: (0, 0))
    vec_n = pl.BlockSpec((1, N), lambda i: (0, 0))

    inputs = [x, w, b.reshape(1, N)]
    in_specs = [row_spec_k, full_w, vec_n]
    if pre_ln is not None:
        g, bb = pre_ln
        inputs += [g.reshape(1, K), bb.reshape(1, K)]
        in_specs += [vec_k, vec_k]
    if post_ln is not None:
        g, bb = post_ln
        inputs += [g.reshape(1, N), bb.reshape(1, N)]
        in_specs += [vec_n, vec_n]
    if residual is not None:
        inputs += [residual]
        in_specs += [row_spec_n]

    if emit_xln:
        out_shape = (jax.ShapeDtypeStruct((M, N), jnp.float32),
                     jax.ShapeDtypeStruct((M, K), jnp.float32))
        out_specs = (row_spec_n, row_spec_k)
    else:
        out_shape = jax.ShapeDtypeStruct((M, N), jnp.float32)
        out_specs = row_spec_n

    kernel = functools.partial(
        _fused_linear_kernel,
        pre_ln=pre_ln is not None, pre_gelu=pre_gelu,
        post_ln=post_ln is not None, residual=residual is not None,
        emit_xln=emit_xln, eps=eps)

    return pl.pallas_call(
        kernel,
        grid=grid,
        out_shape=out_shape,
        in_specs=in_specs,
        out_specs=out_specs,
        compiler_params=pltpu.CompilerParams(
            dimension_semantics=("parallel",)),
    )(*inputs)


# ------------------------------ attention kernel ------------------------------
# q: (B, N, C), kv: (B, Nk, 2C) with K|V concatenated on the lane axis.
# Heads are sliced inside the kernel (no XLA-side head transposes); the output
# is written as a single (tq, C) slab per block.

def _attention_kernel(q_ref, kv_ref, o_ref, *, heads, dk, scale):
    q = q_ref[0]          # (tq, C) fp32
    kv = kv_ref[0]        # (Nk, 2C) fp32
    c = heads * dk
    outs = []
    for h in range(heads):
        qh = q[:, h * dk:(h + 1) * dk].astype(jnp.bfloat16)
        kh = kv[:, h * dk:(h + 1) * dk].astype(jnp.bfloat16)
        vh = kv[:, c + h * dk:c + (h + 1) * dk].astype(jnp.bfloat16)
        s = jnp.dot(qh, kh.T, preferred_element_type=jnp.float32) * scale
        m = jnp.max(s, axis=-1, keepdims=True)
        p = jnp.exp(s - m)
        p = p * pl.reciprocal(jnp.sum(p, axis=-1, keepdims=True), approx=True)
        outs.append(jnp.dot(p.astype(jnp.bfloat16), vh,
                            preferred_element_type=jnp.float32))
    o_ref[0] = jnp.concatenate(outs, axis=-1)


def attention(q, kv, heads, *, tile_q=256):
    B, N, C = q.shape
    Nk = kv.shape[1]
    dk = C // heads
    scale = 1.0 / math.sqrt(dk)       # Python float -> compile-time constant
    tq = _pick_tile(N, tile_q)
    # TODO(synk): for very long reduced sequences, tile Nk with an online-softmax
    # (flash-style) accumulator; after the RxR reduction Nk is small here.
    return pl.pallas_call(
        functools.partial(_attention_kernel, heads=heads, dk=dk, scale=scale),
        grid=(B, N // tq),
        out_shape=jax.ShapeDtypeStruct((B, N, C), jnp.float32),
        in_specs=[
            pl.BlockSpec((1, tq, C), lambda b, i: (b, i, 0)),
            pl.BlockSpec((1, Nk, 2 * C), lambda b, i: (b, 0, 0)),
        ],
        out_specs=pl.BlockSpec((1, tq, C), lambda b, i: (b, i, 0)),
        compiler_params=pltpu.CompilerParams(
            dimension_semantics=("parallel", "parallel")),
    )(q, kv)


# --------------------------- depthwise 3x3 conv kernel ------------------------

def _dwconv3x3_kernel(xp_ref, w_ref, b_ref, o_ref, *, H, W):
    xp = xp_ref[0]                        # (H+2, W+2, C), zero-padded
    w = w_ref[...]                        # (9, C), tap index ki*3 + kj
    acc = jnp.zeros((H, W, xp.shape[-1]), jnp.float32)
    for ki in range(3):
        for kj in range(3):
            acc = acc + xp[ki:ki + H, kj:kj + W, :] * w[ki * 3 + kj]
    o_ref[0] = acc + b_ref[...]


def dwconv3x3(x_nhwc, w9c, b, H, W):
    """Depthwise 3x3 conv, stride 1, padding 1, NHWC (channels on the lane axis)."""
    B, _, _, C = x_nhwc.shape
    xp = jnp.pad(x_nhwc, ((0, 0), (1, 1), (1, 1), (0, 0)))
    # TODO(synk): for large H*W*C, tile rows with a 1-row halo instead of whole-image blocks.
    return pl.pallas_call(
        functools.partial(_dwconv3x3_kernel, H=H, W=W),
        grid=(B,),
        out_shape=jax.ShapeDtypeStruct((B, H, W, C), jnp.float32),
        in_specs=[
            pl.BlockSpec((1, H + 2, W + 2, C), lambda b: (b, 0, 0, 0)),
            pl.BlockSpec((9, C), lambda b: (0, 0)),
            pl.BlockSpec((1, C), lambda b: (0, 0)),
        ],
        out_specs=pl.BlockSpec((1, H, W, C), lambda b: (b, 0, 0, 0)),
        compiler_params=pltpu.CompilerParams(
            dimension_semantics=("parallel",)),
    )(xp, w9c, b.reshape(1, C))


# ------------------------------ layernorm kernel ------------------------------

def _layernorm_kernel(x_ref, g_ref, b_ref, o_ref, *, eps):
    x = x_ref[...]
    mu = jnp.mean(x, axis=-1, keepdims=True)
    var = jnp.mean(jnp.square(x - mu), axis=-1, keepdims=True)
    o_ref[...] = (x - mu) * jax.lax.rsqrt(var + eps) * g_ref[...] + b_ref[...]


def layernorm(x, g, b, eps=1e-5, tile_m=512):
    M, C = x.shape
    tm = _pick_tile(M, tile_m)
    return pl.pallas_call(
        functools.partial(_layernorm_kernel, eps=eps),
        grid=(M // tm,),
        out_shape=jax.ShapeDtypeStruct((M, C), jnp.float32),
        in_specs=[pl.BlockSpec((tm, C), lambda i: (i, 0)),
                  pl.BlockSpec((1, C), lambda i: (0, 0)),
                  pl.BlockSpec((1, C), lambda i: (0, 0))],
        out_specs=pl.BlockSpec((tm, C), lambda i: (i, 0)),
        compiler_params=pltpu.CompilerParams(
            dimension_semantics=("parallel",)),
    )(x, g.reshape(1, C), b.reshape(1, C))


# --------------------------------- JAX glue -----------------------------------

def im2col(x_nchw, kh, kw, stride, pad):
    """Overlapping patches for the patch-embedding conv (feature order ki,kj-major per c)."""
    B, C, H, W = x_nchw.shape
    xp = jnp.pad(x_nchw, ((0, 0), (0, 0), (pad, pad), (pad, pad)))
    Ho = (H + 2 * pad - kh) // stride + 1
    Wo = (W + 2 * pad - kw) // stride + 1
    taps = []
    for ki in range(kh):
        for kj in range(kw):
            taps.append(xp[:, :, ki:ki + stride * Ho:stride,
                           kj:kj + stride * Wo:stride])   # (B, C, Ho, Wo)
    col = jnp.stack(taps, axis=2)                          # (B, C, kh*kw, Ho, Wo)
    col = col.transpose(0, 3, 4, 1, 2).reshape(B, Ho * Wo, C * kh * kw)
    return col, Ho, Wo


def efficient_self_attention(hs, p, B, H, W, heads, reduction_ratio):
    """hs: (B*N, C) pre-norm residual stream. Returns (B*N, C) = hs + ESA(LN(hs))."""
    N = H * W
    C = hs.shape[-1]
    # Fused: ESA LayerNorm + Q projection; normalized x emitted for the KV path.
    q, x_ln = fused_linear(hs, p["wq_w"], p["wq_b"],
                           pre_ln=(p["esa_ln_g"], p["esa_ln_b"]),
                           emit_xln=True)
    if reduction_ratio > 1:
        R = reduction_ratio
        Hr, Wr = H // R, W // R
        # RxR / stride-R / pad-0 reduction conv == non-overlapping patch
        # extraction: reshape + transpose, no im2col.
        patches = (x_ln.reshape(B, Hr, R, Wr, R, C)
                   .transpose(0, 1, 3, 2, 4, 5)
                   .reshape(B * Hr * Wr, R * R * C))
        kv_in = fused_linear(patches, p["wr_w"], p["wr_b"],
                             post_ln=(p["r_ln_g"], p["r_ln_b"]))
        Nk = Hr * Wr
    else:
        kv_in, Nk = x_ln, N
    # Fused K|V projection (lane-dense 2*C output).
    kv = fused_linear(kv_in, p["wkv_w"], p["wkv_b"])
    attn = attention(q.reshape(B, N, C), kv.reshape(B, Nk, 2 * C), heads)
    # Output projection with the residual add fused in.
    return fused_linear(attn.reshape(B * N, C), p["wo_w"], p["wo_b"],
                        residual=hs)


def mix_ffn(hs, p, B, H, W, d_ff):
    """hs: (B*N, C) pre-norm residual stream. Returns hs + MixFFN(LN(hs))."""
    M = hs.shape[0]
    # Fused: MF LayerNorm + w_1.
    h1 = fused_linear(hs, p["w1_w"], p["w1_b"],
                      pre_ln=(p["mf_ln_g"], p["mf_ln_b"]))
    # Tokens are raster-ordered rows -> NHWC reshape is free (no transpose).
    h1 = dwconv3x3(h1.reshape(B, H, W, d_ff), p["dw_w"], p["dw_b"], H, W)
    # TODO(synk): FeedForward.activation assumed GELU (SegFormer MixFFN default);
    # tanh-approximate GELU used for the EUP path.
    return fused_linear(h1.reshape(M, d_ff), p["w2_w"], p["w2_b"],
                        pre_gelu=True, residual=hs)


def transformer_block(hs, p, B, H, W, heads, reduction_ratio, d_ff):
    hs = efficient_self_attention(hs, p, B, H, W, heads, reduction_ratio)
    hs = mix_ffn(hs, p, B, H, W, d_ff)
    return hs


def encoder_stage(x_nchw, params, *, patch_size, stride, padding_size,
                  d_model, d_ff, heads, reduction_ratio):
    """x: (B, Cin, Hin, Win) -> (B, d_model, Hout, Wout)."""
    B = x_nchw.shape[0]
    # OverlappedPatchMerging: strided conv (im2col + matmul) with LayerNorm fused.
    col, H, W = im2col(x_nchw, patch_size, patch_size, stride, padding_size)
    N = H * W
    hs = fused_linear(col.reshape(B * N, -1), params["emb_w"], params["emb_b"],
                      post_ln=(params["emb_ln_g"], params["emb_ln_b"]))
    for blk in params["blocks"]:
        hs = transformer_block(hs, blk, B, H, W, heads, reduction_ratio, d_ff)
    hs = layernorm(hs, params["final_ln_g"], params["final_ln_b"])
    return hs.reshape(B, N, d_model).transpose(0, 2, 1).reshape(B, d_model, H, W)


# ------------------------------ parameter init --------------------------------

def init_params(key, in_channels, d_model, d_ff, patch_size, reduction_ratio,
                n_blocks=2):
    keys = iter(jax.random.split(key, 128))

    def w(shape):
        return jax.random.normal(next(keys), shape, jnp.float32) * 0.02

    zeros = lambda s: jnp.zeros(s, jnp.float32)
    ones = lambda s: jnp.ones(s, jnp.float32)

    params = {
        "emb_w": w((in_channels * patch_size * patch_size, d_model)),
        "emb_b": zeros((d_model,)),
        "emb_ln_g": ones((d_model,)), "emb_ln_b": zeros((d_model,)),
        "final_ln_g": ones((d_model,)), "final_ln_b": zeros((d_model,)),
        "blocks": [],
    }
    for _ in range(n_blocks):
        blk = {
            "esa_ln_g": ones((d_model,)), "esa_ln_b": zeros((d_model,)),
            "mf_ln_g": ones((d_model,)), "mf_ln_b": zeros((d_model,)),
            "wq_w": w((d_model, d_model)), "wq_b": zeros((d_model,)),
            # w_k | w_v fused into one lane-dense projection.
            "wkv_w": w((d_model, 2 * d_model)), "wkv_b": zeros((2 * d_model,)),
            "wo_w": w((d_model, d_model)), "wo_b": zeros((d_model,)),
            "w1_w": w((d_model, d_ff)), "w1_b": zeros((d_ff,)),
            "w2_w": w((d_ff, d_model)), "w2_b": zeros((d_model,)),
            "dw_w": w((9, d_ff)), "dw_b": zeros((d_ff,)),
        }
        if reduction_ratio > 1:
            R = reduction_ratio
            blk["wr_w"] = w((R * R * d_model, d_model))
            blk["wr_b"] = zeros((d_model,))
            blk["r_ln_g"] = ones((d_model,))
            blk["r_ln_b"] = zeros((d_model,))
        params["blocks"].append(blk)
    return params


# ----------------------------------- main --------------------------------------

if __name__ == "__main__":
    B, Cin, Hin, Win = 2, 4, 16, 16
    d_model, d_ff = 32, 64
    patch_size, stride, padding_size = 3, 2, 1
    heads, reduction_ratio = 2, 2
    # dropout_rate treated as eval mode (identity).

    key = jax.random.PRNGKey(0)
    kx, kp = jax.random.split(key)
    x = jax.random.normal(kx, (B, Cin, Hin, Win), jnp.float32)
    params = init_params(kp, Cin, d_model, d_ff, patch_size, reduction_ratio)

    fwd = jax.jit(functools.partial(
        encoder_stage,
        patch_size=patch_size, stride=stride, padding_size=padding_size,
        d_model=d_model, d_ff=d_ff, heads=heads,
        reduction_ratio=reduction_ratio))

    out = fwd(x, params)
    out = jax.block_until_ready(out)

    Hout = (Hin + 2 * padding_size - patch_size) // stride + 1
    Wout = (Win + 2 * padding_size - patch_size) // stride + 1
    assert out.shape == (B, d_model, Hout, Wout), out.shape
    assert bool(jnp.all(jnp.isfinite(out)))
    print("KERNEL_OK")
</pallas_src>

<mosaic_0001>
module attributes {stable_mosaic.version = 11 : i64} {
  func.func @_fused_linear_kernel(%arg0: i32, %arg1: memref<128x36xf32, #tpu.memory_space<vmem>>, %arg2: memref<36x32xf32, #tpu.memory_space<vmem>>, %arg3: memref<1x32xf32, #tpu.memory_space<vmem>>, %arg4: memref<1x32xf32, #tpu.memory_space<vmem>>, %arg5: memref<1x32xf32, #tpu.memory_space<vmem>>, %arg6: memref<128x32xf32, #tpu.memory_space<vmem>>) attributes {dimension_semantics = [#tpu.dimension_semantics<parallel>], iteration_bounds = array<i64: 1>, scalar_prefetch = 0 : i64, scratch_operands = 0 : i64, tpu.core_type = #tpu.core_type<tc>, window_params = [{transform_indices = @transform_0, window_bounds = array<i64: 128, 36>}, {pipeline_mode = #tpu.pipeline_mode<synchronous>, transform_indices = @transform_1, window_bounds = array<i64: 36, 32>}, {pipeline_mode = #tpu.pipeline_mode<synchronous>, transform_indices = @transform_2, window_bounds = array<i64: 1, 32>}, {pipeline_mode = #tpu.pipeline_mode<synchronous>, transform_indices = @transform_3, window_bounds = array<i64: 1, 32>}, {pipeline_mode = #tpu.pipeline_mode<synchronous>, transform_indices = @transform_4, window_bounds = array<i64: 1, 32>}, {transform_indices = @transform_5, window_bounds = array<i64: 128, 32>}]} {
    %c0 = arith.constant 0 : index
    %c0_0 = arith.constant 0 : index
    %0 = vector.load %arg1[%c0, %c0_0] : memref<128x36xf32, #tpu.memory_space<vmem>>, vector<128x36xf32>
    %1 = arith.truncf %0 : vector<128x36xf32> to vector<128x36xbf16>
    %c0_1 = arith.constant 0 : index
    %c0_2 = arith.constant 0 : index
    %2 = vector.load %arg2[%c0_1, %c0_2] : memref<36x32xf32, #tpu.memory_space<vmem>>, vector<36x32xf32>
    %3 = arith.truncf %2 : vector<36x32xf32> to vector<36x32xbf16>
    %cst = arith.constant dense<0.000000e+00> : vector<128x32xf32>
    %4 = tpu.matmul %1, %3, %cst {dimension_numbers = #tpu.dot_dimension_numbers<[1], [0], [0], [1], [0, 0, 1, 1], [], []>} : vector<128x36xbf16>, vector<36x32xbf16>, vector<128x32xf32> -> vector<128x32xf32>
    %c0_3 = arith.constant 0 : index
    %c0_4 = arith.constant 0 : index
    %5 = vector.load %arg3[%c0_3, %c0_4] : memref<1x32xf32, #tpu.memory_space<vmem>>, vector<1x32xf32>
    %6 = vector.broadcast %5 : vector<1x32xf32> to vector<128x32xf32>
    %7 = arith.addf %4, %6 : vector<128x32xf32>
    %cst_5 = arith.constant dense<0.000000e+00> : vector<128xf32>
    %8 = vector.multi_reduction <add>, %7, %cst_5 [1] : vector<128x32xf32> to vector<128xf32>
    %9 = vector.shape_cast %8 : vector<128xf32> to vector<128x1xf32>
    %cst_6 = arith.constant 3.200000e+01 : f32
    %10 = vector.broadcast %cst_6 : f32 to vector<128x1xf32>
    %11 = arith.divf %9, %10 : vector<128x1xf32>
    %12 = vector.broadcast %11 : vector<128x1xf32> to vector<128x32xf32>
    %13 = arith.subf %7, %12 : vector<128x32xf32>
    %14 = arith.mulf %13, %13 : vector<128x32xf32>
    %cst_7 = arith.constant dense<0.000000e+00> : vector<128xf32>
    %15 = vector.multi_reduction <add>, %14, %cst_7 [1] : vector<128x32xf32> to vector<128xf32>
    %16 = vector.shape_cast %15 : vector<128xf32> to vector<128x1xf32>
    %cst_8 = arith.constant 3.200000e+01 : f32
    %17 = vector.broadcast %cst_8 : f32 to vector<128x1xf32>
    %18 = arith.divf %16, %17 : vector<128x1xf32>
    %19 = vector.broadcast %11 : vector<128x1xf32> to vector<128x32xf32>
    %20 = arith.subf %7, %19 : vector<128x32xf32>
    %cst_9 = arith.constant 9.99999974E-6 : f32
    %21 = vector.broadcast %cst_9 : f32 to vector<128x1xf32>
    %22 = arith.addf %18, %21 : vector<128x1xf32>
    %23 = math.rsqrt %22 : vector<128x1xf32>
    %24 = vector.broadcast %23 : vector<128x1xf32> to vector<128x32xf32>
    %25 = arith.mulf %20, %24 : vector<128x32xf32>
    %c0_10 = arith.constant 0 : index
    %c0_11 = arith.constant 0 : index
    %26 = vector.load %arg4[%c0_10, %c0_11] : memref<1x32xf32, #tpu.memory_space<vmem>>, vector<1x32xf32>
    %27 = vector.broadcast %26 : vector<1x32xf32> to vector<128x32xf32>
    %28 = arith.mulf %25, %27 : vector<128x32xf32>
    %c0_12 = arith.constant 0 : index
    %c0_13 = arith.constant 0 : index
    %29 = vector.load %arg5[%c0_12, %c0_13] : memref<1x32xf32, #tpu.memory_space<vmem>>, vector<1x32xf32>
    %30 = vector.broadcast %29 : vector<1x32xf32> to vector<128x32xf32>
    %31 = arith.addf %28, %30 : vector<128x32xf32>
    %c0_14 = arith.constant 0 : index
    %c0_15 = arith.constant 0 : index
    %32 = vector.load %arg6[%c0_14, %c0_15] : memref<128x32xf32, #tpu.memory_space<vmem>>, vector<128x32xf32>
    tpu.vector_store %arg6[%c0_14, %c0_15], %31 {strides = array<i32>} : memref<128x32xf32, #tpu.memory_space<vmem>>, vector<128x32xf32>,
    return
  }
  func.func @transform_0(%arg0: i32) -> (i32, i32) {
    %c0_i32 = arith.constant 0 : i32
    %c0_i32_0 = arith.constant 0 : i32
    return %arg0, %c0_i32 : i32, i32
  }
  func.func @transform_1(%arg0: i32) -> (i32, i32) {
    %c0_i32 = arith.constant 0 : i32
    %c0_i32_0 = arith.constant 0 : i32
    %c0_i32_1 = arith.constant 0 : i32
    return %c0_i32, %c0_i32_0 : i32, i32
  }
  func.func @transform_2(%arg0: i32) -> (i32, i32) {
    %c0_i32 = arith.constant 0 : i32
    %c0_i32_0 = arith.constant 0 : i32
    %c0_i32_1 = arith.constant 0 : i32
    return %c0_i32, %c0_i32_0 : i32, i32
  }
  func.func @transform_3(%arg0: i32) -> (i32, i32) {
    %c0_i32 = arith.constant 0 : i32
    %c0_i32_0 = arith.constant 0 : i32
    %c0_i32_1 = arith.constant 0 : i32
    return %c0_i32, %c0_i32_0 : i32, i32
  }
  func.func @transform_4(%arg0: i32) -> (i32, i32) {
    %c0_i32 = arith.constant 0 : i32
    %c0_i32_0 = arith.constant 0 : i32
    %c0_i32_1 = arith.constant 0 : i32
    return %c0_i32, %c0_i32_0 : i32, i32
  }
  func.func @transform_5(%arg0: i32) -> (i32, i32) {
    %c0_i32 = arith.constant 0 : i32
    %c0_i32_0 = arith.constant 0 : i32
    return %arg0, %c0_i32 : i32, i32
  }
}

module attributes {stable_mosaic.version = 11 : i64} {
  func.func @_fused_linear_kernel(%arg0: i32, %arg1: memref<128x32xf32, #tpu.memory_space<vmem>>, %arg2: memref<32x32xf32, #tpu.memory_space<vmem>>, %arg3: memref<1x32xf32, #tpu.memory_space<vmem>>, %arg4: memref<1x32xf32, #tpu.memory_space<vmem>>, %arg5: memref<1x32xf32, #tpu.memory_space<vmem>>, %arg6: memref<128x32xf32, #tpu.memory_space<vmem>>, %arg7: memref<128x32xf32, #tpu.memory_space<vmem>>) attributes {dimension_semantics = [#tpu.dimension_semantics<parallel>], iteration_bounds = array<i64: 1>, scalar_prefetch = 0 : i64, scratch_operands = 0 : i64, tpu.core_type = #tpu.core_type<tc>, window_params = [{transform_indices = @transform_0, window_bounds = array<i64: 128, 32>}, {pipeline_mode = #tpu.pipeline_mode<synchronous>, transform_indices = @transform_1, window_bounds = array<i64: 32, 32>}, {pipeline_mode = #tpu.pipeline_mode<synchronous>, transform_indices = @transform_2, window_bounds = array<i64: 1, 32>}, {pipeline_mode = #tpu.pipeline_mode<synchronous>, transform_indices = @transform_3, window_bounds = array<i64: 1, 32>}, {pipeline_mode = #tpu.pipeline_mode<synchronous>, transform_indices = @transform_4, window_bounds = array<i64: 1, 32>}, {transform_indices = @transform_5, window_bounds = array<i64: 128, 32>}, {transform_indices = @transform_6, window_bounds = array<i64: 128, 32>}]} {
    %c0 = arith.constant 0 : index
    %c0_0 = arith.constant 0 : index
    %0 = vector.load %arg1[%c0, %c0_0] : memref<128x32xf32, #tpu.memory_space<vmem>>, vector<128x32xf32>
    %cst = arith.constant dense<0.000000e+00> : vector<128xf32>
    %1 = vector.multi_reduction <add>, %0, %cst [1] : vector<128x32xf32> to vector<128xf32>
    %2 = vector.shape_cast %1 : vector<128xf32> to vector<128x1xf32>
    %cst_1 = arith.constant 3.200000e+01 : f32
    %3 = vector.broadcast %cst_1 : f32 to vector<128x1xf32>
    %4 = arith.divf %2, %3 : vector<128x1xf32>
    %5 = vector.broadcast %4 : vector<128x1xf32> to vector<128x32xf32>
    %6 = arith.subf %0, %5 : vector<128x32xf32>
    %7 = arith.mulf %6, %6 : vector<128x32xf32>
    %cst_2 = arith.constant dense<0.000000e+00> : vector<128xf32>
    %8 = vector.multi_reduction <add>, %7, %cst_2 [1] : vector<128x32xf32> to vector<128xf32>
    %9 = vector.shape_cast %8 : vector<128xf32> to vector<128x1xf32>
    %cst_3 = arith.constant 3.200000e+01 : f32
    %10 = vector.broadcast %cst_3 : f32 to vector<128x1xf32>
    %11 = arith.divf %9, %10 : vector<128x1xf32>
    %12 = vector.broadcast %4 : vector<128x1xf32> to vector<128x32xf32>
    %13 = arith.subf %0, %12 : vector<128x32xf32>
    %cst_4 = arith.constant 9.99999974E-6 : f32
    %14 = vector.broadcast %cst_4 : f32 to vector<128x1xf32>
    %15 = arith.addf %11, %14 : vector<128x1xf32>
    %16 = math.rsqrt %15 : vector<128x1xf32>
    %17 = vector.broadcast %16 : vector<128x1xf32> to vector<128x32xf32>
    %18 = arith.mulf %13, %17 : vector<128x32xf32>
    %c0_5 = arith.constant 0 : index
    %c0_6 = arith.constant 0 : index
    %19 = vector.load %arg4[%c0_5, %c0_6] : memref<1x32xf32, #tpu.memory_space<vmem>>, vector<1x32xf32>
    %20 = vector.broadcast %19 : vector<1x32xf32> to vector<128x32xf32>
    %21 = arith.mulf %18, %20 : vector<128x32xf32>
    %c0_7 = arith.constant 0 : index
    %c0_8 = arith.constant 0 : index
    %22 = vector.load %arg5[%c0_7, %c0_8] : memref<1x32xf32, #tpu.memory_space<vmem>>, vector<1x32xf32>
    %23 = vector.broadcast %22 : vector<1x32xf32> to vector<128x32xf32>
    %24 = arith.addf %21, %23 : vector<128x32xf32>
    %c0_9 = arith.constant 0 : index
    %c0_10 = arith.constant 0 : index
    %25 = vector.load %arg7[%c0_9, %c0_10] : memref<128x32xf32, #tpu.memory_space<vmem>>, vector<128x32xf32>
    tpu.vector_store %arg7[%c0_9, %c0_10], %24 {strides = array<i32>} : memref<128x32xf32, #tpu.memory_space<vmem>>, vector<128x32xf32>,
    %26 = arith.truncf %24 : vector<128x32xf32> to vector<128x32xbf16>
    %c0_11 = arith.constant 0 : index
    %c0_12 = arith.constant 0 : index
    %27 = vector.load %arg2[%c0_11, %c0_12] : memref<32x32xf32, #tpu.memory_space<vmem>>, vector<32x32xf32>
    %28 = arith.truncf %27 : vector<32x32xf32> to vector<32x32xbf16>
    %cst_13 = arith.constant dense<0.000000e+00> : vector<128x32xf32>
    %29 = tpu.matmul %26, %28, %cst_13 {dimension_numbers = #tpu.dot_dimension_numbers<[1], [0], [0], [1], [0, 0, 1, 1], [], []>} : vector<128x32xbf16>, vector<32x32xbf16>, vector<128x32xf32> -> vector<128x32xf32>
    %c0_14 = arith.constant 0 : index
    %c0_15 = arith.constant 0 : index
    %30 = vector.load %arg3[%c0_14, %c0_15] : memref<1x32xf32, #tpu.memory_space<vmem>>, vector<1x32xf32>
    %31 = vector.broadcast %30 : vector<1x32xf32> to vector<128x32xf32>
    %32 = arith.addf %29, %31 : vector<128x32xf32>
    %c0_16 = arith.constant 0 : index
    %c0_17 = arith.constant 0 : index
    %33 = vector.load %arg6[%c0_16, %c0_17] : memref<128x32xf32, #tpu.memory_space<vmem>>, vector<128x32xf32>
    tpu.vector_store %arg6[%c0_16, %c0_17], %32 {strides = array<i32>} : memref<128x32xf32, #tpu.memory_space<vmem>>, vector<128x32xf32>,
    return
  }
  func.func @transform_0(%arg0: i32) -> (i32, i32) {
    %c0_i32 = arith.constant 0 : i32
    %c0_i32_0 = arith.constant 0 : i32
    return %arg0, %c0_i32 : i32, i32
  }
  func.func @transform_1(%arg0: i32) -> (i32, i32) {
    %c0_i32 = arith.constant 0 : i32
    %c0_i32_0 = arith.constant 0 : i32
    %c0_i32_1 = arith.constant 0 : i32
    return %c0_i32, %c0_i32_0 : i32, i32
  }
  func.func @transform_2(%arg0: i32) -> (i32, i32) {
    %c0_i32 = arith.constant 0 : i32
    %c0_i32_0 = arith.constant 0 : i32
    %c0_i32_1 = arith.constant 0 : i32
    return %c0_i32, %c0_i32_0 : i32, i32
  }
  func.func @transform_3(%arg0: i32) -> (i32, i32) {
    %c0_i32 = arith.constant 0 : i32
    %c0_i32_0 = arith.constant 0 : i32
    %c0_i32_1 = arith.constant 0 : i32
    return %c0_i32, %c0_i32_0 : i32, i32
  }
  func.func @transform_4(%arg0: i32) -> (i32, i32) {
    %c0_i32 = arith.constant 0 : i32
    %c0_i32_0 = arith.constant 0 : i32
    %c0_i32_1 = arith.constant 0 : i32
    return %c0_i32, %c0_i32_0 : i32, i32
  }
  func.func @transform_5(%arg0: i32) -> (i32, i32) {
    %c0_i32 = arith.constant 0 : i32
    %c0_i32_0 = arith.constant 0 : i32
    return %arg0, %c0_i32 : i32, i32
  }
  func.func @transform_6(%arg0: i32) -> (i32, i32) {
    %c0_i32 = arith.constant 0 : i32
    %c0_i32_0 = arith.constant 0 : i32
    return %arg0, %c0_i32 : i32, i32
  }
}

module attributes {stable_mosaic.version = 11 : i64} {
  func.func @_fused_linear_kernel(%arg0: i32, %arg1: memref<32x128xf32, #tpu.memory_space<vmem>>, %arg2: memref<128x32xf32, #tpu.memory_space<vmem>>, %arg3: memref<1x32xf32, #tpu.memory_space<vmem>>, %arg4: memref<1x32xf32, #tpu.memory_space<vmem>>, %arg5: memref<1x32xf32, #tpu.memory_space<vmem>>, %arg6: memref<32x32xf32, #tpu.memory_space<vmem>>) attributes {dimension_semantics = [#tpu.dimension_semantics<parallel>], iteration_bounds = array<i64: 1>, scalar_prefetch = 0 : i64, scratch_operands = 0 : i64, tpu.core_type = #tpu.core_type<tc>, window_params = [{transform_indices = @transform_0, window_bounds = array<i64: 32, 128>}, {pipeline_mode = #tpu.pipeline_mode<synchronous>, transform_indices = @transform_1, window_bounds = array<i64: 128, 32>}, {pipeline_mode = #tpu.pipeline_mode<synchronous>, transform_indices = @transform_2, window_bounds = array<i64: 1, 32>}, {pipeline_mode = #tpu.pipeline_mode<synchronous>, transform_indices = @transform_3, window_bounds = array<i64: 1, 32>}, {pipeline_mode = #tpu.pipeline_mode<synchronous>, transform_indices = @transform_4, window_bounds = array<i64: 1, 32>}, {transform_indices = @transform_5, window_bounds = array<i64: 32, 32>}]} {
    %c0 = arith.constant 0 : index
    %c0_0 = arith.constant 0 : index
    %0 = vector.load %arg1[%c0, %c0_0] : memref<32x128xf32, #tpu.memory_space<vmem>>, vector<32x128xf32>
    %1 = arith.truncf %0 : vector<32x128xf32> to vector<32x128xbf16>
    %c0_1 = arith.constant 0 : index
    %c0_2 = arith.constant 0 : index
    %2 = vector.load %arg2[%c0_1, %c0_2] : memref<128x32xf32, #tpu.memory_space<vmem>>, vector<128x32xf32>
    %3 = arith.truncf %2 : vector<128x32xf32> to vector<128x32xbf16>
    %cst = arith.constant dense<0.000000e+00> : vector<32x32xf32>
    %4 = tpu.matmul %1, %3, %cst {dimension_numbers = #tpu.dot_dimension_numbers<[1], [0], [0], [1], [0, 0, 1, 1], [], []>} : vector<32x128xbf16>, vector<128x32xbf16>, vector<32x32xf32> -> vector<32x32xf32>
    %c0_3 = arith.constant 0 : index
    %c0_4 = arith.constant 0 : index
    %5 = vector.load %arg3[%c0_3, %c0_4] : memref<1x32xf32, #tpu.memory_space<vmem>>, vector<1x32xf32>
    %6 = vector.broadcast %5 : vector<1x32xf32> to vector<32x32xf32>
    %7 = arith.addf %4, %6 : vector<32x32xf32>
    %cst_5 = arith.constant dense<0.000000e+00> : vector<32xf32>
    %8 = vector.multi_reduction <add>, %7, %cst_5 [1] : vector<32x32xf32> to vector<32xf32>
    %9 = vector.shape_cast %8 : vector<32xf32> to vector<32x1xf32>
    %cst_6 = arith.constant 3.200000e+01 : f32
    %10 = vector.broadcast %cst_6 : f32 to vector<32x1xf32>
    %11 = arith.divf %9, %10 : vector<32x1xf32>
    %12 = vector.broadcast %11 : vector<32x1xf32> to vector<32x32xf32>
    %13 = arith.subf %7, %12 : vector<32x32xf32>
    %14 = arith.mulf %13, %13 : vector<32x32xf32>
    %cst_7 = arith.constant dense<0.000000e+00> : vector<32xf32>
    %15 = vector.multi_reduction <add>, %14, %cst_7 [1] : vector<32x32xf32> to vector<32xf32>
    %16 = vector.shape_cast %15 : vector<32xf32> to vector<32x1xf32>
    %cst_8 = arith.constant 3.200000e+01 : f32
    %17 = vector.broadcast %cst_8 : f32 to vector<32x1xf32>
    %18 = arith.divf %16, %17 : vector<32x1xf32>
    %19 = vector.broadcast %11 : vector<32x1xf32> to vector<32x32xf32>
    %20 = arith.subf %7, %19 : vector<32x32xf32>
    %cst_9 = arith.constant 9.99999974E-6 : f32
    %21 = vector.broadcast %cst_9 : f32 to vector<32x1xf32>
    %22 = arith.addf %18, %21 : vector<32x1xf32>
    %23 = math.rsqrt %22 : vector<32x1xf32>
    %24 = vector.broadcast %23 : vector<32x1xf32> to vector<32x32xf32>
    %25 = arith.mulf %20, %24 : vector<32x32xf32>
    %c0_10 = arith.constant 0 : index
    %c0_11 = arith.constant 0 : index
    %26 = vector.load %arg4[%c0_10, %c0_11] : memref<1x32xf32, #tpu.memory_space<vmem>>, vector<1x32xf32>
    %27 = vector.broadcast %26 : vector<1x32xf32> to vector<32x32xf32>
    %28 = arith.mulf %25, %27 : vector<32x32xf32>
    %c0_12 = arith.constant 0 : index
    %c0_13 = arith.constant 0 : index
    %29 = vector.load %arg5[%c0_12, %c0_13] : memref<1x32xf32, #tpu.memory_space<vmem>>, vector<1x32xf32>
    %30 = vector.broadcast %29 : vector<1x32xf32> to vector<32x32xf32>
    %31 = arith.addf %28, %30 : vector<32x32xf32>
    %c0_14 = arith.constant 0 : index
    %c0_15 = arith.constant 0 : index
    %32 = vector.load %arg6[%c0_14, %c0_15] : memref<32x32xf32, #tpu.memory_space<vmem>>, vector<32x32xf32>
    tpu.vector_store %arg6[%c0_14, %c0_15], %31 {strides = array<i32>} : memref<32x32xf32, #tpu.memory_space<vmem>>, vector<32x32xf32>,
    return
  }
  func.func @transform_0(%arg0: i32) -> (i32, i32) {
    %c0_i32 = arith.constant 0 : i32
    %c0_i32_0 = arith.constant 0 : i32
    return %arg0, %c0_i32 : i32, i32
  }
  func.func @transform_1(%arg0: i32) -> (i32, i32) {
    %c0_i32 = arith.constant 0 : i32
    %c0_i32_0 = arith.constant 0 : i32
    %c0_i32_1 = arith.constant 0 : i32
    return %c0_i32, %c0_i32_0 : i32, i32
  }
  func.func @transform_2(%arg0: i32) -> (i32, i32) {
    %c0_i32 = arith.constant 0 : i32
    %c0_i32_0 = arith.constant 0 : i32
    %c0_i32_1 = arith.constant 0 : i32
    return %c0_i32, %c0_i32_0 : i32, i32
  }
  func.func @transform_3(%arg0: i32) -> (i32, i32) {
    %c0_i32 = arith.constant 0 : i32
    %c0_i32_0 = arith.constant 0 : i32
    %c0_i32_1 = arith.constant 0 : i32
    return %c0_i32, %c0_i32_0 : i32, i32
  }
  func.func @transform_4(%arg0: i32) -> (i32, i32) {
    %c0_i32 = arith.constant 0 : i32
    %c0_i32_0 = arith.constant 0 : i32
    %c0_i32_1 = arith.constant 0 : i32
    return %c0_i32, %c0_i32_0 : i32, i32
  }
  func.func @transform_5(%arg0: i32) -> (i32, i32) {
    %c0_i32 = arith.constant 0 : i32
    %c0_i32_0 = arith.constant 0 : i32
    return %arg0, %c0_i32 : i32, i32
  }
}

module attributes {stable_mosaic.version = 11 : i64} {
  func.func @_fused_linear_kernel(%arg0: i32, %arg1: memref<32x32xf32, #tpu.memory_space<vmem>>, %arg2: memref<32x64xf32, #tpu.memory_space<vmem>>, %arg3: memref<1x64xf32, #tpu.memory_space<vmem>>, %arg4: memref<32x64xf32, #tpu.memory_space<vmem>>) attributes {dimension_semantics = [#tpu.dimension_semantics<parallel>], iteration_bounds = array<i64: 1>, scalar_prefetch = 0 : i64, scratch_operands = 0 : i64, tpu.core_type = #tpu.core_type<tc>, window_params = [{transform_indices = @transform_0, window_bounds = array<i64: 32, 32>}, {pipeline_mode = #tpu.pipeline_mode<synchronous>, transform_indices = @transform_1, window_bounds = array<i64: 32, 64>}, {pipeline_mode = #tpu.pipeline_mode<synchronous>, transform_indices = @transform_2, window_bounds = array<i64: 1, 64>}, {transform_indices = @transform_3, window_bounds = array<i64: 32, 64>}]} {
    %c0 = arith.constant 0 : index
    %c0_0 = arith.constant 0 : index
    %0 = vector.load %arg1[%c0, %c0_0] : memref<32x32xf32, #tpu.memory_space<vmem>>, vector<32x32xf32>
    %1 = arith.truncf %0 : vector<32x32xf32> to vector<32x32xbf16>
    %c0_1 = arith.constant 0 : index
    %c0_2 = arith.constant 0 : index
    %2 = vector.load %arg2[%c0_1, %c0_2] : memref<32x64xf32, #tpu.memory_space<vmem>>, vector<32x64xf32>
    %3 = arith.truncf %2 : vector<32x64xf32> to vector<32x64xbf16>
    %cst = arith.constant dense<0.000000e+00> : vector<32x64xf32>
    %4 = tpu.matmul %1, %3, %cst {dimension_numbers = #tpu.dot_dimension_numbers<[1], [0], [0], [1], [0, 0, 1, 1], [], []>} : vector<32x32xbf16>, vector<32x64xbf16>, vector<32x64xf32> -> vector<32x64xf32>
    %c0_3 = arith.constant 0 : index
    %c0_4 = arith.constant 0 : index
    %5 = vector.load %arg3[%c0_3, %c0_4] : memref<1x64xf32, #tpu.memory_space<vmem>>, vector<1x64xf32>
    %6 = vector.broadcast %5 : vector<1x64xf32> to vector<32x64xf32>
    %7 = arith.addf %4, %6 : vector<32x64xf32>
    %c0_5 = arith.constant 0 : index
    %c0_6 = arith.constant 0 : index
    %8 = vector.load %arg4[%c0_5, %c0_6] : memref<32x64xf32, #tpu.memory_space<vmem>>, vector<32x64xf32>
    tpu.vector_store %arg4[%c0_5, %c0_6], %7 {strides = array<i32>} : memref<32x64xf32, #tpu.memory_space<vmem>>, vector<32x64xf32>,
    return
  }
  func.func @transform_0(%arg0: i32) -> (i32, i32) {
    %c0_i32 = arith.constant 0 : i32
    %c0_i32_0 = arith.constant 0 : i32
    return %arg0, %c0_i32 : i32, i32
  }
  func.func @transform_1(%arg0: i32) -> (i32, i32) {
    %c0_i32 = arith.constant 0 : i32
    %c0_i32_0 = arith.constant 0 : i32
    %c0_i32_1 = arith.constant 0 : i32
    return %c0_i32, %c0_i32_0 : i32, i32
  }
  func.func @transform_2(%arg0: i32) -> (i32, i32) {
    %c0_i32 = arith.constant 0 : i32
    %c0_i32_0 = arith.constant 0 : i32
    %c0_i32_1 = arith.constant 0 : i32
    return %c0_i32, %c0_i32_0 : i32, i32
  }
  func.func @transform_3(%arg0: i32) -> (i32, i32) {
    %c0_i32 = arith.constant 0 : i32
    %c0_i32_0 = arith.constant 0 : i32
    return %arg0, %c0_i32 : i32, i32
  }
}

module attributes {stable_mosaic.version = 11 : i64} {
  func.func @_attention_kernel(%arg0: i32, %arg1: i32, %arg2: memref<1x64x32xf32, #tpu.memory_space<vmem>>, %arg3: memref<1x16x64xf32, #tpu.memory_space<vmem>>, %arg4: memref<1x64x32xf32, #tpu.memory_space<vmem>>) attributes {dimension_semantics = [#tpu.dimension_semantics<parallel>, #tpu.dimension_semantics<parallel>], iteration_bounds = array<i64: 2, 1>, scalar_prefetch = 0 : i64, scratch_operands = 0 : i64, tpu.core_type = #tpu.core_type<tc>, window_params = [{transform_indices = @transform_0, window_bounds = array<i64: 1, 64, 32>}, {transform_indices = @transform_1, window_bounds = array<i64: 1, 16, 64>}, {transform_indices = @transform_2, window_bounds = array<i64: 1, 64, 32>}]} {
    %c0 = arith.constant 0 : index
    %c0_0 = arith.constant 0 : index
    %c0_1 = arith.constant 0 : index
    %0 = vector.load %arg2[%c0, %c0_0, %c0_1] : memref<1x64x32xf32, #tpu.memory_space<vmem>>, vector<1x64x32xf32>
    %1 = vector.shape_cast %0 : vector<1x64x32xf32> to vector<64x32xf32>
    %c0_2 = arith.constant 0 : index
    %c0_3 = arith.constant 0 : index
    %c0_4 = arith.constant 0 : index
    %2 = vector.load %arg3[%c0_2, %c0_3, %c0_4] : memref<1x16x64xf32, #tpu.memory_space<vmem>>, vector<1x16x64xf32>
    %3 = vector.shape_cast %2 : vector<1x16x64xf32> to vector<16x64xf32>
    %4 = vector.extract_strided_slice %1 {offsets = [0, 0], sizes = [64, 16], strides = [1, 1]} : vector<64x32xf32> to vector<64x16xf32>
    %5 = arith.truncf %4 : vector<64x16xf32> to vector<64x16xbf16>
    %6 = vector.extract_strided_slice %3 {offsets = [0, 0], sizes = [16, 16], strides = [1, 1]} : vector<16x64xf32> to vector<16x16xf32>
    %7 = arith.truncf %6 : vector<16x16xf32> to vector<16x16xbf16>
    %8 = vector.extract_strided_slice %3 {offsets = [0, 32], sizes = [16, 16], strides = [1, 1]} : vector<16x64xf32> to vector<16x16xf32>
    %9 = arith.truncf %8 : vector<16x16xf32> to vector<16x16xbf16>
    %10 = tpu.transpose %7, [1, 0] : vector<16x16xbf16> -> vector<16x16xbf16>
    %cst = arith.constant dense<0.000000e+00> : vector<64x16xf32>
    %11 = tpu.matmul %5, %10, %cst {dimension_numbers = #tpu.dot_dimension_numbers<[1], [0], [0], [1], [0, 0, 1, 1], [], []>} : vector<64x16xbf16>, vector<16x16xbf16>, vector<64x16xf32> -> vector<64x16xf32>
    %cst_5 = arith.constant 2.500000e-01 : f32
    %12 = vector.broadcast %cst_5 : f32 to vector<64x16xf32>
    %13 = arith.mulf %11, %12 : vector<64x16xf32>
    %cst_6 = arith.constant dense<0xFF800000> : vector<64xf32>
    %14 = vector.multi_reduction <maximumf>, %13, %cst_6 [1] : vector<64x16xf32> to vector<64xf32>
    %15 = vector.shape_cast %14 : vector<64xf32> to vector<64x1xf32>
    %16 = vector.broadcast %15 : vector<64x1xf32> to vector<64x16xf32>
    %17 = arith.subf %13, %16 : vector<64x16xf32>
    %18 = math.exp %17 : vector<64x16xf32>
    %cst_7 = arith.constant dense<0.000000e+00> : vector<64xf32>
    %19 = vector.multi_reduction <add>, %18, %cst_7 [1] : vector<64x16xf32> to vector<64xf32>
    %20 = vector.shape_cast %19 : vector<64xf32> to vector<64x1xf32>
    %21 = tpu.reciprocal %20 {approx = true} : vector<64x1xf32> -> vector<64x1xf32>
    %22 = vector.broadcast %21 : vector<64x1xf32> to vector<64x16xf32>
    %23 = arith.mulf %18, %22 : vector<64x16xf32>
    %24 = arith.truncf %23 : vector<64x16xf32> to vector<64x16xbf16>
    %cst_8 = arith.constant dense<0.000000e+00> : vector<64x16xf32>
    %25 = tpu.matmul %24, %9, %cst_8 {dimension_numbers = #tpu.dot_dimension_numbers<[1], [0], [0], [1], [0, 0, 1, 1], [], []>} : vector<64x16xbf16>, vector<16x16xbf16>, vector<64x16xf32> -> vector<64x16xf32>
    %26 = vector.extract_strided_slice %1 {offsets = [0, 16], sizes = [64, 16], strides = [1, 1]} : vector<64x32xf32> to vector<64x16xf32>
    %27 = arith.truncf %26 : vector<64x16xf32> to vector<64x16xbf16>
    %28 = vector.extract_strided_slice %3 {offsets = [0, 16], sizes = [16, 16], strides = [1, 1]} : vector<16x64xf32> to vector<16x16xf32>
    %29 = arith.truncf %28 : vector<16x16xf32> to vector<16x16xbf16>
    %30 = vector.extract_strided_slice %3 {offsets = [0, 48], sizes = [16, 16], strides = [1, 1]} : vector<16x64xf32> to vector<16x16xf32>
    %31 = arith.truncf %30 : vector<16x16xf32> to vector<16x16xbf16>
    %32 = tpu.transpose %29, [1, 0] : vector<16x16xbf16> -> vector<16x16xbf16>
    %cst_9 = arith.constant dense<0.000000e+00> : vector<64x16xf32>
    %33 = tpu.matmul %27, %32, %cst_9 {dimension_numbers = #tpu.dot_dimension_numbers<[1], [0], [0], [1], [0, 0, 1, 1], [], []>} : vector<64x16xbf16>, vector<16x16xbf16>, vector<64x16xf32> -> vector<64x16xf32>
    %cst_10 = arith.constant 2.500000e-01 : f32
    %34 = vector.broadcast %cst_10 : f32 to vector<64x16xf32>
    %35 = arith.mulf %33, %34 : vector<64x16xf32>
    %cst_11 = arith.constant dense<0xFF800000> : vector<64xf32>
    %36 = vector.multi_reduction <maximumf>, %35, %cst_11 [1] : vector<64x16xf32> to vector<64xf32>
    %37 = vector.shape_cast %36 : vector<64xf32> to vector<64x1xf32>
    %38 = vector.broadcast %37 : vector<64x1xf32> to vector<64x16xf32>
    %39 = arith.subf %35, %38 : vector<64x16xf32>
    %40 = math.exp %39 : vector<64x16xf32>
    %cst_12 = arith.constant dense<0.000000e+00> : vector<64xf32>
    %41 = vector.multi_reduction <add>, %40, %cst_12 [1] : vector<64x16xf32> to vector<64xf32>
    %42 = vector.shape_cast %41 : vector<64xf32> to vector<64x1xf32>
    %43 = tpu.reciprocal %42 {approx = true} : vector<64x1xf32> -> vector<64x1xf32>
    %44 = vector.broadcast %43 : vector<64x1xf32> to vector<64x16xf32>
    %45 = arith.mulf %40, %44 : vector<64x16xf32>
    %46 = arith.truncf %45 : vector<64x16xf32> to vector<64x16xbf16>
    %cst_13 = arith.constant dense<0.000000e+00> : vector<64x16xf32>
    %47 = tpu.matmul %46, %31, %cst_13 {dimension_numbers = #tpu.dot_dimension_numbers<[1], [0], [0], [1], [0, 0, 1, 1], [], []>} : vector<64x16xbf16>, vector<16x16xbf16>, vector<64x16xf32> -> vector<64x16xf32>
    %48 = tpu.concatenate %25, %47 in 1 : vector<64x16xf32>, vector<64x16xf32> -> vector<64x32xf32>
    %c0_14 = arith.constant 0 : index
    %c0_15 = arith.constant 0 : index
    %c0_16 = arith.constant 0 : index
    %49 = vector.load %arg4[%c0_14, %c0_15, %c0_16] : memref<1x64x32xf32, #tpu.memory_space<vmem>>, vector<1x64x32xf32>
    %50 = vector.shape_cast %49 : vector<1x64x32xf32> to vector<64x32xf32>
    %51 = vector.shape_cast %48 : vector<64x32xf32> to vector<1x64x32xf32>
    tpu.vector_store %arg4[%c0_14, %c0_15, %c0_16], %51 {strides = array<i32>} : memref<1x64x32xf32, #tpu.memory_space<vmem>>, vector<1x64x32xf32>,
    return
  }
  func.func @transform_0(%arg0: i32, %arg1: i32) -> (i32, i32, i32) {
    %c0_i32 = arith.constant 0 : i32
    %c0_i32_0 = arith.constant 0 : i32
    return %arg0, %arg1, %c0_i32 : i32, i32, i32
  }
  func.func @transform_1(%arg0: i32, %arg1: i32) -> (i32, i32, i32) {
    %c0_i32 = arith.constant 0 : i32
    %c0_i32_0 = arith.constant 0 : i32
    %c0_i32_1 = arith.constant 0 : i32
    return %arg0, %c0_i32, %c0_i32_0 : i32, i32, i32
  }
  func.func @transform_2(%arg0: i32, %arg1: i32) -> (i32, i32, i32) {
    %c0_i32 = arith.constant 0 : i32
    %c0_i32_0 = arith.constant 0 : i32
    return %arg0, %arg1, %c0_i32 : i32, i32, i32
  }
}

module attributes {stable_mosaic.version = 11 : i64} {
  func.func @_fused_linear_kernel(%arg0: i32, %arg1: memref<128x32xf32, #tpu.memory_space<vmem>>, %arg2: memref<32x32xf32, #tpu.memory_space<vmem>>, %arg3: memref<1x32xf32, #tpu.memory_space<vmem>>, %arg4: memref<128x32xf32, #tpu.memory_space<vmem>>, %arg5: memref<128x32xf32, #tpu.memory_space<vmem>>) attributes {dimension_semantics = [#tpu.dimension_semantics<parallel>], iteration_bounds = array<i64: 1>, scalar_prefetch = 0 : i64, scratch_operands = 0 : i64, tpu.core_type = #tpu.core_type<tc>, window_params = [{transform_indices = @transform_0, window_bounds = array<i64: 128, 32>}, {pipeline_mode = #tpu.pipeline_mode<synchronous>, transform_indices = @transform_1, window_bounds = array<i64: 32, 32>}, {pipeline_mode = #tpu.pipeline_mode<synchronous>, transform_indices = @transform_2, window_bounds = array<i64: 1, 32>}, {transform_indices = @transform_3, window_bounds = array<i64: 128, 32>}, {transform_indices = @transform_4, window_bounds = array<i64: 128, 32>}]} {
    %c0 = arith.constant 0 : index
    %c0_0 = arith.constant 0 : index
    %0 = vector.load %arg1[%c0, %c0_0] : memref<128x32xf32, #tpu.memory_space<vmem>>, vector<128x32xf32>
    %1 = arith.truncf %0 : vector<128x32xf32> to vector<128x32xbf16>
    %c0_1 = arith.constant 0 : index
    %c0_2 = arith.constant 0 : index
    %2 = vector.load %arg2[%c0_1, %c0_2] : memref<32x32xf32, #tpu.memory_space<vmem>>, vector<32x32xf32>
    %3 = arith.truncf %2 : vector<32x32xf32> to vector<32x32xbf16>
    %cst = arith.constant dense<0.000000e+00> : vector<128x32xf32>
    %4 = tpu.matmul %1, %3, %cst {dimension_numbers = #tpu.dot_dimension_numbers<[1], [0], [0], [1], [0, 0, 1, 1], [], []>} : vector<128x32xbf16>, vector<32x32xbf16>, vector<128x32xf32> -> vector<128x32xf32>
    %c0_3 = arith.constant 0 : index
    %c0_4 = arith.constant 0 : index
    %5 = vector.load %arg3[%c0_3, %c0_4] : memref<1x32xf32, #tpu.memory_space<vmem>>, vector<1x32xf32>
    %6 = vector.broadcast %5 : vector<1x32xf32> to vector<128x32xf32>
    %7 = arith.addf %4, %6 : vector<128x32xf32>
    %c0_5 = arith.constant 0 : index
    %c0_6 = arith.constant 0 : index
    %8 = vector.load %arg4[%c0_5, %c0_6] : memref<128x32xf32, #tpu.memory_space<vmem>>, vector<128x32xf32>
    %9 = arith.addf %7, %8 : vector<128x32xf32>
    %c0_7 = arith.constant 0 : index
    %c0_8 = arith.constant 0 : index
    %10 = vector.load %arg5[%c0_7, %c0_8] : memref<128x32xf32, #tpu.memory_space<vmem>>, vector<128x32xf32>
    tpu.vector_store %arg5[%c0_7, %c0_8], %9 {strides = array<i32>} : memref<128x32xf32, #tpu.memory_space<vmem>>, vector<128x32xf32>,
    return
  }
  func.func @transform_0(%arg0: i32) -> (i32, i32) {
    %c0_i32 = arith.constant 0 : i32
    %c0_i32_0 = arith.constant 0 : i32
    return %arg0, %c0_i32 : i32, i32
  }
  func.func @transform_1(%arg0: i32) -> (i32, i32) {
    %c0_i32 = arith.constant 0 : i32
    %c0_i32_0 = arith.constant 0 : i32
    %c0_i32_1 = arith.constant 0 : i32
    return %c0_i32, %c0_i32_0 : i32, i32
  }
  func.func @transform_2(%arg0: i32) -> (i32, i32) {
    %c0_i32 = arith.constant 0 : i32
    %c0_i32_0 = arith.constant 0 : i32
    %c0_i32_1 = arith.constant 0 : i32
    return %c0_i32, %c0_i32_0 : i32, i32
  }
  func.func @transform_3(%arg0: i32) -> (i32, i32) {
    %c0_i32 = arith.constant 0 : i32
    %c0_i32_0 = arith.constant 0 : i32
    return %arg0, %c0_i32 : i32, i32
  }
  func.func @transform_4(%arg0: i32) -> (i32, i32) {
    %c0_i32 = arith.constant 0 : i32
    %c0_i32_0 = arith.constant 0 : i32
    return %arg0, %c0_i32 : i32, i32
  }
}

module attributes {stable_mosaic.version = 11 : i64} {
  func.func @_fused_linear_kernel(%arg0: i32, %arg1: memref<128x32xf32, #tpu.memory_space<vmem>>, %arg2: memref<32x64xf32, #tpu.memory_space<vmem>>, %arg3: memref<1x64xf32, #tpu.memory_space<vmem>>, %arg4: memref<1x32xf32, #tpu.memory_space<vmem>>, %arg5: memref<1x32xf32, #tpu.memory_space<vmem>>, %arg6: memref<128x64xf32, #tpu.memory_space<vmem>>) attributes {dimension_semantics = [#tpu.dimension_semantics<parallel>], iteration_bounds = array<i64: 1>, scalar_prefetch = 0 : i64, scratch_operands = 0 : i64, tpu.core_type = #tpu.core_type<tc>, window_params = [{transform_indices = @transform_0, window_bounds = array<i64: 128, 32>}, {pipeline_mode = #tpu.pipeline_mode<synchronous>, transform_indices = @transform_1, window_bounds = array<i64: 32, 64>}, {pipeline_mode = #tpu.pipeline_mode<synchronous>, transform_indices = @transform_2, window_bounds = array<i64: 1, 64>}, {pipeline_mode = #tpu.pipeline_mode<synchronous>, transform_indices = @transform_3, window_bounds = array<i64: 1, 32>}, {pipeline_mode = #tpu.pipeline_mode<synchronous>, transform_indices = @transform_4, window_bounds = array<i64: 1, 32>}, {transform_indices = @transform_5, window_bounds = array<i64: 128, 64>}]} {
    %c0 = arith.constant 0 : index
    %c0_0 = arith.constant 0 : index
    %0 = vector.load %arg1[%c0, %c0_0] : memref<128x32xf32, #tpu.memory_space<vmem>>, vector<128x32xf32>
    %cst = arith.constant dense<0.000000e+00> : vector<128xf32>
    %1 = vector.multi_reduction <add>, %0, %cst [1] : vector<128x32xf32> to vector<128xf32>
    %2 = vector.shape_cast %1 : vector<128xf32> to vector<128x1xf32>
    %cst_1 = arith.constant 3.200000e+01 : f32
    %3 = vector.broadcast %cst_1 : f32 to vector<128x1xf32>
    %4 = arith.divf %2, %3 : vector<128x1xf32>
    %5 = vector.broadcast %4 : vector<128x1xf32> to vector<128x32xf32>
    %6 = arith.subf %0, %5 : vector<128x32xf32>
    %7 = arith.mulf %6, %6 : vector<128x32xf32>
    %cst_2 = arith.constant dense<0.000000e+00> : vector<128xf32>
    %8 = vector.multi_reduction <add>, %7, %cst_2 [1] : vector<128x32xf32> to vector<128xf32>
    %9 = vector.shape_cast %8 : vector<128xf32> to vector<128x1xf32>
    %cst_3 = arith.constant 3.200000e+01 : f32
    %10 = vector.broadcast %cst_3 : f32 to vector<128x1xf32>
    %11 = arith.divf %9, %10 : vector<128x1xf32>
    %12 = vector.broadcast %4 : vector<128x1xf32> to vector<128x32xf32>
    %13 = arith.subf %0, %12 : vector<128x32xf32>
    %cst_4 = arith.constant 9.99999974E-6 : f32
    %14 = vector.broadcast %cst_4 : f32 to vector<128x1xf32>
    %15 = arith.addf %11, %14 : vector<128x1xf32>
    %16 = math.rsqrt %15 : vector<128x1xf32>
    %17 = vector.broadcast %16 : vector<128x1xf32> to vector<128x32xf32>
    %18 = arith.mulf %13, %17 : vector<128x32xf32>
    %c0_5 = arith.constant 0 : index
    %c0_6 = arith.constant 0 : index
    %19 = vector.load %arg4[%c0_5, %c0_6] : memref<1x32xf32, #tpu.memory_space<vmem>>, vector<1x32xf32>
    %20 = vector.broadcast %19 : vector<1x32xf32> to vector<128x32xf32>
    %21 = arith.mulf %18, %20 : vector<128x32xf32>
    %c0_7 = arith.constant 0 : index
    %c0_8 = arith.constant 0 : index
    %22 = vector.load %arg5[%c0_7, %c0_8] : memref<1x32xf32, #tpu.memory_space<vmem>>, vector<1x32xf32>
    %23 = vector.broadcast %22 : vector<1x32xf32> to vector<128x32xf32>
    %24 = arith.addf %21, %23 : vector<128x32xf32>
    %25 = arith.truncf %24 : vector<128x32xf32> to vector<128x32xbf16>
    %c0_9 = arith.constant 0 : index
    %c0_10 = arith.constant 0 : index
    %26 = vector.load %arg2[%c0_9, %c0_10] : memref<32x64xf32, #tpu.memory_space<vmem>>, vector<32x64xf32>
    %27 = arith.truncf %26 : vector<32x64xf32> to vector<32x64xbf16>
    %cst_11 = arith.constant dense<0.000000e+00> : vector<128x64xf32>
    %28 = tpu.matmul %25, %27, %cst_11 {dimension_numbers = #tpu.dot_dimension_numbers<[1], [0], [0], [1], [0, 0, 1, 1], [], []>} : vector<128x32xbf16>, vector<32x64xbf16>, vector<128x64xf32> -> vector<128x64xf32>
    %c0_12 = arith.constant 0 : index
    %c0_13 = arith.constant 0 : index
    %29 = vector.load %arg3[%c0_12, %c0_13] : memref<1x64xf32, #tpu.memory_space<vmem>>, vector<1x64xf32>
    %30 = vector.broadcast %29 : vector<1x64xf32> to vector<128x64xf32>
    %31 = arith.addf %28, %30 : vector<128x64xf32>
    %c0_14 = arith.constant 0 : index
    %c0_15 = arith.constant 0 : index
    %32 = vector.load %arg6[%c0_14, %c0_15] : memref<128x64xf32, #tpu.memory_space<vmem>>, vector<128x64xf32>
    tpu.vector_store %arg6[%c0_14, %c0_15], %31 {strides = array<i32>} : memref<128x64xf32, #tpu.memory_space<vmem>>, vector<128x64xf32>,
    return
  }
  func.func @transform_0(%arg0: i32) -> (i32, i32) {
    %c0_i32 = arith.constant 0 : i32
    %c0_i32_0 = arith.constant 0 : i32
    return %arg0, %c0_i32 : i32, i32
  }
  func.func @transform_1(%arg0: i32) -> (i32, i32) {
    %c0_i32 = arith.constant 0 : i32
    %c0_i32_0 = arith.constant 0 : i32
    %c0_i32_1 = arith.constant 0 : i32
    return %c0_i32, %c0_i32_0 : i32, i32
  }
  func.func @transform_2(%arg0: i32) -> (i32, i32) {
    %c0_i32 = arith.constant 0 : i32
    %c0_i32_0 = arith.constant 0 : i32
    %c0_i32_1 = arith.constant 0 : i32
    return %c0_i32, %c0_i32_0 : i32, i32
  }
  func.func @transform_3(%arg0: i32) -> (i32, i32) {
    %c0_i32 = arith.constant 0 : i32
    %c0_i32_0 = arith.constant 0 : i32
    %c0_i32_1 = arith.constant 0 : i32
    return %c0_i32, %c0_i32_0 : i32, i32
  }
  func.func @transform_4(%arg0: i32) -> (i32, i32) {
    %c0_i32 = arith.constant 0 : i32
    %c0_i32_0 = arith.constant 0 : i32
    %c0_i32_1 = arith.constant 0 : i32
    return %c0_i32, %c0_i32_0 : i32, i32
  }
  func.func @transform_5(%arg0: i32) -> (i32, i32) {
    %c0_i32 = arith.constant 0 : i32
    %c0_i32_0 = arith.constant 0 : i32
    return %arg0, %c0_i32 : i32, i32
  }
}

module attributes {stable_mosaic.version = 11 : i64} {
  func.func @_dwconv3x3_kernel(%arg0: i32, %arg1: memref<1x10x10x64xf32, #tpu.memory_space<vmem>>, %arg2: memref<9x64xf32, #tpu.memory_space<vmem>>, %arg3: memref<1x64xf32, #tpu.memory_space<vmem>>, %arg4: memref<1x8x8x64xf32, #tpu.memory_space<vmem>>) attributes {dimension_semantics = [#tpu.dimension_semantics<parallel>], iteration_bounds = array<i64: 2>, scalar_prefetch = 0 : i64, scratch_operands = 0 : i64, tpu.core_type = #tpu.core_type<tc>, window_params = [{transform_indices = @transform_0, window_bounds = array<i64: 1, 10, 10, 64>}, {pipeline_mode = #tpu.pipeline_mode<synchronous>, transform_indices = @transform_1, window_bounds = array<i64: 9, 64>}, {pipeline_mode = #tpu.pipeline_mode<synchronous>, transform_indices = @transform_2, window_bounds = array<i64: 1, 64>}, {transform_indices = @transform_3, window_bounds = array<i64: 1, 8, 8, 64>}]} {
    %c0 = arith.constant 0 : index
    %c0_0 = arith.constant 0 : index
    %c0_1 = arith.constant 0 : index
    %c0_2 = arith.constant 0 : index
    %0 = vector.load %arg1[%c0, %c0_0, %c0_1, %c0_2] : memref<1x10x10x64xf32, #tpu.memory_space<vmem>>, vector<1x10x10x64xf32>
    %1 = vector.shape_cast %0 : vector<1x10x10x64xf32> to vector<10x10x64xf32>
    %c0_3 = arith.constant 0 : index
    %c0_4 = arith.constant 0 : index
    %2 = vector.load %arg2[%c0_3, %c0_4] : memref<9x64xf32, #tpu.memory_space<vmem>>, vector<9x64xf32>
    %cst = arith.constant 0.000000e+00 : f32
    %3 = vector.broadcast %cst : f32 to vector<8x8x64xf32>
    %4 = vector.extract_strided_slice %1 {offsets = [0, 0, 0], sizes = [8, 8, 64], strides = [1, 1, 1]} : vector<10x10x64xf32> to vector<8x8x64xf32>
    %5 = vector.extract_strided_slice %2 {offsets = [0, 0], sizes = [1, 64], strides = [1, 1]} : vector<9x64xf32> to vector<1x64xf32>
    %6 = vector.shape_cast %5 : vector<1x64xf32> to vector<64xf32>
    %7 = vector.shape_cast %6 : vector<64xf32> to vector<1x1x64xf32>
    %8 = vector.broadcast %7 : vector<1x1x64xf32> to vector<8x8x64xf32>
    %9 = arith.mulf %4, %8 : vector<8x8x64xf32>
    %10 = arith.addf %3, %9 : vector<8x8x64xf32>
    %11 = vector.extract_strided_slice %1 {offsets = [0, 1, 0], sizes = [8, 8, 64], strides = [1, 1, 1]} : vector<10x10x64xf32> to vector<8x8x64xf32>
    %12 = vector.extract_strided_slice %2 {offsets = [1, 0], sizes = [1, 64], strides = [1, 1]} : vector<9x64xf32> to vector<1x64xf32>
    %13 = vector.shape_cast %12 : vector<1x64xf32> to vector<64xf32>
    %14 = vector.shape_cast %13 : vector<64xf32> to vector<1x1x64xf32>
    %15 = vector.broadcast %14 : vector<1x1x64xf32> to vector<8x8x64xf32>
    %16 = arith.mulf %11, %15 : vector<8x8x64xf32>
    %17 = arith.addf %10, %16 : vector<8x8x64xf32>
    %18 = vector.extract_strided_slice %1 {offsets = [0, 2, 0], sizes = [8, 8, 64], strides = [1, 1, 1]} : vector<10x10x64xf32> to vector<8x8x64xf32>
    %19 = vector.extract_strided_slice %2 {offsets = [2, 0], sizes = [1, 64], strides = [1, 1]} : vector<9x64xf32> to vector<1x64xf32>
    %20 = vector.shape_cast %19 : vector<1x64xf32> to vector<64xf32>
    %21 = vector.shape_cast %20 : vector<64xf32> to vector<1x1x64xf32>
    %22 = vector.broadcast %21 : vector<1x1x64xf32> to vector<8x8x64xf32>
    %23 = arith.mulf %18, %22 : vector<8x8x64xf32>
    %24 = arith.addf %17, %23 : vector<8x8x64xf32>
    %25 = vector.extract_strided_slice %1 {offsets = [1, 0, 0], sizes = [8, 8, 64], strides = [1, 1, 1]} : vector<10x10x64xf32> to vector<8x8x64xf32>
    %26 = vector.extract_strided_slice %2 {offsets = [3, 0], sizes = [1, 64], strides = [1, 1]} : vector<9x64xf32> to vector<1x64xf32>
    %27 = vector.shape_cast %26 : vector<1x64xf32> to vector<64xf32>
    %28 = vector.shape_cast %27 : vector<64xf32> to vector<1x1x64xf32>
    %29 = vector.broadcast %28 : vector<1x1x64xf32> to vector<8x8x64xf32>
    %30 = arith.mulf %25, %29 : vector<8x8x64xf32>
    %31 = arith.addf %24, %30 : vector<8x8x64xf32>
    %32 = vector.extract_strided_slice %1 {offsets = [1, 1, 0], sizes = [8, 8, 64], strides = [1, 1, 1]} : vector<10x10x64xf32> to vector<8x8x64xf32>
    %33 = vector.extract_strided_slice %2 {offsets = [4, 0], sizes = [1, 64], strides = [1, 1]} : vector<9x64xf32> to vector<1x64xf32>
    %34 = vector.shape_cast %33 : vector<1x64xf32> to vector<64xf32>
    %35 = vector.shape_cast %34 : vector<64xf32> to vector<1x1x64xf32>
    %36 = vector.broadcast %35 : vector<1x1x64xf32> to vector<8x8x64xf32>
    %37 = arith.mulf %32, %36 : vector<8x8x64xf32>
    %38 = arith.addf %31, %37 : vector<8x8x64xf32>
    %39 = vector.extract_strided_slice %1 {offsets = [1, 2, 0], sizes = [8, 8, 64], strides = [1, 1, 1]} : vector<10x10x64xf32> to vector<8x8x64xf32>
    %40 = vector.extract_strided_slice %2 {offsets = [5, 0], sizes = [1, 64], strides = [1, 1]} : vector<9x64xf32> to vector<1x64xf32>
    %41 = vector.shape_cast %40 : vector<1x64xf32> to vector<64xf32>
    %42 = vector.shape_cast %41 : vector<64xf32> to vector<1x1x64xf32>
    %43 = vector.broadcast %42 : vector<1x1x64xf32> to vector<8x8x64xf32>
    %44 = arith.mulf %39, %43 : vector<8x8x64xf32>
    %45 = arith.addf %38, %44 : vector<8x8x64xf32>
    %46 = vector.extract_strided_slice %1 {offsets = [2, 0, 0], sizes = [8, 8, 64], strides = [1, 1, 1]} : vector<10x10x64xf32> to vector<8x8x64xf32>
    %47 = vector.extract_strided_slice %2 {offsets = [6, 0], sizes = [1, 64], strides = [1, 1]} : vector<9x64xf32> to vector<1x64xf32>
    %48 = vector.shape_cast %47 : vector<1x64xf32> to vector<64xf32>
    %49 = vector.shape_cast %48 : vector<64xf32> to vector<1x1x64xf32>
    %50 = vector.broadcast %49 : vector<1x1x64xf32> to vector<8x8x64xf32>
    %51 = arith.mulf %46, %50 : vector<8x8x64xf32>
    %52 = arith.addf %45, %51 : vector<8x8x64xf32>
    %53 = vector.extract_strided_slice %1 {offsets = [2, 1, 0], sizes = [8, 8, 64], strides = [1, 1, 1]} : vector<10x10x64xf32> to vector<8x8x64xf32>
    %54 = vector.extract_strided_slice %2 {offsets = [7, 0], sizes = [1, 64], strides = [1, 1]} : vector<9x64xf32> to vector<1x64xf32>
    %55 = vector.shape_cast %54 : vector<1x64xf32> to vector<64xf32>
    %56 = vector.shape_cast %55 : vector<64xf32> to vector<1x1x64xf32>
    %57 = vector.broadcast %56 : vector<1x1x64xf32> to vector<8x8x64xf32>
    %58 = arith.mulf %53, %57 : vector<8x8x64xf32>
    %59 = arith.addf %52, %58 : vector<8x8x64xf32>
    %60 = vector.extract_strided_slice %1 {offsets = [2, 2, 0], sizes = [8, 8, 64], strides = [1, 1, 1]} : vector<10x10x64xf32> to vector<8x8x64xf32>
    %61 = vector.extract_strided_slice %2 {offsets = [8, 0], sizes = [1, 64], strides = [1, 1]} : vector<9x64xf32> to vector<1x64xf32>
    %62 = vector.shape_cast %61 : vector<1x64xf32> to vector<64xf32>
    %63 = vector.shape_cast %62 : vector<64xf32> to vector<1x1x64xf32>
    %64 = vector.broadcast %63 : vector<1x1x64xf32> to vector<8x8x64xf32>
    %65 = arith.mulf %60, %64 : vector<8x8x64xf32>
    %66 = arith.addf %59, %65 : vector<8x8x64xf32>
    %c0_5 = arith.constant 0 : index
    %c0_6 = arith.constant 0 : index
    %67 = vector.load %arg3[%c0_5, %c0_6] : memref<1x64xf32, #tpu.memory_space<vmem>>, vector<1x64xf32>
    %68 = vector.shape_cast %67 : vector<1x64xf32> to vector<1x1x64xf32>
    %69 = vector.broadcast %68 : vector<1x1x64xf32> to vector<8x8x64xf32>
    %70 = arith.addf %66, %69 : vector<8x8x64xf32>
    %c0_7 = arith.constant 0 : index
    %c0_8 = arith.constant 0 : index
    %c0_9 = arith.constant 0 : index
    %c0_10 = arith.constant 0 : index
    %71 = vector.load %arg4[%c0_7, %c0_8, %c0_9, %c0_10] : memref<1x8x8x64xf32, #tpu.memory_space<vmem>>, vector<1x8x8x64xf32>
    %72 = vector.shape_cast %71 : vector<1x8x8x64xf32> to vector<8x8x64xf32>
    %73 = vector.shape_cast %70 : vector<8x8x64xf32> to vector<1x8x8x64xf32>
    tpu.vector_store %arg4[%c0_7, %c0_8, %c0_9, %c0_10], %73 {strides = array<i32>} : memref<1x8x8x64xf32, #tpu.memory_space<vmem>>, vector<1x8x8x64xf32>,
    return
  }
  func.func @transform_0(%arg0: i32) -> (i32, i32, i32, i32) {
    %c0_i32 = arith.constant 0 : i32
    %c0_i32_0 = arith.constant 0 : i32
    %c0_i32_1 = arith.constant 0 : i32
    %c0_i32_2 = arith.constant 0 : i32
    return %arg0, %c0_i32, %c0_i32_0, %c0_i32_1 : i32, i32, i32, i32
  }
  func.func @transform_1(%arg0: i32) -> (i32, i32) {
    %c0_i32 = arith.constant 0 : i32
    %c0_i32_0 = arith.constant 0 : i32
    %c0_i32_1 = arith.constant 0 : i32
    return %c0_i32, %c0_i32_0 : i32, i32
  }
  func.func @transform_2(%arg0: i32) -> (i32, i32) {
    %c0_i32 = arith.constant 0 : i32
    %c0_i32_0 = arith.constant 0 : i32
    %c0_i32_1 = arith.constant 0 : i32
    return %c0_i32, %c0_i32_0 : i32, i32
  }
  func.func @transform_3(%arg0: i32) -> (i32, i32, i32, i32) {
    %c0_i32 = arith.constant 0 : i32
    %c0_i32_0 = arith.constant 0 : i32
    %c0_i32_1 = arith.constant 0 : i32
    %c0_i32_2 = arith.constant 0 : i32
    return %arg0, %c0_i32, %c0_i32_0, %c0_i32_1 : i32, i32, i32, i32
  }
}

module attributes {stable_mosaic.version = 11 : i64} {
  func.func @_fused_linear_kernel(%arg0: i32, %arg1: memref<128x64xf32, #tpu.memory_space<vmem>>, %arg2: memref<64x32xf32, #tpu.memory_space<vmem>>, %arg3: memref<1x32xf32, #tpu.memory_space<vmem>>, %arg4: memref<128x32xf32, #tpu.memory_space<vmem>>, %arg5: memref<128x32xf32, #tpu.memory_space<vmem>>) attributes {dimension_semantics = [#tpu.dimension_semantics<parallel>], iteration_bounds = array<i64: 1>, scalar_prefetch = 0 : i64, scratch_operands = 0 : i64, tpu.core_type = #tpu.core_type<tc>, window_params = [{transform_indices = @transform_0, window_bounds = array<i64: 128, 64>}, {pipeline_mode = #tpu.pipeline_mode<synchronous>, transform_indices = @transform_1, window_bounds = array<i64: 64, 32>}, {pipeline_mode = #tpu.pipeline_mode<synchronous>, transform_indices = @transform_2, window_bounds = array<i64: 1, 32>}, {transform_indices = @transform_3, window_bounds = array<i64: 128, 32>}, {transform_indices = @transform_4, window_bounds = array<i64: 128, 32>}]} {
    %c0 = arith.constant 0 : index
    %c0_0 = arith.constant 0 : index
    %0 = vector.load %arg1[%c0, %c0_0] : memref<128x64xf32, #tpu.memory_space<vmem>>, vector<128x64xf32>
    %1 = arith.mulf %0, %0 : vector<128x64xf32>
    %2 = arith.mulf %0, %1 : vector<128x64xf32>
    %cst = arith.constant 4.471500e-02 : f32
    %3 = vector.broadcast %cst : f32 to vector<128x64xf32>
    %4 = arith.mulf %3, %2 : vector<128x64xf32>
    %5 = arith.addf %0, %4 : vector<128x64xf32>
    %cst_1 = arith.constant 0.797884583 : f32
    %6 = vector.broadcast %cst_1 : f32 to vector<128x64xf32>
    %7 = arith.mulf %6, %5 : vector<128x64xf32>
    %8 = math.tanh %7 : vector<128x64xf32>
    %cst_2 = arith.constant 1.000000e+00 : f32
    %9 = vector.broadcast %cst_2 : f32 to vector<128x64xf32>
    %10 = arith.addf %9, %8 : vector<128x64xf32>
    %cst_3 = arith.constant 5.000000e-01 : f32
    %11 = vector.broadcast %cst_3 : f32 to vector<128x64xf32>
    %12 = arith.mulf %11, %10 : vector<128x64xf32>
    %13 = arith.mulf %0, %12 : vector<128x64xf32>
    %14 = arith.truncf %13 : vector<128x64xf32> to vector<128x64xbf16>
    %c0_4 = arith.constant 0 : index
    %c0_5 = arith.constant 0 : index
    %15 = vector.load %arg2[%c0_4, %c0_5] : memref<64x32xf32, #tpu.memory_space<vmem>>, vector<64x32xf32>
    %16 = arith.truncf %15 : vector<64x32xf32> to vector<64x32xbf16>
    %cst_6 = arith.constant dense<0.000000e+00> : vector<128x32xf32>
    %17 = tpu.matmul %14, %16, %cst_6 {dimension_numbers = #tpu.dot_dimension_numbers<[1], [0], [0], [1], [0, 0, 1, 1], [], []>} : vector<128x64xbf16>, vector<64x32xbf16>, vector<128x32xf32> -> vector<128x32xf32>
    %c0_7 = arith.constant 0 : index
    %c0_8 = arith.constant 0 : index
    %18 = vector.load %arg3[%c0_7, %c0_8] : memref<1x32xf32, #tpu.memory_space<vmem>>, vector<1x32xf32>
    %19 = vector.broadcast %18 : vector<1x32xf32> to vector<128x32xf32>
    %20 = arith.addf %17, %19 : vector<128x32xf32>
    %c0_9 = arith.constant 0 : index
    %c0_10 = arith.constant 0 : index
    %21 = vector.load %arg4[%c0_9, %c0_10] : memref<128x32xf32, #tpu.memory_space<vmem>>, vector<128x32xf32>
    %22 = arith.addf %20, %21 : vector<128x32xf32>
    %c0_11 = arith.constant 0 : index
    %c0_12 = arith.constant 0 : index
    %23 = vector.load %arg5[%c0_11, %c0_12] : memref<128x32xf32, #tpu.memory_space<vmem>>, vector<128x32xf32>
    tpu.vector_store %arg5[%c0_11, %c0_12], %22 {strides = array<i32>} : memref<128x32xf32, #tpu.memory_space<vmem>>, vector<128x32xf32>,
    return
  }
  func.func @transform_0(%arg0: i32) -> (i32, i32) {
    %c0_i32 = arith.constant 0 : i32
    %c0_i32_0 = arith.constant 0 : i32
    return %arg0, %c0_i32 : i32, i32
  }
  func.func @transform_1(%arg0: i32) -> (i32, i32) {
    %c0_i32 = arith.constant 0 : i32
    %c0_i32_0 = arith.constant 0 : i32
    %c0_i32_1 = arith.constant 0 : i32
    return %c0_i32, %c0_i32_0 : i32, i32
  }
  func.func @transform_2(%arg0: i32) -> (i32, i32) {
    %c0_i32 = arith.constant 0 : i32
    %c0_i32_0 = arith.constant 0 : i32
    %c0_i32_1 = arith.constant 0 : i32
    return %c0_i32, %c0_i32_0 : i32, i32
  }
  func.func @transform_3(%arg0: i32) -> (i32, i32) {
    %c0_i32 = arith.constant 0 : i32
    %c0_i32_0 = arith.constant 0 : i32
    return %arg0, %c0_i32 : i32, i32
  }
  func.func @transform_4(%arg0: i32) -> (i32, i32) {
    %c0_i32 = arith.constant 0 : i32
    %c0_i32_0 = arith.constant 0 : i32
    return %arg0, %c0_i32 : i32, i32
  }
}

module attributes {stable_mosaic.version = 11 : i64} {
  func.func @_layernorm_kernel(%arg0: i32, %arg1: memref<128x32xf32, #tpu.memory_space<vmem>>, %arg2: memref<1x32xf32, #tpu.memory_space<vmem>>, %arg3: memref<1x32xf32, #tpu.memory_space<vmem>>, %arg4: memref<128x32xf32, #tpu.memory_space<vmem>>) attributes {dimension_semantics = [#tpu.dimension_semantics<parallel>], iteration_bounds = array<i64: 1>, scalar_prefetch = 0 : i64, scratch_operands = 0 : i64, tpu.core_type = #tpu.core_type<tc>, window_params = [{transform_indices = @transform_0, window_bounds = array<i64: 128, 32>}, {pipeline_mode = #tpu.pipeline_mode<synchronous>, transform_indices = @transform_1, window_bounds = array<i64: 1, 32>}, {pipeline_mode = #tpu.pipeline_mode<synchronous>, transform_indices = @transform_2, window_bounds = array<i64: 1, 32>}, {transform_indices = @transform_3, window_bounds = array<i64: 128, 32>}]} {
    %c0 = arith.constant 0 : index
    %c0_0 = arith.constant 0 : index
    %0 = vector.load %arg1[%c0, %c0_0] : memref<128x32xf32, #tpu.memory_space<vmem>>, vector<128x32xf32>
    %cst = arith.constant dense<0.000000e+00> : vector<128xf32>
    %1 = vector.multi_reduction <add>, %0, %cst [1] : vector<128x32xf32> to vector<128xf32>
    %2 = vector.shape_cast %1 : vector<128xf32> to vector<128x1xf32>
    %cst_1 = arith.constant 3.200000e+01 : f32
    %3 = vector.broadcast %cst_1 : f32 to vector<128x1xf32>
    %4 = arith.divf %2, %3 : vector<128x1xf32>
    %5 = vector.broadcast %4 : vector<128x1xf32> to vector<128x32xf32>
    %6 = arith.subf %0, %5 : vector<128x32xf32>
    %7 = arith.mulf %6, %6 : vector<128x32xf32>
    %cst_2 = arith.constant dense<0.000000e+00> : vector<128xf32>
    %8 = vector.multi_reduction <add>, %7, %cst_2 [1] : vector<128x32xf32> to vector<128xf32>
    %9 = vector.shape_cast %8 : vector<128xf32> to vector<128x1xf32>
    %cst_3 = arith.constant 3.200000e+01 : f32
    %10 = vector.broadcast %cst_3 : f32 to vector<128x1xf32>
    %11 = arith.divf %9, %10 : vector<128x1xf32>
    %12 = vector.broadcast %4 : vector<128x1xf32> to vector<128x32xf32>
    %13 = arith.subf %0, %12 : vector<128x32xf32>
    %cst_4 = arith.constant 9.99999974E-6 : f32
    %14 = vector.broadcast %cst_4 : f32 to vector<128x1xf32>
    %15 = arith.addf %11, %14 : vector<128x1xf32>
    %16 = math.rsqrt %15 : vector<128x1xf32>
    %17 = vector.broadcast %16 : vector<128x1xf32> to vector<128x32xf32>
    %18 = arith.mulf %13, %17 : vector<128x32xf32>
    %c0_5 = arith.constant 0 : index
    %c0_6 = arith.constant 0 : index
    %19 = vector.load %arg2[%c0_5, %c0_6] : memref<1x32xf32, #tpu.memory_space<vmem>>, vector<1x32xf32>
    %20 = vector.broadcast %19 : vector<1x32xf32> to vector<128x32xf32>
    %21 = arith.mulf %18, %20 : vector<128x32xf32>
    %c0_7 = arith.constant 0 : index
    %c0_8 = arith.constant 0 : index
    %22 = vector.load %arg3[%c0_7, %c0_8] : memref<1x32xf32, #tpu.memory_space<vmem>>, vector<1x32xf32>
    %23 = vector.broadcast %22 : vector<1x32xf32> to vector<128x32xf32>
    %24 = arith.addf %21, %23 : vector<128x32xf32>
    %c0_9 = arith.constant 0 : index
    %c0_10 = arith.constant 0 : index
    %25 = vector.load %arg4[%c0_9, %c0_10] : memref<128x32xf32, #tpu.memory_space<vmem>>, vector<128x32xf32>
    tpu.vector_store %arg4[%c0_9, %c0_10], %24 {strides = array<i32>} : memref<128x32xf32, #tpu.memory_space<vmem>>, vector<128x32xf32>,
    return
  }
  func.func @transform_0(%arg0: i32) -> (i32, i32) {
    %c0_i32 = arith.constant 0 : i32
    %c0_i32_0 = arith.constant 0 : i32
    return %arg0, %c0_i32 : i32, i32
  }
  func.func @transform_1(%arg0: i32) -> (i32, i32) {
    %c0_i32 = arith.constant 0 : i32
    %c0_i32_0 = arith.constant 0 : i32
    %c0_i32_1 = arith.constant 0 : i32
    return %c0_i32, %c0_i32_0 : i32, i32
  }
  func.func @transform_2(%arg0: i32) -> (i32, i32) {
    %c0_i32 = arith.constant 0 : i32
    %c0_i32_0 = arith.constant 0 : i32
    %c0_i32_1 = arith.constant 0 : i32
    return %c0_i32, %c0_i32_0 : i32, i32
  }
  func.func @transform_3(%arg0: i32) -> (i32, i32) {
    %c0_i32 = arith.constant 0 : i32
    %c0_i32_0 = arith.constant 0 : i32
    return %arg0, %c0_i32 : i32, i32
  }
}

</mosaic_0001>

<bundles_post_ra>
// kernel: encoder_stage.18
= control target key start
LH: loop header
LB: loop body
LE: loop exit
PB: predicated region body
PF: predicated region fallthrough
CT: control target
= control target key end

     0   :  { %vm82_vm0 = vcmask 1041408   ;;  %vm57_vm1 = vcmask 293888   ;;  %vm135_vm2 = vcmask 261120   ;;  %s1139_s1 = inlined_call_operand.vmem [shape: f32[36,32], index: 1, kind: input, shape index: {}]   ;;  %s1140_s0 = inlined_call_operand.vmem [shape: f32[128,36], index: 0, kind: input, shape index: {}]   ;;  %s1141_s2 = inlined_call_operand.vmem [shape: f32[1,32], index: 2, kind: input, shape index: {}]   ;;  %s1142_s3 = inlined_call_operand.vmem [shape: f32[1,32], index: 3, kind: input, shape index: {}]   ;;  %s1143_s4 = inlined_call_operand.vmem [shape: f32[1,32], index: 4, kind: input, shape index: {}]   ;;  %s1144_s5 = inlined_call_operand.vmem [shape: f32[128,32], index: 5, kind: output, shape index: {}]  }
   0x1   :  { %v49_v0 = vld [vmem:[%s1139_s1 + $0x20] sm:$0xf]  ;;  %v47_v2 = vld [vmem:[%s1139_s1 + $0x10] sm:$0xff]  ;;  %v48_v3 = vld [vmem:[%s1139_s1 + $0x18] sm:$0xff] }
   0x2   :  { %v52_v1 = vpack.c.bf16 %v49_v0, %v49_v0  ;;  %v51_v5 = vpack.c.bf16 %v48_v3, %v47_v2  ;;  %v45_v6 = vld [vmem:[%s1139_s1] sm:$0xff]  ;;  %v46_v7 = vld [vmem:[%s1139_s1 + $0x8] sm:$0xff]  ;;  %v23_v21 = vld [vmem:[%s1140_s0 + $0x10] sm:$0xff] }
   0x3   :  { %v21_v8 = vld [vmem:[%s1140_s0] sm:$0xff]  ;;  %v22_v9 = vld [vmem:[%s1140_s0 + $0x8] sm:$0xff]  ;;  %v50_v10 = vpack.c.bf16 %v46_v7, %v45_v6  ;;  %v24_v22 = vld [vmem:[%s1140_s0 + $0x18] sm:$0xff] }
   0x4   :  { %v84_v4 = vsel %vm82_vm0, %v52_v1, 0  ;;  %v25_v11 = vld [vmem:[%s1140_s0 + $0x20] sm:$0xff]  ;;  %v26_v12 = vld [vmem:[%s1140_s0 + $0x28] sm:$0xff]  ;;  %v37_v17 = vpack.c.bf16 %v22_v9, %v21_v8  ;;  %v31_v23 = vld [vmem:[%s1140_s0 + $0x50] sm:$0xff]  ;;  %v38_v29 = vpack.c.bf16 %v24_v22, %v23_v21 }
   0x5   :  { %91 = vmatpush.bf16.msra.mxu0 %v84_v4  ;;  %563 = vmatpush.bf16.msra.mxu1 %v84_v4  ;;  %v29_v13 = vld [vmem:[%s1140_s0 + $0x40] sm:$0xff]  ;;  %v30_v14 = vld [vmem:[%s1140_s0 + $0x48] sm:$0xff]  ;;  %v39_v18 = vpack.c.bf16 %v26_v12, %v25_v11  ;;  %v27_v24 = vld [vmem:[%s1140_s0 + $0x30] sm:$0xff] }
   0x6   :  { %564 = vmatpush.bf16.msra.mxu2 %v84_v4  ;;  %565 = vmatpush.bf16.msra.mxu3 %v84_v4  ;;  %v33_v15 = vld [vmem:[%s1140_s0 + $0x60] sm:$0xff]  ;;  %v34_v16 = vld [vmem:[%s1140_s0 + $0x68] sm:$0xff]  ;;  %v41_v19 = vpack.c.bf16 %v30_v14, %v29_v13  ;;  %v28_v25 = vld [vmem:[%s1140_s0 + $0x38] sm:$0xff] }
   0x7   :  { %v43_v20 = vpack.c.bf16 %v34_v16, %v33_v15  ;;  %v32_v26 = vld [vmem:[%s1140_s0 + $0x58] sm:$0xff]  ;;  %v35_v27 = vld [vmem:[%s1140_s0 + $0x70] sm:$0xff]  ;;  %v40_v30 = vpack.c.bf16 %v28_v25, %v27_v24  ;;  %v715_v33 = vld [vmem:[%s1141_s2] ss:$0 sm:$0xff] }
   0x8   :  { %v36_v28 = vld [vmem:[%s1140_s0 + $0x78] sm:$0xff]  ;;  %v42_v31 = vpack.c.bf16 %v32_v26, %v31_v23 }
   0x9   :  { %92 = vmatpush.bf16.msra.mxu0 %v51_v5  ;;  %566 = vmatpush.bf16.msra.mxu1 %v51_v5  ;;  %v44_v32 = vpack.c.bf16 %v36_v28, %v35_v27 }
   0xa   :  { %567 = vmatpush.bf16.msra.mxu2 %v51_v5  ;;  %568 = vmatpush.bf16.msra.mxu3 %v51_v5 }
   0xd   :  { %93 = vmatpush.bf16.msra.mxu0 %v50_v10  ;;  %569 = vmatpush.bf16.msra.mxu1 %v50_v10 }
   0xe   :  { %570 = vmatpush.bf16.msra.mxu2 %v50_v10  ;;  %571 = vmatpush.bf16.msra.mxu3 %v50_v10 }
  0x10   :  { %555 = vmatmul.msk.bf16.vlgmr.msra.gmra.mxu0 %vm57_vm1, %v37_v17  ;;  %557 = vmatmul.msk.bf16.vlgmr.msra.gmra.mxu1 %vm57_vm1, %v39_v18  ;;  %v610_v18 = vmov 32.0  }
  0x11   :  { %559 = vmatmul.msk.bf16.vlgmr.msra.gmra.mxu2 %vm57_vm1, %v41_v19  ;;  %561 = vmatmul.msk.bf16.vlgmr.msra.gmra.mxu3 %vm57_vm1, %v43_v20  ;;  %576 = vrcp.f32 %v610_v18 }
  0x17   :  { %v577_v19 = vpop.eup %576 }
  0x18   :  { %v185_v20 = vmul.f32 32.0, %v577_v19  ;;  %vm189_vm3 = vweird.f32 %v577_v19 }
  0x1a   :  { %v186_v21 = vsub.f32 1.0, %v185_v20 }
  0x1c   :  { %v187_v22 = vmul.f32 %v577_v19, %v186_v21 }
  0x1e   :  { %v188_v23 = vadd.f32 %v577_v19, %v187_v22 }
  0x20   :  { %556 = vmatmul.msk.bf16.gmra.mxu0 %vm57_vm1, %v38_v29  ;;  %558 = vmatmul.msk.bf16.gmra.mxu1 %vm57_vm1, %v40_v30  ;;  %v797_v24 = vsel %vm189_vm3, %v577_v19, %v188_v23 }
  0x21   :  { %560 = vmatmul.msk.bf16.gmra.mxu2 %vm57_vm1, %v42_v31  ;;  %562 = vmatmul.msk.bf16.gmra.mxu3 %vm57_vm1, %v44_v32 }
  0x8d   :  { %v95_v34 = vpop.f32.mrf.mxu0  ;;  %v105_v35 = vpop.f32.mrf.mxu1 }
  0x8e   :  { %v718_v36 = vadd.f32 %v715_v33, %v95_v34  ;;  %v721_v37 = vadd.f32 %v715_v33, %v105_v35 }
  0x90   :  { %v148_v38 = vsel %vm135_vm2, %v721_v37, 0.0  ;;  %v136_v39 = vsel %vm135_vm2, %v718_v36, 0.0 }
  0x91   :  { %149 = vadd.xlane.f32.xlu2 %v148_v38  ;;  %137 = vadd.xlane.f32.xlu0 %v136_v39 }
  0x94   :  { %v115_v40 = vpop.f32.mrf.mxu2  ;;  %v125_v41 = vpop.f32.mrf.mxu3 }
  0x95   :  { %v728_v42 = vadd.f32 %v715_v33, %v115_v40  ;;  %v731_v43 = vadd.f32 %v715_v33, %v125_v41  ;;  %v97_v44 = vpop.f32.mrf.mxu0  ;;  %v107_v47 = vpop.f32.mrf.mxu1 }
  0x96   :  { %v738_v48 = vadd.f32 %v715_v33, %v97_v44  ;;  %v741_v49 = vadd.f32 %v715_v33, %v107_v47 }
  0x97   :  { %v160_v45 = vsel %vm135_vm2, %v728_v42, 0.0  ;;  %v172_v46 = vsel %vm135_vm2, %v731_v43, 0.0 }
  0x98   :  { %v151_v55 = vsel %vm135_vm2, %v741_v49, 0.0  ;;  %v139_v56 = vsel %vm135_vm2, %v738_v48, 0.0 }
  0x99   :  { %161 = vadd.xlane.f32.xlu2 %v160_v45  ;;  %173 = vadd.xlane.f32.xlu0 %v172_v46 }
  0x9c   :  { %v117_v50 = vpop.f32.mrf.mxu2  ;;  %v127_v51 = vpop.f32.mrf.mxu3 }
  0x9d   :  { %v744_v52 = vadd.f32 %v715_v33, %v127_v51  ;;  %v100_v54 = vpop.f32.mrf.mxu0  ;;  %v756_v58 = vadd.f32 %v715_v33, %v117_v50  ;;  %v110_v0 = vpop.f32.mrf.mxu1 }
  0x9e   :  { %v753_v57 = vadd.f32 %v715_v33, %v100_v54  ;;  %v766_v1 = vadd.f32 %v715_v33, %v110_v0 }
  0x9f   :  { %v175_v53 = vsel %vm135_vm2, %v744_v52, 0.0  ;;  %v163_v62 = vsel %vm135_vm2, %v756_v58, 0.0 }
  0xa0   :  { %176 = vadd.xlane.f32.xlu1 %v175_v53  ;;  %v142_v60 = vsel %vm135_vm2, %v753_v57, 0.0  ;;  %v154_v5 = vsel %vm135_vm2, %v766_v1, 0.0 }
  0xa1   :  { %152 = vadd.xlane.f32.xlu2 %v151_v55  ;;  %140 = vadd.xlane.f32.xlu0 %v139_v56 }
  0xa4   :  { %v120_v59 = vpop.f32.mrf.mxu2  ;;  %v130_v61 = vpop.f32.mrf.mxu3 }
  0xa5   :  { %v763_v63 = vadd.f32 %v715_v33, %v120_v59  ;;  %v102_v8 = vpop.f32.mrf.mxu0  ;;  %v778_v9 = vadd.f32 %v715_v33, %v130_v61  ;;  %v112_v15 = vpop.f32.mrf.mxu1 }
  0xa6   :  { %v784_v11 = vadd.f32 %v715_v33, %v102_v8  ;;  %v793_v16 = vadd.f32 %v715_v33, %v112_v15 }
  0xa7   :  { %v166_v4 = vsel %vm135_vm2, %v763_v63, 0.0  ;;  %v178_v12 = vsel %vm135_vm2, %v778_v9, 0.0 }
  0xa8   :  { %143 = vadd.xlane.f32.xlu1 %v142_v60  ;;  %v145_v14 = vsel %vm135_vm2, %v784_v11, 0.0  ;;  %v157_v17 = vsel %vm135_vm2, %v793_v16, 0.0 }
  0xa9   :  { %164 = vadd.xlane.f32.xlu0 %v163_v62 }
  0xac   :  { %v122_v2 = vpop.f32.mrf.mxu2  ;;  %v132_v7 = vpop.f32.mrf.mxu3 }
  0xad   :  { %v769_v3 = vadd.f32 %v715_v33, %v122_v2  ;;  %v781_v10 = vadd.f32 %v715_v33, %v132_v7 }
  0xaf   :  { %v169_v6 = vsel %vm135_vm2, %v769_v3, 0.0  ;;  %v181_v13 = vsel %vm135_vm2, %v781_v10, 0.0 }
  0xb0   :  { %170 = vadd.xlane.f32.xlu2 %v169_v6  ;;  %167 = vadd.xlane.f32.xlu1 %v166_v4 }
  0xb1   :  { %155 = vadd.xlane.f32.xlu0 %v154_v5 }
  0xb8   :  { %179 = vadd.xlane.f32.xlu2 %v178_v12  ;;  %146 = vadd.xlane.f32.xlu1 %v145_v14 }
  0xb9   :  { %182 = vadd.xlane.f32.xlu0 %v181_v13 }
  0xc0   :  { %158 = vadd.xlane.f32.xlu1 %v157_v17 }
 0x104   :  { %v150_v25 = vpop.xlane.xlu2 %149  ;;  %v138_v26 = vpop.xlane.xlu0 %137 }
 0x105   :  { %v195_v27 = vmul.f32 %v797_v24, %v150_v25  ;;  %v191_v28 = vmul.f32 %v797_v24, %v138_v26 }
 0x107   :  { %v802_v29 = vsub.f32 %v721_v37, %v195_v27  ;;  %v805_v30 = vsub.f32 %v718_v36, %v191_v28 }
 0x109   :  { %v227_v31 = vmul.f32 %v802_v29, %v802_v29  ;;  %v223_v32 = vmul.f32 %v805_v30, %v805_v30 }
 0x10b   :  { %v251_v33 = vsel %vm135_vm2, %v227_v31, 0.0  ;;  %v239_v34 = vsel %vm135_vm2, %v223_v32, 0.0 }
 0x10c   :  { %252 = vadd.xlane.f32.xlu2 %v251_v33  ;;  %v162_v35 = vpop.xlane.xlu2 %161  ;;  %240 = vadd.xlane.f32.xlu1 %v239_v34  ;;  %v174_v38 = vpop.xlane.xlu0 %173 }
 0x10d   :  { %v199_v37 = vmul.f32 %v797_v24, %v162_v35  ;;  %v203_v39 = vmul.f32 %v797_v24, %v174_v38 }
 0x10f   :  { %v816_v36 = vsub.f32 %v728_v42, %v199_v37  ;;  %v819_v40 = vsub.f32 %v731_v43, %v203_v39 }
 0x111   :  { %v231_v41 = vmul.f32 %v816_v36, %v816_v36  ;;  %v235_v44 = vmul.f32 %v819_v40, %v819_v40 }
 0x113   :  { %v825_v45 = vpop.xlane.xlu1 %176  ;;  %v263_v46 = vsel %vm135_vm2, %v231_v41, 0.0  ;;  %v275_v47 = vsel %vm135_vm2, %v235_v44, 0.0 }
 0x114   :  { %v153_v50 = vpop.xlane.xlu2 %152  ;;  %264 = vadd.xlane.f32.xlu0 %v263_v46  ;;  %276 = vadd.xlane.f32.xlu1 %v275_v47  ;;  %v141_v42 = vpop.xlane.xlu0 %140 }
 0x115   :  { %v196_v51 = vmul.f32 %v797_v24, %v153_v50  ;;  %v192_v43 = vmul.f32 %v797_v24, %v141_v42 }
 0x117   :  { %v832_v53 = vsub.f32 %v741_v49, %v196_v51  ;;  %v835_v54 = vsub.f32 %v738_v48, %v192_v43 }
 0x119   :  { %v228_v55 = vmul.f32 %v832_v53, %v832_v53  ;;  %v224_v56 = vmul.f32 %v835_v54, %v835_v54 }
 0x11b   :  { %v144_v59 = vpop.xlane.xlu1 %143  ;;  %v254_v60 = vsel %vm135_vm2, %v228_v55, 0.0  ;;  %v242_v61 = vsel %vm135_vm2, %v224_v56, 0.0 }
 0x11c   :  { %v193_v62 = vmul.f32 %v797_v24, %v144_v59  ;;  %255 = vadd.xlane.f32.xlu0 %v254_v60  ;;  %243 = vadd.xlane.f32.xlu2 %v242_v61  ;;  %v165_v49 = vpop.xlane.xlu0 %164 }
 0x11d   :  { %v200_v0 = vmul.f32 %v797_v24, %v165_v49 }
 0x11e   :  { %v846_v48 = vsub.f32 %v753_v57, %v193_v62 }
 0x11f   :  { %v849_v2 = vsub.f32 %v756_v58, %v200_v0 }
 0x120   :  { %v225_v4 = vmul.f32 %v846_v48, %v846_v48 }
 0x121   :  { %v232_v5 = vmul.f32 %v849_v2, %v849_v2 }
 0x122   :  { %v245_v8 = vsel %vm135_vm2, %v225_v4, 0.0 }
 0x123   :  { %v171_v6 = vpop.xlane.xlu2 %170  ;;  %v168_v7 = vpop.xlane.xlu1 %167  ;;  %v266_v12 = vsel %vm135_vm2, %v232_v5, 0.0 }
 0x124   :  { %v202_v13 = vmul.f32 %v797_v24, %v171_v6  ;;  %v201_v57 = vmul.f32 %v797_v24, %v168_v7  ;;  %246 = vadd.xlane.f32.xlu0 %v245_v8  ;;  %267 = vadd.xlane.f32.xlu1 %v266_v12  ;;  %v156_v58 = vpop.xlane.xlu0 %155 }
 0x125   :  { %v197_v14 = vmul.f32 %v797_v24, %v156_v58 }
 0x126   :  { %v861_v15 = vsub.f32 %v769_v3, %v202_v13  ;;  %v864_v17 = vsub.f32 %v763_v63, %v201_v57 }
 0x127   :  { %v867_v18 = vsub.f32 %v766_v1, %v197_v14 }
 0x128   :  { %v233_v19 = vmul.f32 %v864_v17, %v864_v17  ;;  %v234_v20 = vmul.f32 %v861_v15, %v861_v15 }
 0x129   :  { %v229_v21 = vmul.f32 %v867_v18, %v867_v18 }
 0x12a   :  { %v269_v22 = vsel %vm135_vm2, %v233_v19, 0.0  ;;  %v272_v63 = vsel %vm135_vm2, %v234_v20, 0.0 }
 0x12b   :  { %v180_v23 = vpop.xlane.xlu2 %179  ;;  %v147_v3 = vpop.xlane.xlu1 %146  ;;  %270 = vadd.xlane.f32.xlu2 %v269_v22  ;;  %v257_v25 = vsel %vm135_vm2, %v229_v21, 0.0 }
 0x12c   :  { %v205_v1 = vmul.f32 %v797_v24, %v180_v23  ;;  %v194_v26 = vmul.f32 %v797_v24, %v147_v3  ;;  %273 = vadd.xlane.f32.xlu0 %v272_v63  ;;  %258 = vadd.xlane.f32.xlu1 %v257_v25  ;;  %v183_v27 = vpop.xlane.xlu0 %182 }
 0x12d   :  { %v206_v32 = vmul.f32 %v797_v24, %v183_v27  ;;  %v934_v27 = vld [vmem:[%s1142_s3] ss:$0 sm:$0xff] }
 0x12e   :  { %v881_v28 = vsub.f32 %v778_v9, %v205_v1  ;;  %v884_v31 = vsub.f32 %v784_v11, %v194_v26  ;;  %v204_v11 = vmul.f32 %v797_v24, %v825_v45 }
 0x12f   :  { %v892_v35 = vsub.f32 %v781_v10, %v206_v32 }
 0x130   :  { %v237_v33 = vmul.f32 %v881_v28, %v881_v28  ;;  %v226_v34 = vmul.f32 %v884_v31, %v884_v31  ;;  %v907_v46 = vsub.f32 %v744_v52, %v204_v11 }
 0x131   :  { %v238_v44 = vmul.f32 %v892_v35, %v892_v35 }
 0x132   :  { %v281_v37 = vsel %vm135_vm2, %v237_v33, 0.0  ;;  %v248_v9 = vsel %vm135_vm2, %v226_v34, 0.0  ;;  %v236_v45 = vmul.f32 %v907_v46, %v907_v46 }
 0x133   :  { %v159_v38 = vpop.xlane.xlu1 %158  ;;  %v284_v50 = vsel %vm135_vm2, %v238_v44, 0.0 }
 0x134   :  { %v198_v39 = vmul.f32 %v797_v24, %v159_v38  ;;  %282 = vadd.xlane.f32.xlu0 %v281_v37  ;;  %249 = vadd.xlane.f32.xlu1 %v248_v9  ;;  %v942_v37 = vld [vmem:[%s1143_s4] ss:$0 sm:$0xff] }
 0x136   :  { %v900_v41 = vsub.f32 %v793_v16, %v198_v39  ;;  %v278_v16 = vsel %vm135_vm2, %v236_v45, 0.0 }
 0x138   :  { %v230_v10 = vmul.f32 %v900_v41, %v900_v41 }
 0x13a   :  { %v260_v47 = vsel %vm135_vm2, %v230_v10, 0.0 }
 0x13b   :  { %261 = vadd.xlane.f32.xlu2 %v260_v47 }
 0x13c   :  { %285 = vadd.xlane.f32.xlu1 %v284_v50 }
 0x143   :  { %279 = vadd.xlane.f32.xlu2 %v278_v16 }
 0x17f   :  { %v253_v42 = vpop.xlane.xlu2 %252  ;;  %v241_v51 = vpop.xlane.xlu1 %240 }
 0x180   :  { %v291_v43 = vmul.f32 %v253_v42, %v797_v24  ;;  %v287_v55 = vmul.f32 %v241_v51, %v797_v24 }
 0x182   :  { %v307_v52 = vadd.f32 1e-05, %v291_v43  ;;  %v303_v56 = vadd.f32 1e-05, %v287_v55 }
 0x184   :  { %578 = vrsqrt.f32 %v307_v52  ;;  %vm365_vm6 = vweird.f32 %v307_v52  ;;  %vm325_vm8 = vweird.f32 %v303_v56 }
 0x185   :  { %580 = vrsqrt.f32 %v303_v56 }
 0x187   :  { %v277_v59 = vpop.xlane.xlu1 %276  ;;  %v265_v60 = vpop.xlane.xlu0 %264 }
 0x188   :  { %v299_v61 = vmul.f32 %v277_v59, %v797_v24  ;;  %v295_v62 = vmul.f32 %v265_v60, %v797_v24 }
 0x18a   :  { %v579_v49 = vpop.eup %578  ;;  %v918_v0 = vadd.f32 1e-05, %v299_v61  ;;  %v920_v4 = vadd.f32 1e-05, %v295_v62 }
 0x18b   :  { %v581_v5 = vpop.eup %580  ;;  %v360_v6 = vmul.f32 %v579_v49, %v307_v52  ;;  %vm366_vm4 = vweird.f32 %v579_v49 }
 0x18c   :  { %v320_v7 = vmul.f32 %v581_v5, %v303_v56  ;;  %582 = vrsqrt.f32 %v918_v0  ;;  %vm326_vm5 = vweird.f32 %v581_v5  ;;  %vm367_vm7 = vmor %vm365_vm6, %vm366_vm4  ;;  %vm445_vm12 = vweird.f32 %v918_v0 }
 0x18d   :  { %v361_v8 = vmul.f32 %v579_v49, %v360_v6  ;;  %584 = vrsqrt.f32 %v920_v4  ;;  %vm327_vm9 = vmor %vm325_vm8, %vm326_vm5  ;;  %vm405_vm14 = vweird.f32 %v920_v4 }
 0x18e   :  { %v321_v12 = vmul.f32 %v581_v5, %v320_v7 }
 0x18f   :  { %v362_v13 = vmul.f32 0.5, %v361_v8  ;;  %v244_v57 = vpop.xlane.xlu2 %243  ;;  %v256_v58 = vpop.xlane.xlu0 %255 }
 0x190   :  { %v322_v14 = vmul.f32 0.5, %v321_v12  ;;  %v288_v19 = vmul.f32 %v244_v57, %v797_v24  ;;  %v292_v20 = vmul.f32 %v256_v58, %v797_v24 }
 0x191   :  { %v363_v21 = vsub.f32 1.5, %v362_v13 }
 0x192   :  { %v583_v22 = vpop.eup %582  ;;  %v323_v23 = vsub.f32 1.5, %v322_v14  ;;  %v926_v3 = vadd.f32 1e-05, %v288_v19  ;;  %v928_v63 = vadd.f32 1e-05, %v292_v20 }
 0x193   :  { %v585_v25 = vpop.eup %584  ;;  %v364_v1 = vmul.f32 %v579_v49, %v363_v21  ;;  %v440_v26 = vmul.f32 %v583_v22, %v918_v0  ;;  %vm446_vm10 = vweird.f32 %v583_v22 }
 0x194   :  { %v324_v32 = vmul.f32 %v581_v5, %v323_v23  ;;  %v400_v33 = vmul.f32 %v585_v25, %v920_v4  ;;  %586 = vrsqrt.f32 %v926_v3  ;;  %vm406_vm11 = vweird.f32 %v585_v25  ;;  %vm447_vm13 = vmor %vm445_vm12, %vm446_vm10 }
 0x195   :  { %v368_v34 = vsel %vm367_vm7, %v579_v49, %v364_v1  ;;  %v441_v38 = vmul.f32 %v583_v22, %v440_v26  ;;  %588 = vrsqrt.f32 %v928_v63  ;;  %vm407_vm15 = vmor %vm405_vm14, %vm406_vm11  ;;  %vm335_vm0 = vweird.f32 %v926_v3 }
 0x196   :  { %v483_v9 = vmul.f32 %v368_v34, %v802_v29  ;;  %v328_v39 = vsel %vm327_vm9, %v581_v5, %v324_v32  ;;  %v401_v11 = vmul.f32 %v585_v25, %v400_v33  ;;  %vm375_vm5 = vweird.f32 %v928_v63 }
 0x197   :  { %v479_v44 = vmul.f32 %v328_v39, %v805_v30  ;;  %v442_v10 = vmul.f32 0.5, %v441_v38  ;;  %v268_v47 = vpop.xlane.xlu1 %267  ;;  %v247_v50 = vpop.xlane.xlu0 %246 }
 0x198   :  { %v503_v45 = vmul.f32 %v934_v27, %v483_v9  ;;  %v402_v16 = vmul.f32 0.5, %v401_v11  ;;  %v296_v42 = vmul.f32 %v268_v47, %v797_v24  ;;  %v289_v51 = vmul.f32 %v247_v50, %v797_v24 }
 0x199   :  { %v499_v43 = vmul.f32 %v934_v27, %v479_v44  ;;  %v443_v55 = vsub.f32 1.5, %v442_v10 }
 0x19a   :  { %v587_v29 = vpop.eup %586  ;;  %v523_v52 = vadd.f32 %v942_v37, %v503_v45  ;;  %v403_v56 = vsub.f32 1.5, %v402_v16  ;;  %v951_v30 = vadd.f32 1e-05, %v296_v42  ;;  %v953_v59 = vadd.f32 1e-05, %v289_v51 }
 0x19b   :  { %v589_v60 = vpop.eup %588  ;;  %v519_v61 = vadd.f32 %v942_v37, %v499_v43  ;;  %v444_v62 = vmul.f32 %v583_v22, %v443_v55  ;;  %v330_v49 = vmul.f32 %v587_v29, %v926_v3  ;;  %vm336_vm1 = vweird.f32 %v587_v29 }
 0x19c   :  { %539 = vst.msk [vmem:[%s1144_s5 + $0x20] sm:$0xff] %vm135_vm2, %v523_v52  ;;  %v404_v5 = vmul.f32 %v585_v25, %v403_v56  ;;  %v370_v6 = vmul.f32 %v589_v60, %v928_v63  ;;  %590 = vrsqrt.f32 %v951_v30  ;;  %vm376_vm3 = vweird.f32 %v589_v60  ;;  %vm337_vm4 = vmor %vm335_vm0, %vm336_vm1 }
 0x19d   :  { %535 = vst.msk [vmem:[%s1144_s5] sm:$0xff] %vm135_vm2, %v519_v61  ;;  %v448_v0 = vsel %vm447_vm13, %v583_v22, %v444_v62  ;;  %v331_v7 = vmul.f32 %v587_v29, %v330_v49  ;;  %592 = vrsqrt.f32 %v953_v59  ;;  %vm377_vm6 = vmor %vm375_vm5, %vm376_vm3  ;;  %vm415_vm9 = vweird.f32 %v951_v30 }
 0x19e   :  { %v491_v8 = vmul.f32 %v448_v0, %v819_v40  ;;  %v408_v12 = vsel %vm407_vm15, %v585_v25, %v404_v5  ;;  %v371_v13 = vmul.f32 %v589_v60, %v370_v6  ;;  %v271_v4 = vpop.xlane.xlu2 %270  ;;  %vm345_vm11 = vweird.f32 %v953_v59 }
 0x19f   :  { %v487_v57 = vmul.f32 %v408_v12, %v816_v36  ;;  %v332_v58 = vmul.f32 0.5, %v331_v7  ;;  %v297_v14 = vmul.f32 %v271_v4, %v797_v24  ;;  %v259_v19 = vpop.xlane.xlu1 %258  ;;  %v274_v20 = vpop.xlane.xlu0 %273 }
 0x1a0   :  { %v511_v21 = vmul.f32 %v934_v27, %v491_v8  ;;  %v372_v22 = vmul.f32 0.5, %v371_v13  ;;  %v293_v23 = vmul.f32 %v259_v19, %v797_v24  ;;  %v298_v1 = vmul.f32 %v274_v20, %v797_v24 }
 0x1a1   :  { %v507_v40 = vmul.f32 %v934_v27, %v487_v57  ;;  %v333_v25 = vsub.f32 1.5, %v332_v58  ;;  %v979_v26 = vadd.f32 1e-05, %v297_v14 }
 0x1a2   :  { %v591_v36 = vpop.eup %590  ;;  %v531_v32 = vadd.f32 %v942_v37, %v511_v21  ;;  %v373_v33 = vsub.f32 1.5, %v372_v22  ;;  %v982_v34 = vadd.f32 1e-05, %v293_v23  ;;  %v986_v44 = vadd.f32 1e-05, %v298_v1 }
 0x1a3   :  { %v593_v38 = vpop.eup %592  ;;  %v527_v9 = vadd.f32 %v942_v37, %v507_v40  ;;  %v334_v39 = vmul.f32 %v587_v29, %v333_v25  ;;  %v410_v11 = vmul.f32 %v591_v36, %v951_v30  ;;  %594 = vrsqrt.f32 %v979_v26 }
 0x1a4   :  { %547 = vst.msk [vmem:[%s1144_s5 + $0x60] sm:$0xff] %vm135_vm2, %v531_v32  ;;  %v374_v10 = vmul.f32 %v589_v60, %v373_v33  ;;  %v340_v47 = vmul.f32 %v593_v38, %v953_v59  ;;  %596 = vrsqrt.f32 %v982_v34  ;;  %vm416_vm7 = vweird.f32 %v591_v36 }
 0x1a5   :  { %543 = vst.msk [vmem:[%s1144_s5 + $0x40] sm:$0xff] %vm135_vm2, %v527_v9  ;;  %v338_v50 = vsel %vm337_vm4, %v587_v29, %v334_v39  ;;  %v411_v45 = vmul.f32 %v591_v36, %v410_v11  ;;  %598 = vrsqrt.f32 %v986_v44  ;;  %vm346_vm8 = vweird.f32 %v593_v38  ;;  %vm417_vm10 = vmor %vm415_vm9, %vm416_vm7 }
 0x1a6   :  { %v480_v3 = vmul.f32 %v338_v50, %v835_v54  ;;  %v378_v16 = vsel %vm377_vm6, %v589_v60, %v374_v10  ;;  %v341_v42 = vmul.f32 %v593_v38, %v340_v47  ;;  %vm347_vm12 = vmor %vm345_vm11, %vm346_vm8  ;;  %vm425_vm13 = vweird.f32 %v979_v26 }
 0x1a7   :  { %v484_v63 = vmul.f32 %v378_v16, %v832_v53  ;;  %v412_v51 = vmul.f32 0.5, %v411_v45  ;;  %v250_v43 = vpop.xlane.xlu1 %249  ;;  %v283_v55 = vpop.xlane.xlu0 %282  ;;  %vm385_vm14 = vweird.f32 %v982_v34  ;;  %vm435_vm5 = vweird.f32 %v986_v44 }
 0x1a8   :  { %v500_v52 = vmul.f32 %v934_v27, %v480_v3  ;;  %v342_v56 = vmul.f32 0.5, %v341_v42  ;;  %v290_v29 = vmul.f32 %v250_v43, %v797_v24  ;;  %v301_v61 = vmul.f32 %v283_v55, %v797_v24 }
 0x1a9   :  { %v504_v62 = vmul.f32 %v934_v27, %v484_v63  ;;  %v413_v49 = vsub.f32 1.5, %v412_v51  ;;  %v1010_v54 = vpop.eup %594 }
 0x1aa   :  { %v520_v53 = vadd.f32 %v942_v37, %v500_v52  ;;  %v343_v60 = vsub.f32 1.5, %v342_v56  ;;  %v1013_v5 = vadd.f32 1e-05, %v290_v29  ;;  %v1015_v6 = vadd.f32 1e-05, %v301_v61  ;;  %v1017_v0 = vpop.eup %596 }
 0x1ab   :  { %v524_v7 = vadd.f32 %v942_v37, %v504_v62  ;;  %v414_v8 = vmul.f32 %v591_v36, %v413_v49  ;;  %v420_v12 = vmul.f32 %v1010_v54, %v979_v26  ;;  %v380_v4 = vmul.f32 %v1017_v0, %v982_v34  ;;  %v599_v57 = vpop.eup %598 }
 0x1ac   :  { %536 = vst.msk [vmem:[%s1144_s5 + $0x8] sm:$0xff] %vm135_vm2, %v520_v53  ;;  %v344_v13 = vmul.f32 %v593_v38, %v343_v60  ;;  %600 = vrsqrt.f32 %v1013_v5  ;;  %v430_v20 = vmul.f32 %v599_v57, %v986_v44  ;;  %vm426_vm15 = vweird.f32 %v1010_v54 }
 0x1ad   :  { %540 = vst.msk [vmem:[%s1144_s5 + $0x28] sm:$0xff] %vm135_vm2, %v524_v7  ;;  %v418_v30 = vsel %vm417_vm10, %v591_v36, %v414_v8  ;;  %v421_v58 = vmul.f32 %v1010_v54, %v420_v12  ;;  %602 = vrsqrt.f32 %v1015_v6  ;;  %v381_v19 = vmul.f32 %v1017_v0, %v380_v4  ;;  %vm427_vm1 = vmor %vm425_vm13, %vm426_vm15 }
 0x1ae   :  { %v488_v59 = vmul.f32 %v418_v30, %v849_v2  ;;  %v348_v14 = vsel %vm347_vm12, %v593_v38, %v344_v13  ;;  %v262_v21 = vpop.xlane.xlu2 %261  ;;  %v431_v25 = vmul.f32 %v599_v57, %v430_v20  ;;  %vm386_vm0 = vweird.f32 %v1017_v0 }
 0x1af   :  { %v481_v22 = vmul.f32 %v348_v14, %v846_v48  ;;  %v422_v23 = vmul.f32 0.5, %v421_v58  ;;  %v382_v40 = vmul.f32 0.5, %v381_v19  ;;  %v294_v36 = vmul.f32 %v262_v21, %v797_v24  ;;  %v286_v2 = vpop.xlane.xlu1 %285  ;;  %vm387_vm4 = vmor %vm385_vm14, %vm386_vm0 }
 0x1b0   :  { %v508_v1 = vmul.f32 %v934_v27, %v488_v59  ;;  %v432_v39 = vmul.f32 0.5, %v431_v25  ;;  %v302_v3 = vmul.f32 %v286_v2, %v797_v24  ;;  %vm436_vm3 = vweird.f32 %v599_v57 }
 0x1b1   :  { %v501_v32 = vmul.f32 %v934_v27, %v481_v22  ;;  %v423_v33 = vsub.f32 1.5, %v422_v23  ;;  %v383_v9 = vsub.f32 1.5, %v382_v40  ;;  %v1050_v11 = vadd.f32 1e-05, %v294_v36  ;;  %vm437_vm6 = vmor %vm435_vm5, %vm436_vm3 }
 0x1b2   :  { %v601_v48 = vpop.eup %600  ;;  %v528_v38 = vadd.f32 %v942_v37, %v508_v1  ;;  %v433_v42 = vsub.f32 1.5, %v432_v39  ;;  %v318_v49 = vadd.f32 1e-05, %v302_v3  ;;  %vm355_vm9 = vweird.f32 %v1013_v5 }
 0x1b3   :  { %v603_v10 = vpop.eup %602  ;;  %v521_v47 = vadd.f32 %v942_v37, %v501_v32  ;;  %v424_v50 = vmul.f32 %v1010_v54, %v423_v33  ;;  %v350_v45 = vmul.f32 %v601_v48, %v1013_v5  ;;  %v384_v16 = vmul.f32 %v1017_v0, %v383_v9 }
 0x1b4   :  { %544 = vst.msk [vmem:[%s1144_s5 + $0x48] sm:$0xff] %vm135_vm2, %v528_v38  ;;  %v460_v63 = vmul.f32 %v603_v10, %v1015_v6  ;;  %604 = vrsqrt.f32 %v1050_v11  ;;  %v434_v52 = vmul.f32 %v599_v57, %v433_v42  ;;  %vm356_vm7 = vweird.f32 %v601_v48 }
 0x1b5   :  { %537 = vst.msk [vmem:[%s1144_s5 + $0x10] sm:$0xff] %vm135_vm2, %v521_v47  ;;  %v428_v51 = vsel %vm427_vm1, %v1010_v54, %v424_v50  ;;  %v351_v26 = vmul.f32 %v601_v48, %v350_v45  ;;  %v388_v55 = vsel %vm387_vm4, %v1017_v0, %v384_v16  ;;  %606 = vrsqrt.f32 %v318_v49  ;;  %vm357_vm10 = vmor %vm355_vm9, %vm356_vm7 }
 0x1b6   :  { %v489_v43 = vmul.f32 %v428_v51, %v864_v17  ;;  %v461_v56 = vmul.f32 %v603_v10, %v460_v63  ;;  %v280_v29 = vpop.xlane.xlu2 %279  ;;  %v485_v61 = vmul.f32 %v388_v55, %v867_v18  ;;  %v438_v44 = vsel %vm437_vm6, %v599_v57, %v434_v52 }
 0x1b7   :  { %v352_v62 = vmul.f32 0.5, %v351_v26  ;;  %v300_v34 = vmul.f32 %v280_v29, %v797_v24  ;;  %v490_v17 = vmul.f32 %v438_v44, %v861_v15  ;;  %vm466_vm8 = vweird.f32 %v603_v10 }
 0x1b8   :  { %v509_v54 = vmul.f32 %v934_v27, %v489_v43  ;;  %v462_v53 = vmul.f32 0.5, %v461_v56  ;;  %v505_v60 = vmul.f32 %v934_v27, %v485_v61  ;;  %vm465_vm11 = vweird.f32 %v1015_v6 }
 0x1b9   :  { %v353_v0 = vsub.f32 1.5, %v352_v62  ;;  %v316_v18 = vadd.f32 1e-05, %v300_v34  ;;  %v510_v24 = vmul.f32 %v934_v27, %v490_v17  ;;  %vm467_vm12 = vmor %vm465_vm11, %vm466_vm8  ;;  %vm395_vm14 = vweird.f32 %v1050_v11 }
 0x1ba   :  { %v529_v7 = vadd.f32 %v942_v37, %v509_v54  ;;  %v463_v8 = vsub.f32 1.5, %v462_v53  ;;  %v605_v12 = vpop.eup %604  ;;  %v525_v13 = vadd.f32 %v942_v37, %v505_v60  ;;  %vm475_vm1 = vweird.f32 %v318_v49 }
 0x1bb   :  { %v354_v4 = vmul.f32 %v601_v48, %v353_v0  ;;  %v390_v57 = vmul.f32 %v605_v12, %v1050_v11  ;;  %608 = vrsqrt.f32 %v316_v18  ;;  %v530_v5 = vadd.f32 %v942_v37, %v510_v24  ;;  %v607_v19 = vpop.eup %606 }
 0x1bc   :  { %545 = vst.msk [vmem:[%s1144_s5 + $0x50] sm:$0xff] %vm135_vm2, %v529_v7  ;;  %v464_v15 = vmul.f32 %v603_v10, %v463_v8  ;;  %v470_v22 = vmul.f32 %v607_v19, %v318_v49  ;;  %vm396_vm13 = vweird.f32 %v605_v12  ;;  %vm476_vm0 = vweird.f32 %v607_v19 }
 0x1bd   :  { %541 = vst.msk [vmem:[%s1144_s5 + $0x30] sm:$0xff] %vm135_vm2, %v525_v13  ;;  %v358_v30 = vsel %vm357_vm10, %v601_v48, %v354_v4  ;;  %v391_v14 = vmul.f32 %v605_v12, %v390_v57  ;;  %vm397_vm15 = vmor %vm395_vm14, %vm396_vm13  ;;  %vm455_vm5 = vweird.f32 %v316_v18 }
 0x1be   :  { %v482_v58 = vmul.f32 %v358_v30, %v884_v31  ;;  %v468_v59 = vsel %vm467_vm12, %v603_v10, %v464_v15  ;;  %546 = vst.msk [vmem:[%s1144_s5 + $0x58] sm:$0xff] %vm135_vm2, %v530_v5  ;;  %v471_v25 = vmul.f32 %v607_v19, %v470_v22  ;;  %vm477_vm3 = vmor %vm475_vm1, %vm476_vm0 }
 0x1bf   :  { %v493_v6 = vmul.f32 %v468_v59, %v881_v28  ;;  %v392_v21 = vmul.f32 0.5, %v391_v14 }
 0x1c0   :  { %v502_v20 = vmul.f32 %v934_v27, %v482_v58  ;;  %v472_v32 = vmul.f32 0.5, %v471_v25 }
 0x1c1   :  { %v513_v23 = vmul.f32 %v934_v27, %v493_v6  ;;  %v609_v1 = vpop.eup %608  ;;  %v393_v31 = vsub.f32 1.5, %v392_v21 }
 0x1c2   :  { %v522_v40 = vadd.f32 %v942_v37, %v502_v20  ;;  %v450_v2 = vmul.f32 %v609_v1, %v316_v18  ;;  %v473_v38 = vsub.f32 1.5, %v472_v32  ;;  %vm456_vm4 = vweird.f32 %v609_v1 }
 0x1c3   :  { %v533_v36 = vadd.f32 %v942_v37, %v513_v23  ;;  %v394_v28 = vmul.f32 %v605_v12, %v393_v31  ;;  %vm457_vm6 = vmor %vm455_vm5, %vm456_vm4 }
 0x1c4   :  { %538 = vst.msk [vmem:[%s1144_s5 + $0x18] sm:$0xff] %vm135_vm2, %v522_v40  ;;  %v451_v33 = vmul.f32 %v609_v1, %v450_v2  ;;  %v474_v10 = vmul.f32 %v607_v19, %v473_v38 }
 0x1c5   :  { %549 = vst.msk [vmem:[%s1144_s5 + $0x70] sm:$0xff] %vm135_vm2, %v533_v36  ;;  %v398_v48 = vsel %vm397_vm15, %v605_v12, %v394_v28 }
 0x1c6   :  { %v486_v9 = vmul.f32 %v398_v48, %v900_v41  ;;  %v452_v39 = vmul.f32 0.5, %v451_v33  ;;  %v478_v50 = vsel %vm477_vm3, %v607_v19, %v474_v10 }
 0x1c7   :  { %v494_v3 = vmul.f32 %v478_v50, %v892_v35 }
 0x1c8   :  { %v506_v47 = vmul.f32 %v934_v27, %v486_v9  ;;  %v453_v11 = vsub.f32 1.5, %v452_v39 }
 0x1c9   :  { %v514_v41 = vmul.f32 %v934_v27, %v494_v3 }
 0x1ca   :  { %v526_v45 = vadd.f32 %v942_v37, %v506_v47  ;;  %v454_v16 = vmul.f32 %v609_v1, %v453_v11 }
 0x1cb   :  { %v534_v51 = vadd.f32 %v942_v37, %v514_v41 }
 0x1cc   :  { %542 = vst.msk [vmem:[%s1144_s5 + $0x38] sm:$0xff] %vm135_vm2, %v526_v45  ;;  %v458_v42 = vsel %vm457_vm6, %v609_v1, %v454_v16 }
 0x1cd   :  { %v492_v63 = vmul.f32 %v458_v42, %v907_v46  ;;  %550 = vst.msk [vmem:[%s1144_s5 + $0x78] sm:$0xff] %vm135_vm2, %v534_v51 }
 0x1cf   :  { %v512_v26 = vmul.f32 %v934_v27, %v492_v63 }
 0x1d1   :  { %v532_v35 = vadd.f32 %v942_v37, %v512_v26 }
 0x1d3   :  { %548 = vst.msk [vmem:[%s1144_s5 + $0x68] sm:$0xff] %vm135_vm2, %v532_v35 }

// kernel: encoder_stage.19
= control target key start
LH: loop header
LB: loop body
LE: loop exit
PB: predicated region body
PF: predicated region fallthrough
CT: control target
= control target key end

     0   :  { %vm39_vm0 = vcmask 261120   ;;  %v622_v32 = vmov 32.0   ;;  %s1366_s0 = inlined_call_operand.vmem [shape: f32[128,32], index: 0, kind: input, shape index: {}]   ;;  %s1367_s3 = inlined_call_operand.vmem [shape: f32[1,32], index: 3, kind: input, shape index: {}]   ;;  %s1368_s4 = inlined_call_operand.vmem [shape: f32[1,32], index: 4, kind: input, shape index: {}]   ;;  %s1369_s2 = inlined_call_operand.vmem [shape: f32[1,32], index: 2, kind: input, shape index: {}]   ;;  %s1370_s1 = inlined_call_operand.vmem [shape: f32[32,32], index: 1, kind: input, shape index: {}]   ;;  %s1371_s6 = inlined_call_operand.vmem [shape: f32[128,32], index: 6, kind: output, shape index: {1}]   ;;  %s1372_s5 = inlined_call_operand.vmem [shape: f32[128,32], index: 5, kind: output, shape index: {0}]  }
   0x1   :  { %v35_v0 = vld [vmem:[%s1366_s0 + $0x60] sm:$0xff]  ;;  %v676_v6 = vld [vmem:[%s1366_s0 + $0x68] sm:$0xff]  ;;  %v707_v14 = vld [vmem:[%s1366_s0 + $0x50] sm:$0xff]  ;;  %588 = vrcp.f32 %v622_v32 }
   0x2   :  { %v31_v1 = vld [vmem:[%s1366_s0 + $0x40] sm:$0xff]  ;;  %v76_v3 = vsel %vm39_vm0, %v35_v0, 0.0  ;;  %v681_v7 = vld [vmem:[%s1366_s0 + $0x48] sm:$0xff]  ;;  %v79_v9 = vsel %vm39_vm0, %v676_v6, 0.0  ;;  %v70_v17 = vsel %vm39_vm0, %v707_v14, 0.0  ;;  %v718_v18 = vld [vmem:[%s1366_s0 + $0x58] sm:$0xff] }
   0x3   :  { %v667_v2 = vld [vmem:[%s1366_s0] sm:$0xff]  ;;  %v64_v4 = vsel %vm39_vm0, %v31_v1, 0.0  ;;  %77 = vadd.xlane.f32.xlu1 %v76_v3  ;;  %v686_v8 = vld [vmem:[%s1366_s0 + $0x8] sm:$0xff]  ;;  %v67_v10 = vsel %vm39_vm0, %v681_v7, 0.0  ;;  %v723_v19 = vld [vmem:[%s1366_s0 + $0x70] sm:$0xff]  ;;  %v73_v21 = vsel %vm39_vm0, %v718_v18, 0.0 }
   0x4   :  { %v40_v5 = vsel %vm39_vm0, %v667_v2, 0.0  ;;  %65 = vadd.xlane.f32.xlu0 %v64_v4  ;;  %v43_v11 = vsel %vm39_vm0, %v686_v8, 0.0  ;;  %v697_v12 = vld [vmem:[%s1366_s0 + $0x20] sm:$0xff]  ;;  %v702_v13 = vld [vmem:[%s1366_s0 + $0x28] sm:$0xff]  ;;  %v728_v20 = vld [vmem:[%s1366_s0 + $0x78] sm:$0xff]  ;;  %v82_v22 = vsel %vm39_vm0, %v723_v19, 0.0 }
   0x5   :  { %41 = vadd.xlane.f32.xlu2 %v40_v5  ;;  %v52_v15 = vsel %vm39_vm0, %v697_v12, 0.0  ;;  %v55_v16 = vsel %vm39_vm0, %v702_v13, 0.0  ;;  %v85_v23 = vsel %vm39_vm0, %v728_v20, 0.0  ;;  %v739_v24 = vld [vmem:[%s1366_s0 + $0x10] sm:$0xff]  ;;  %v744_v25 = vld [vmem:[%s1366_s0 + $0x18] sm:$0xff] }
   0x6   :  { %v749_v26 = vld [vmem:[%s1366_s0 + $0x30] sm:$0xff]  ;;  %v46_v27 = vsel %vm39_vm0, %v739_v24, 0.0  ;;  %v49_v28 = vsel %vm39_vm0, %v744_v25, 0.0  ;;  %v760_v30 = vld [vmem:[%s1366_s0 + $0x38] sm:$0xff] }
   0x7   :  { %v58_v29 = vsel %vm39_vm0, %v749_v26, 0.0  ;;  %v61_v31 = vsel %vm39_vm0, %v760_v30, 0.0  ;;  %v589_v33 = vpop.eup %588 }
   0x8   :  { %v89_v34 = vmul.f32 32.0, %v589_v33  ;;  %vm93_vm1 = vweird.f32 %v589_v33 }
   0xa   :  { %v90_v35 = vsub.f32 1.0, %v89_v34 }
   0xb   :  { %80 = vadd.xlane.f32.xlu1 %v79_v9 }
   0xc   :  { %68 = vadd.xlane.f32.xlu0 %v67_v10  ;;  %v91_v36 = vmul.f32 %v589_v33, %v90_v35 }
   0xd   :  { %44 = vadd.xlane.f32.xlu2 %v43_v11 }
   0xe   :  { %v92_v37 = vadd.f32 %v589_v33, %v91_v36 }
  0x10   :  { %v764_v38 = vsel %vm93_vm1, %v589_v33, %v92_v37 }
  0x13   :  { %56 = vadd.xlane.f32.xlu1 %v55_v16 }
  0x14   :  { %53 = vadd.xlane.f32.xlu0 %v52_v15 }
  0x15   :  { %71 = vadd.xlane.f32.xlu2 %v70_v17 }
  0x1b   :  { %83 = vadd.xlane.f32.xlu1 %v82_v22 }
  0x1c   :  { %74 = vadd.xlane.f32.xlu0 %v73_v21 }
  0x1d   :  { %86 = vadd.xlane.f32.xlu2 %v85_v23 }
  0x23   :  { %50 = vadd.xlane.f32.xlu1 %v49_v28 }
  0x24   :  { %47 = vadd.xlane.f32.xlu0 %v46_v27 }
  0x25   :  { %59 = vadd.xlane.f32.xlu2 %v58_v29 }
  0x2c   :  { %62 = vadd.xlane.f32.xlu0 %v61_v31 }
  0x76   :  { %v78_v39 = vpop.xlane.xlu1 %77 }
  0x77   :  { %v66_v40 = vpop.xlane.xlu0 %65  ;;  %v107_v41 = vmul.f32 %v764_v38, %v78_v39 }
  0x78   :  { %v103_v42 = vmul.f32 %v764_v38, %v66_v40  ;;  %v42_v43 = vpop.xlane.xlu2 %41 }
  0x79   :  { %v768_v44 = vsub.f32 %v35_v0, %v107_v41  ;;  %v95_v56 = vmul.f32 %v764_v38, %v42_v43 }
  0x7a   :  { %v770_v45 = vsub.f32 %v31_v1, %v103_v42 }
  0x7b   :  { %v139_v47 = vmul.f32 %v768_v44, %v768_v44  ;;  %v798_v63 = vsub.f32 %v667_v2, %v95_v56 }
  0x7c   :  { %v135_v46 = vmul.f32 %v770_v45, %v770_v45 }
  0x7d   :  { %v179_v49 = vsel %vm39_vm0, %v139_v47, 0.0  ;;  %v127_v10 = vmul.f32 %v798_v63, %v798_v63 }
  0x7e   :  { %v167_v48 = vsel %vm39_vm0, %v135_v46, 0.0  ;;  %v81_v50 = vpop.xlane.xlu1 %80  ;;  %180 = vadd.xlane.f32.xlu0 %v179_v49 }
  0x7f   :  { %v69_v51 = vpop.xlane.xlu0 %68  ;;  %168 = vadd.xlane.f32.xlu1 %v167_v48  ;;  %v108_v52 = vmul.f32 %v764_v38, %v81_v50 }
  0x80   :  { %v104_v53 = vmul.f32 %v764_v38, %v69_v51  ;;  %v45_v54 = vpop.xlane.xlu2 %44 }
  0x81   :  { %v96_v55 = vmul.f32 %v764_v38, %v45_v54  ;;  %v783_v57 = vsub.f32 %v676_v6, %v108_v52 }
  0x82   :  { %v786_v58 = vsub.f32 %v681_v7, %v104_v53 }
  0x83   :  { %v789_v59 = vsub.f32 %v686_v8, %v96_v55  ;;  %v140_v60 = vmul.f32 %v783_v57, %v783_v57 }
  0x84   :  { %v136_v61 = vmul.f32 %v786_v58, %v786_v58 }
  0x85   :  { %v128_v62 = vmul.f32 %v789_v59, %v789_v59  ;;  %v182_v0 = vsel %vm39_vm0, %v140_v60, 0.0 }
  0x86   :  { %v170_v1 = vsel %vm39_vm0, %v136_v61, 0.0  ;;  %v57_v5 = vpop.xlane.xlu1 %56 }
  0x87   :  { %v54_v3 = vpop.xlane.xlu0 %53  ;;  %183 = vadd.xlane.f32.xlu1 %v182_v0  ;;  %171 = vadd.xlane.f32.xlu2 %v170_v1  ;;  %v146_v4 = vsel %vm39_vm0, %v128_v62, 0.0  ;;  %v100_v8 = vmul.f32 %v764_v38, %v57_v5 }
  0x88   :  { %v99_v6 = vmul.f32 %v764_v38, %v54_v3  ;;  %147 = vadd.xlane.f32.xlu0 %v146_v4  ;;  %v72_v7 = vpop.xlane.xlu2 %71 }
  0x89   :  { %v105_v9 = vmul.f32 %v764_v38, %v72_v7  ;;  %v815_v15 = vsub.f32 %v702_v13, %v100_v8 }
  0x8a   :  { %v807_v2 = vsub.f32 %v697_v12, %v99_v6  ;;  %v143_v12 = vsel %vm39_vm0, %v127_v10, 0.0  ;;  %v466_v6 = vld [vmem:[%s1370_s1 + $0x18] sm:$0xff] }
  0x8b   :  { %v812_v11 = vsub.f32 %v707_v14, %v105_v9  ;;  %v132_v29 = vmul.f32 %v815_v15, %v815_v15 }
  0x8c   :  { %v131_v16 = vmul.f32 %v807_v2, %v807_v2 }
  0x8d   :  { %v137_v17 = vmul.f32 %v812_v11, %v812_v11  ;;  %v158_v36 = vsel %vm39_vm0, %v132_v29, 0.0 }
  0x8e   :  { %v155_v21 = vsel %vm39_vm0, %v131_v16, 0.0  ;;  %v84_v14 = vpop.xlane.xlu1 %83 }
  0x8f   :  { %v75_v22 = vpop.xlane.xlu0 %74  ;;  %156 = vadd.xlane.f32.xlu1 %v155_v21  ;;  %144 = vadd.xlane.f32.xlu2 %v143_v12  ;;  %v173_v23 = vsel %vm39_vm0, %v137_v17, 0.0  ;;  %v109_v28 = vmul.f32 %v764_v38, %v84_v14  ;;  %v463_v21 = vld [vmem:[%s1370_s1] sm:$0xff]  ;;  %v464_v12 = vld [vmem:[%s1370_s1 + $0x8] sm:$0xff] }
  0x90   :  { %v106_v27 = vmul.f32 %v764_v38, %v75_v22  ;;  %174 = vadd.xlane.f32.xlu0 %v173_v23  ;;  %v87_v13 = vpop.xlane.xlu2 %86  ;;  %v467_v23 = vpack.c.bf16 %v464_v12, %v463_v21 }
  0x91   :  { %v110_v31 = vmul.f32 %v764_v38, %v87_v13  ;;  %v836_v34 = vsub.f32 %v723_v19, %v109_v28 }
  0x92   :  { %v830_v32 = vsub.f32 %v718_v18, %v106_v27 }
  0x93   :  { %v833_v33 = vsub.f32 %v728_v20, %v110_v31  ;;  %v141_v43 = vmul.f32 %v836_v34, %v836_v34 }
  0x94   :  { %v138_v35 = vmul.f32 %v830_v32, %v830_v32 }
  0x95   :  { %v142_v37 = vmul.f32 %v833_v33, %v833_v33  ;;  %v185_v51 = vsel %vm39_vm0, %v141_v43, 0.0 }
  0x96   :  { %v176_v39 = vsel %vm39_vm0, %v138_v35, 0.0  ;;  %v51_v20 = vpop.xlane.xlu1 %50 }
  0x97   :  { %177 = vadd.xlane.f32.xlu1 %v176_v39  ;;  %v48_v40 = vpop.xlane.xlu0 %47  ;;  %159 = vadd.xlane.f32.xlu2 %v158_v36  ;;  %v188_v18 = vsel %vm39_vm0, %v142_v37, 0.0  ;;  %v98_v42 = vmul.f32 %v764_v38, %v51_v20 }
  0x98   :  { %v97_v41 = vmul.f32 %v764_v38, %v48_v40  ;;  %189 = vadd.xlane.f32.xlu0 %v188_v18  ;;  %v60_v19 = vpop.xlane.xlu2 %59 }
  0x99   :  { %v101_v46 = vmul.f32 %v764_v38, %v60_v19  ;;  %v857_v49 = vsub.f32 %v744_v25, %v98_v42 }
  0x9a   :  { %v851_v47 = vsub.f32 %v739_v24, %v97_v41 }
  0x9b   :  { %v854_v48 = vsub.f32 %v749_v26, %v101_v46  ;;  %v130_v25 = vmul.f32 %v857_v49, %v857_v49 }
  0x9c   :  { %v129_v50 = vmul.f32 %v851_v47, %v851_v47 }
  0x9d   :  { %v133_v52 = vmul.f32 %v854_v48, %v854_v48  ;;  %v152_v60 = vsel %vm39_vm0, %v130_v25, 0.0 }
  0x9e   :  { %v149_v53 = vsel %vm39_vm0, %v129_v50, 0.0 }
  0x9f   :  { %150 = vadd.xlane.f32.xlu1 %v149_v53  ;;  %v63_v54 = vpop.xlane.xlu0 %62  ;;  %186 = vadd.xlane.f32.xlu2 %v185_v51  ;;  %v161_v24 = vsel %vm39_vm0, %v133_v52, 0.0 }
  0xa0   :  { %v102_v26 = vmul.f32 %v764_v38, %v63_v54  ;;  %162 = vadd.xlane.f32.xlu0 %v161_v24 }
  0xa2   :  { %v870_v55 = vsub.f32 %v760_v30, %v102_v26  ;;  %v465_v30 = vld [vmem:[%s1370_s1 + $0x10] sm:$0xff] }
  0xa3   :  { %v468_v7 = vpack.c.bf16 %v466_v6, %v465_v30  ;;  %v942_v30 = vld [vmem:[%s1367_s3] ss:$0 sm:$0xff] }
  0xa4   :  { %v134_v56 = vmul.f32 %v870_v55, %v870_v55 }
  0xa5   :  { %579 = vmatpush.bf16.msra.mxu2 %v468_v7  ;;  %580 = vmatpush.bf16.msra.mxu3 %v468_v7 }
  0xa6   :  { %v164_v61 = vsel %vm39_vm0, %v134_v56, 0.0  ;;  %503 = vmatpush.bf16.msra.mxu0 %v468_v7  ;;  %578 = vmatpush.bf16.msra.mxu1 %v468_v7 }
  0xa7   :  { %165 = vadd.xlane.f32.xlu1 %v164_v61  ;;  %153 = vadd.xlane.f32.xlu2 %v152_v60 }
  0xa9   :  { %582 = vmatpush.bf16.msra.mxu2 %v467_v23  ;;  %583 = vmatpush.bf16.msra.mxu3 %v467_v23 }
  0xaa   :  { %504 = vmatpush.bf16.msra.mxu0 %v467_v23  ;;  %581 = vmatpush.bf16.msra.mxu1 %v467_v23  ;;  %v963_v23 = vld [vmem:[%s1368_s4] ss:$0 sm:$0xff] }
  0xf1   :  { %v181_v0 = vpop.xlane.xlu0 %180 }
  0xf2   :  { %v169_v62 = vpop.xlane.xlu1 %168  ;;  %v203_v3 = vmul.f32 %v181_v0, %v764_v38 }
  0xf3   :  { %v199_v1 = vmul.f32 %v169_v62, %v764_v38 }
  0xf4   :  { %v878_v5 = vadd.f32 1e-05, %v203_v3 }
  0xf5   :  { %v215_v4 = vadd.f32 1e-05, %v199_v1 }
  0xf6   :  { %vm349_vm6 = vweird.f32 %v878_v5 }
  0xf7   :  { %590 = vrsqrt.f32 %v215_v4  ;;  %vm309_vm3 = vweird.f32 %v215_v4 }
  0xf8   :  { %592 = vrsqrt.f32 %v878_v5 }
  0xfa   :  { %v184_v8 = vpop.xlane.xlu1 %183  ;;  %v172_v9 = vpop.xlane.xlu2 %171 }
  0xfb   :  { %v204_v10 = vmul.f32 %v184_v8, %v764_v38  ;;  %v148_v16 = vpop.xlane.xlu0 %147  ;;  %v200_v17 = vmul.f32 %v172_v9, %v764_v38 }
  0xfc   :  { %v192_v22 = vmul.f32 %v148_v16, %v764_v38 }
  0xfd   :  { %v591_v14 = vpop.eup %590  ;;  %v896_v27 = vadd.f32 1e-05, %v204_v10  ;;  %v898_v13 = vadd.f32 1e-05, %v200_v17 }
  0xfe   :  { %v900_v28 = vpop.eup %592  ;;  %v304_v29 = vmul.f32 %v591_v14, %v215_v4  ;;  %v902_v31 = vadd.f32 1e-05, %v192_v22  ;;  %vm310_vm2 = vweird.f32 %v591_v14 }
  0xff   :  { %v344_v35 = vmul.f32 %v900_v28, %v878_v5  ;;  %594 = vrsqrt.f32 %v896_v27  ;;  %vm350_vm4 = vweird.f32 %v900_v28  ;;  %vm311_vm5 = vmor %vm309_vm3, %vm310_vm2  ;;  %vm359_vm7 = vweird.f32 %v896_v27 }
 0x100   :  { %v305_v36 = vmul.f32 %v591_v14, %v304_v29  ;;  %596 = vrsqrt.f32 %v902_v31  ;;  %vm946_vm8 = vmor %vm349_vm6, %vm350_vm4  ;;  %vm239_vm9 = vweird.f32 %v902_v31  ;;  %vm319_vm10 = vweird.f32 %v898_v13 }
 0x101   :  { %v345_v37 = vmul.f32 %v900_v28, %v344_v35  ;;  %598 = vrsqrt.f32 %v898_v13 }
 0x102   :  { %v306_v39 = vmul.f32 0.5, %v305_v36  ;;  %v157_v40 = vpop.xlane.xlu1 %156  ;;  %v145_v18 = vpop.xlane.xlu2 %144 }
 0x103   :  { %v346_v20 = vmul.f32 0.5, %v345_v37  ;;  %v195_v41 = vmul.f32 %v157_v40, %v764_v38  ;;  %v175_v19 = vpop.xlane.xlu0 %174  ;;  %v191_v42 = vmul.f32 %v145_v18, %v764_v38 }
 0x104   :  { %v307_v43 = vsub.f32 1.5, %v306_v39  ;;  %v201_v46 = vmul.f32 %v175_v19, %v764_v38 }
 0x105   :  { %v913_v50 = vpop.eup %594  ;;  %v347_v51 = vsub.f32 1.5, %v346_v20  ;;  %v915_v52 = vadd.f32 1e-05, %v195_v41  ;;  %v930_v61 = vadd.f32 1e-05, %v191_v42 }
 0x106   :  { %v917_v53 = vpop.eup %596  ;;  %v308_v54 = vmul.f32 %v591_v14, %v307_v43  ;;  %v354_v24 = vmul.f32 %v913_v50, %v896_v27  ;;  %v922_v26 = vadd.f32 1e-05, %v201_v46  ;;  %vm360_vm11 = vweird.f32 %v913_v50 }
 0x107   :  { %v924_v25 = vpop.eup %598  ;;  %v348_v56 = vmul.f32 %v900_v28, %v347_v51  ;;  %v234_v60 = vmul.f32 %v917_v53, %v902_v31  ;;  %600 = vrsqrt.f32 %v915_v52  ;;  %vm240_vm13 = vweird.f32 %v917_v53  ;;  %vm983_vm15 = vmor %vm359_vm7, %vm360_vm11 }
 0x108   :  { %v312_v62 = vsel %vm311_vm5, %v591_v14, %v308_v54  ;;  %v355_v0 = vmul.f32 %v913_v50, %v354_v24  ;;  %v314_v1 = vmul.f32 %v924_v25, %v898_v13  ;;  %602 = vrsqrt.f32 %v922_v26  ;;  %vm1026_vm4 = vmor %vm239_vm9, %vm240_vm13 }
 0x109   :  { %v391_v3 = vmul.f32 %v312_v62, %v770_v45  ;;  %v235_v4 = vmul.f32 %v917_v53, %v234_v60  ;;  %v352_v9 = vsel %vm946_vm8, %v900_v28, %v348_v56  ;;  %604 = vrsqrt.f32 %v930_v61 }
 0x10a   :  { %v356_v7 = vmul.f32 0.5, %v355_v0  ;;  %v315_v45 = vmul.f32 %v924_v25, %v314_v1  ;;  %v178_v5 = vpop.xlane.xlu1 %177  ;;  %v160_v8 = vpop.xlane.xlu2 %159  ;;  %vm320_vm12 = vweird.f32 %v924_v25  ;;  %v395_v40 = vmul.f32 %v352_v9, %v768_v44 }
 0x10b   :  { %v236_v10 = vmul.f32 0.5, %v235_v4  ;;  %v190_v16 = vpop.xlane.xlu0 %189  ;;  %v202_v12 = vmul.f32 %v178_v5, %v764_v38  ;;  %v196_v29 = vmul.f32 %v160_v8, %v764_v38  ;;  %v411_v35 = vmul.f32 %v942_v30, %v391_v3  ;;  %vm321_vm1 = vmor %vm319_vm10, %vm320_vm12 }
 0x10c   :  { %v357_v17 = vsub.f32 1.5, %v356_v7  ;;  %v316_v21 = vmul.f32 0.5, %v315_v45  ;;  %v206_v22 = vmul.f32 %v190_v16, %v764_v38  ;;  %vm269_vm14 = vweird.f32 %v915_v52 }
 0x10d   :  { %v965_v14 = vpop.eup %600  ;;  %v237_v28 = vsub.f32 1.5, %v236_v10  ;;  %v977_v18 = vadd.f32 1e-05, %v202_v12  ;;  %v992_v44 = vadd.f32 %v963_v23, %v411_v35  ;;  %vm329_vm2 = vweird.f32 %v922_v26 }
 0x10e   :  { %v358_v36 = vmul.f32 %v913_v50, %v357_v17  ;;  %v317_v37 = vsub.f32 1.5, %v316_v21  ;;  %v264_v39 = vmul.f32 %v965_v14, %v915_v52  ;;  %v979_v20 = vpop.eup %602  ;;  %v989_v43 = vadd.f32 1e-05, %v206_v22 }
 0x10f   :  { %v994_v46 = vpop.eup %604  ;;  %v238_v51 = vmul.f32 %v917_v53, %v237_v28  ;;  %v324_v27 = vmul.f32 %v979_v20, %v922_v26  ;;  %v1004_v54 = vadd.f32 1e-05, %v196_v29  ;;  %vm229_vm3 = vweird.f32 %v930_v61  ;;  %447 = vst.msk [vmem:[%s1371_s6 + $0x40] sm:$0xff] %vm39_vm0, %v992_v44 }
 0x110   :  { %v318_v19 = vmul.f32 %v924_v25, %v317_v37  ;;  %v265_v42 = vmul.f32 %v965_v14, %v264_v39  ;;  %v362_v24 = vsel %vm983_vm15, %v913_v50, %v358_v36  ;;  %v224_v62 = vmul.f32 %v994_v46, %v930_v61 }
 0x111   :  { %v325_v0 = vmul.f32 %v979_v20, %v324_v27  ;;  %606 = vrsqrt.f32 %v977_v18  ;;  %v415_v1 = vmul.f32 %v942_v30, %v395_v40  ;;  %vm270_vm5 = vweird.f32 %v965_v14 }
 0x112   :  { %v322_v56 = vsel %vm321_vm1, %v924_v25, %v318_v19  ;;  %v266_v60 = vmul.f32 0.5, %v265_v42  ;;  %v151_v50 = vpop.xlane.xlu1 %150  ;;  %608 = vrsqrt.f32 %v989_v43  ;;  %v187_v6 = vpop.xlane.xlu2 %186  ;;  %v396_v7 = vmul.f32 %v362_v24, %v783_v57  ;;  %vm1051_vm7 = vmor %vm269_vm14, %vm270_vm5 }
 0x113   :  { %v392_v13 = vmul.f32 %v322_v56, %v786_v58  ;;  %v163_v25 = vpop.xlane.xlu0 %162  ;;  %v225_v58 = vmul.f32 %v994_v46, %v224_v62  ;;  %v242_v45 = vsel %vm1026_vm4, %v917_v53, %v238_v51  ;;  %v326_v5 = vmul.f32 0.5, %v325_v0 }
 0x114   :  { %v267_v4 = vsub.f32 1.5, %v266_v60  ;;  %610 = vrsqrt.f32 %v1004_v54  ;;  %v193_v9 = vmul.f32 %v151_v50, %v764_v38  ;;  %v197_v10 = vmul.f32 %v163_v25, %v764_v38 }
 0x115   :  { %v226_v8 = vmul.f32 0.5, %v225_v58  ;;  %v327_v16 = vsub.f32 1.5, %v326_v5  ;;  %vm330_vm6 = vweird.f32 %v979_v20  ;;  %v205_v17 = vmul.f32 %v187_v6, %v764_v38 }
 0x116   :  { %v268_v31 = vmul.f32 %v965_v14, %v267_v4  ;;  %v412_v57 = vmul.f32 %v942_v30, %v392_v13  ;;  %v1045_v21 = vmul.f32 %v242_v45, %v789_v59  ;;  %vm230_vm8 = vweird.f32 %v994_v46  ;;  %vm1071_vm9 = vmor %vm329_vm2, %vm330_vm6 }
 0x117   :  { %v227_v12 = vsub.f32 1.5, %v226_v8  ;;  %v1056_v22 = vadd.f32 1e-05, %v193_v9  ;;  %v1058_v28 = vpop.eup %606  ;;  %v328_v29 = vmul.f32 %v979_v20, %v327_v16  ;;  %v1064_v35 = vadd.f32 1e-05, %v197_v10  ;;  %vm1091_vm11 = vmor %vm229_vm3, %vm230_vm8 }
 0x118   :  { %v272_v59 = vsel %vm1051_vm7, %v965_v14, %v268_v31  ;;  %v432_v52 = vadd.f32 %v963_v23, %v412_v57  ;;  %v1067_v36 = vpop.eup %608  ;;  %v334_v40 = vmul.f32 %v1058_v28, %v977_v18  ;;  %vm339_vm10 = vweird.f32 %v977_v18 }
 0x119   :  { %v228_v39 = vmul.f32 %v994_v46, %v227_v12  ;;  %612 = vrsqrt.f32 %v1056_v22  ;;  %v1080_v14 = vadd.f32 1e-05, %v205_v17  ;;  %v332_v26 = vsel %vm1071_vm9, %v979_v20, %v328_v29 }
 0x11a   :  { %v1082_v41 = vpop.eup %610  ;;  %v374_v42 = vmul.f32 %v1067_v36, %v989_v43  ;;  %vm379_vm12 = vweird.f32 %v989_v43  ;;  %448 = vst.msk [vmem:[%s1371_s6 + $0x48] sm:$0xff] %vm39_vm0, %v432_v52  ;;  %v416_v20 = vmul.f32 %v942_v30, %v396_v7  ;;  %v1104_v51 = vmul.f32 %v272_v59, %v807_v2  ;;  %v166_v2 = vpop.xlane.xlu1 %165 }
 0x11b   :  { %v232_v61 = vsel %vm1091_vm11, %v994_v46, %v228_v39  ;;  %v335_v27 = vmul.f32 %v1058_v28, %v334_v40  ;;  %v274_v24 = vmul.f32 %v1082_v41, %v1004_v54  ;;  %vm279_vm13 = vweird.f32 %v1004_v54  ;;  %v154_v13 = vpop.xlane.xlu2 %153 }
 0x11c   :  { %vm340_vm14 = vweird.f32 %v1058_v28  ;;  %v375_v56 = vmul.f32 %v1067_v36, %v374_v42  ;;  %vm380_vm15 = vweird.f32 %v1067_v36  ;;  %614 = vrsqrt.f32 %v1064_v35 }
 0x11d   :  { %v1118_v60 = vmul.f32 %v332_v26, %v812_v11  ;;  %v336_v46 = vmul.f32 0.5, %v335_v27  ;;  %v275_v62 = vmul.f32 %v1082_v41, %v274_v24  ;;  %616 = vrsqrt.f32 %v1080_v14  ;;  %vm1151_vm4 = vmor %vm339_vm10, %vm340_vm14 }
 0x11e   :  { %v383_v0 = vmul.f32 %v232_v61, %v798_v63  ;;  %v376_v50 = vmul.f32 0.5, %v375_v56  ;;  %v459_v25 = vpack.c.bf16 %v432_v52, %v992_v44  ;;  %v435_v3 = vadd.f32 %v963_v23, %v415_v1  ;;  %vm1167_vm6 = vmor %vm379_vm12, %vm380_vm15 }
 0x11f   :  { %v1125_v4 = vpop.eup %612  ;;  %v337_v58 = vsub.f32 1.5, %v336_v46  ;;  %v276_v6 = vmul.f32 0.5, %v275_v62  ;;  %v436_v11 = vadd.f32 %v963_v23, %v416_v20  ;;  %v198_v7 = vmul.f32 %v166_v2, %v764_v38 }
 0x120   :  { %v377_v45 = vsub.f32 1.5, %v376_v50  ;;  %vm280_vm1 = vweird.f32 %v1082_v41  ;;  %v244_v5 = vmul.f32 %v1125_v4, %v1056_v22  ;;  %vm249_vm2 = vweird.f32 %v1056_v22  ;;  %574 = vmatmul.msk.bf16.vlgmr.msra.gmra.mxu2 %vm39_vm0, %v459_v25  ;;  %451 = vst.msk [vmem:[%s1371_s6 + $0x60] sm:$0xff] %vm39_vm0, %v435_v3 }
 0x121   :  { %v194_v63 = vmul.f32 %v154_v13, %v764_v38  ;;  %v338_v44 = vmul.f32 %v1058_v28, %v337_v58  ;;  %v277_v1 = vsub.f32 1.5, %v276_v6  ;;  %vm289_vm3 = vweird.f32 %v1064_v35  ;;  %452 = vst.msk [vmem:[%s1371_s6 + $0x68] sm:$0xff] %vm39_vm0, %v436_v11  ;;  %vm281_vm7 = vmor %vm279_vm13, %vm280_vm1 }
 0x122   :  { %v461_v31 = vpack.c.bf16 %v436_v11, %v435_v3  ;;  %v1145_v8 = vpop.eup %614  ;;  %v378_v38 = vmul.f32 %v1067_v36, %v377_v45  ;;  %v245_v10 = vmul.f32 %v1125_v4, %v244_v5  ;;  %vm250_vm5 = vweird.f32 %v1125_v4 }
 0x123   :  { %v1158_v16 = vadd.f32 1e-05, %v198_v7  ;;  %v617_v17 = vpop.eup %616  ;;  %v342_v57 = vsel %vm1151_vm4, %v1058_v28, %v338_v44  ;;  %v278_v53 = vmul.f32 %v1082_v41, %v277_v1  ;;  %v284_v12 = vmul.f32 %v1145_v8, %v1064_v35  ;;  %vm251_vm11 = vmor %vm249_vm2, %vm250_vm5 }
 0x124   :  { %576 = vmatmul.msk.bf16.vlgmr.msra.gmra.mxu3 %vm39_vm0, %v461_v31  ;;  %v1175_v59 = vadd.f32 1e-05, %v194_v63  ;;  %v382_v28 = vsel %vm1167_vm6, %v1067_v36, %v378_v38  ;;  %v246_v43 = vmul.f32 0.5, %v245_v10  ;;  %v364_v29 = vmul.f32 %v617_v17, %v1080_v14 }
 0x125   :  { %vm369_vm8 = vweird.f32 %v1080_v14  ;;  %v403_v52 = vmul.f32 %v942_v30, %v383_v0  ;;  %v394_v37 = vmul.f32 %v342_v57, %v830_v32  ;;  %v282_v39 = vsel %vm281_vm7, %v1082_v41, %v278_v53 }
 0x126   :  { %v285_v40 = vmul.f32 %v1145_v8, %v284_v12  ;;  %vm290_vm9 = vweird.f32 %v1145_v8  ;;  %v388_v36 = vmul.f32 %v282_v39, %v815_v15  ;;  %v247_v26 = vsub.f32 1.5, %v246_v43 }
 0x127   :  { %v365_v54 = vmul.f32 %v617_v17, %v364_v29  ;;  %618 = vrsqrt.f32 %v1158_v16  ;;  %v398_v19 = vmul.f32 %v382_v28, %v833_v33  ;;  %vm370_vm10 = vweird.f32 %v617_v17  ;;  %vm291_vm12 = vmor %vm289_vm3, %vm290_vm9 }
 0x128   :  { %v286_v42 = vmul.f32 0.5, %v285_v40  ;;  %620 = vrsqrt.f32 %v1175_v59  ;;  %v248_v32 = vmul.f32 %v1125_v4, %v247_v26  ;;  %v404_v41 = vmul.f32 %v942_v30, %v1045_v21  ;;  %vm371_vm13 = vmor %vm369_vm8, %vm370_vm10 }
 0x129   :  { %v366_v20 = vmul.f32 0.5, %v365_v54  ;;  %v423_v61 = vadd.f32 %v963_v23, %v403_v52  ;;  %v407_v33 = vmul.f32 %v942_v30, %v1104_v51  ;;  %v408_v27 = vmul.f32 %v942_v30, %v388_v36 }
 0x12a   :  { %v287_v15 = vsub.f32 1.5, %v286_v42  ;;  %v413_v24 = vmul.f32 %v942_v30, %v1118_v60  ;;  %v252_v56 = vsel %vm251_vm11, %v1125_v4, %v248_v32  ;;  %v424_v21 = vadd.f32 %v963_v23, %v404_v41 }
 0x12b   :  { %v367_v2 = vsub.f32 1.5, %v366_v20  ;;  %439 = vst.msk [vmem:[%s1371_s6] sm:$0xff] %vm39_vm0, %v423_v61  ;;  %v414_v22 = vmul.f32 %v942_v30, %v394_v37  ;;  %v385_v46 = vmul.f32 %v252_v56, %v851_v47  ;;  %v427_v62 = vadd.f32 %v963_v23, %v407_v33 }
 0x12c   :  { %v288_v51 = vmul.f32 %v1145_v8, %v287_v15  ;;  %v428_v60 = vadd.f32 %v963_v23, %v408_v27  ;;  %440 = vst.msk [vmem:[%s1371_s6 + $0x8] sm:$0xff] %vm39_vm0, %v424_v21  ;;  %v455_v50 = vpack.c.bf16 %v424_v21, %v423_v61  ;;  %v433_v47 = vadd.f32 %v963_v23, %v413_v24 }
 0x12d   :  { %v619_v13 = vpop.eup %618  ;;  %v368_v0 = vmul.f32 %v617_v17, %v367_v2  ;;  %v434_v25 = vadd.f32 %v963_v23, %v414_v22  ;;  %443 = vst.msk [vmem:[%s1371_s6 + $0x20] sm:$0xff] %vm39_vm0, %v427_v62  ;;  %v418_v63 = vmul.f32 %v942_v30, %v398_v19  ;;  %v405_v44 = vmul.f32 %v942_v30, %v385_v46 }
 0x12e   :  { %v621_v3 = vpop.eup %620  ;;  %v292_v4 = vsel %vm291_vm12, %v1145_v8, %v288_v51  ;;  %v294_v35 = vmul.f32 %v619_v13, %v1158_v16  ;;  %v457_v58 = vpack.c.bf16 %v428_v60, %v427_v62  ;;  %570 = vmatmul.msk.bf16.vlgmr.msra.gmra.mxu0 %vm39_vm0, %v455_v50  ;;  %444 = vst.msk [vmem:[%s1371_s6 + $0x28] sm:$0xff] %vm39_vm0, %v428_v60  ;;  %vm300_vm14 = vweird.f32 %v619_v13 }
 0x12f   :  { %v389_v6 = vmul.f32 %v292_v4, %v854_v48  ;;  %v372_v11 = vsel %vm371_vm13, %v617_v17, %v368_v0  ;;  %v254_v7 = vmul.f32 %v621_v3, %v1175_v59  ;;  %449 = vst.msk [vmem:[%s1371_s6 + $0x50] sm:$0xff] %vm39_vm0, %v433_v47  ;;  %v460_v48 = vpack.c.bf16 %v434_v25, %v433_v47 }
 0x130   :  { %v397_v14 = vmul.f32 %v372_v11, %v836_v34  ;;  %v295_v45 = vmul.f32 %v619_v13, %v294_v35  ;;  %572 = vmatmul.msk.bf16.vlgmr.msra.gmra.mxu1 %vm39_vm0, %v457_v58  ;;  %450 = vst.msk [vmem:[%s1371_s6 + $0x58] sm:$0xff] %vm39_vm0, %v434_v25  ;;  %v438_v9 = vadd.f32 %v963_v23, %v418_v63  ;;  %vm260_vm15 = vweird.f32 %v621_v3 }
 0x131   :  { %v255_v5 = vmul.f32 %v621_v3, %v254_v7  ;;  %v409_v34 = vmul.f32 %v942_v30, %v389_v6  ;;  %575 = vmatmul.msk.bf16.gmra.mxu2 %vm39_vm0, %v460_v48  ;;  %v425_v38 = vadd.f32 %v963_v23, %v405_v44  ;;  %vm299_vm1 = vweird.f32 %v1158_v16 }
 0x132   :  { %v296_v1 = vmul.f32 0.5, %v295_v45  ;;  %v417_v31 = vmul.f32 %v942_v30, %v397_v14  ;;  %454 = vst.msk [vmem:[%s1371_s6 + $0x78] sm:$0xff] %vm39_vm0, %v438_v9  ;;  %vm301_vm2 = vmor %vm299_vm1, %vm300_vm14  ;;  %vm259_vm3 = vweird.f32 %v1175_v59 }
 0x133   :  { %v256_v8 = vmul.f32 0.5, %v255_v5  ;;  %v429_v57 = vadd.f32 %v963_v23, %v409_v34  ;;  %441 = vst.msk [vmem:[%s1371_s6 + $0x10] sm:$0xff] %vm39_vm0, %v425_v38  ;;  %vm261_vm4 = vmor %vm259_vm3, %vm260_vm15 }
 0x134   :  { %v297_v10 = vsub.f32 1.5, %v296_v1  ;;  %v437_v17 = vadd.f32 %v963_v23, %v417_v31 }
 0x135   :  { %v257_v18 = vsub.f32 1.5, %v256_v8  ;;  %445 = vst.msk [vmem:[%s1371_s6 + $0x30] sm:$0xff] %vm39_vm0, %v429_v57 }
 0x136   :  { %v298_v53 = vmul.f32 %v619_v13, %v297_v10  ;;  %453 = vst.msk [vmem:[%s1371_s6 + $0x70] sm:$0xff] %vm39_vm0, %v437_v17  ;;  %v462_v12 = vpack.c.bf16 %v438_v9, %v437_v17 }
 0x137   :  { %v258_v28 = vmul.f32 %v621_v3, %v257_v18 }
 0x138   :  { %v302_v43 = vsel %vm301_vm2, %v619_v13, %v298_v53  ;;  %577 = vmatmul.msk.bf16.gmra.mxu3 %vm39_vm0, %v462_v12 }
 0x139   :  { %v390_v16 = vmul.f32 %v302_v43, %v870_v55  ;;  %v262_v29 = vsel %vm261_vm4, %v621_v3, %v258_v28  ;;  %v587_v55 = vld [vmem:[%s1369_s2] ss:$0 sm:$0xff] }
 0x13a   :  { %v386_v52 = vmul.f32 %v262_v29, %v857_v49 }
 0x13b   :  { %v410_v59 = vmul.f32 %v942_v30, %v390_v16 }
 0x13c   :  { %v406_v37 = vmul.f32 %v942_v30, %v386_v52 }
 0x13d   :  { %v430_v39 = vadd.f32 %v963_v23, %v410_v59 }
 0x13e   :  { %v426_v40 = vadd.f32 %v963_v23, %v406_v37 }
 0x13f   :  { %446 = vst.msk [vmem:[%s1371_s6 + $0x38] sm:$0xff] %vm39_vm0, %v430_v39  ;;  %v458_v36 = vpack.c.bf16 %v430_v39, %v429_v57 }
 0x140   :  { %442 = vst.msk [vmem:[%s1371_s6 + $0x18] sm:$0xff] %vm39_vm0, %v426_v40  ;;  %v456_v49 = vpack.c.bf16 %v426_v40, %v425_v38 }
 0x141   :  { %573 = vmatmul.msk.bf16.gmra.mxu1 %vm39_vm0, %v458_v36 }
 0x142   :  { %571 = vmatmul.msk.bf16.gmra.mxu0 %vm39_vm0, %v456_v49 }
 0x1a3   :  { %v526_v30 = vpop.f32.mrf.mxu2 }
 0x1a4   :  { %v527_v23 = vadd.f32 %v587_v55, %v526_v30 }
 0x1a6   :  { %554 = vst.msk [vmem:[%s1372_s5 + $0x40] sm:$0xff] %vm39_vm0, %v527_v23 }
 0x1a7   :  { %v536_v26 = vpop.f32.mrf.mxu3 }
 0x1a8   :  { %v537_v54 = vadd.f32 %v587_v55, %v536_v26 }
 0x1aa   :  { %558 = vst.msk [vmem:[%s1372_s5 + $0x60] sm:$0xff] %vm39_vm0, %v537_v54 }
 0x1ab   :  { %v506_v19 = vpop.f32.mrf.mxu0  ;;  %v528_v42 = vpop.f32.mrf.mxu2 }
 0x1ac   :  { %v507_v32 = vadd.f32 %v587_v55, %v506_v19  ;;  %v529_v20 = vadd.f32 %v587_v55, %v528_v42 }
 0x1ad   :  { %v516_v41 = vpop.f32.mrf.mxu1 }
 0x1ae   :  { %v517_v61 = vadd.f32 %v587_v55, %v516_v41  ;;  %546 = vst.msk [vmem:[%s1372_s5] sm:$0xff] %vm39_vm0, %v507_v32 }
 0x1af   :  { %v538_v15 = vpop.f32.mrf.mxu3  ;;  %555 = vst.msk [vmem:[%s1372_s5 + $0x48] sm:$0xff] %vm39_vm0, %v529_v20 }
 0x1b0   :  { %v539_v33 = vadd.f32 %v587_v55, %v538_v15  ;;  %550 = vst.msk [vmem:[%s1372_s5 + $0x20] sm:$0xff] %vm39_vm0, %v517_v61 }
 0x1b2   :  { %559 = vst.msk [vmem:[%s1372_s5 + $0x68] sm:$0xff] %vm39_vm0, %v539_v33 }
 0x1b3   :  { %v508_v27 = vpop.f32.mrf.mxu0 }
 0x1b4   :  { %v509_v24 = vadd.f32 %v587_v55, %v508_v27  ;;  %v531_v56 = vpop.f32.mrf.mxu2 }
 0x1b5   :  { %v518_v2 = vpop.f32.mrf.mxu1  ;;  %v532_v21 = vadd.f32 %v587_v55, %v531_v56 }
 0x1b6   :  { %v519_v22 = vadd.f32 %v587_v55, %v518_v2  ;;  %547 = vst.msk [vmem:[%s1372_s5 + $0x8] sm:$0xff] %vm39_vm0, %v509_v24 }
 0x1b7   :  { %556 = vst.msk [vmem:[%s1372_s5 + $0x50] sm:$0xff] %vm39_vm0, %v532_v21 }
 0x1b8   :  { %551 = vst.msk [vmem:[%s1372_s5 + $0x28] sm:$0xff] %vm39_vm0, %v519_v22 }
 0x1bb   :  { %v541_v46 = vpop.f32.mrf.mxu3 }
 0x1bc   :  { %v542_v51 = vadd.f32 %v587_v55, %v541_v46  ;;  %v533_v62 = vpop.f32.mrf.mxu2 }
 0x1bd   :  { %v534_v60 = vadd.f32 %v587_v55, %v533_v62 }
 0x1be   :  { %560 = vst.msk [vmem:[%s1372_s5 + $0x70] sm:$0xff] %vm39_vm0, %v542_v51  ;;  %v521_v13 = vpop.f32.mrf.mxu1 }
 0x1bf   :  { %v511_v0 = vpop.f32.mrf.mxu0  ;;  %v522_v50 = vadd.f32 %v587_v55, %v521_v13  ;;  %557 = vst.msk [vmem:[%s1372_s5 + $0x58] sm:$0xff] %vm39_vm0, %v534_v60 }
 0x1c0   :  { %v512_v47 = vadd.f32 %v587_v55, %v511_v0 }
 0x1c1   :  { %552 = vst.msk [vmem:[%s1372_s5 + $0x30] sm:$0xff] %vm39_vm0, %v522_v50 }
 0x1c2   :  { %548 = vst.msk [vmem:[%s1372_s5 + $0x10] sm:$0xff] %vm39_vm0, %v512_v47 }
 0x1c3   :  { %v543_v25 = vpop.f32.mrf.mxu3 }
 0x1c4   :  { %v544_v3 = vadd.f32 %v587_v55, %v543_v25 }
 0x1c6   :  { %561 = vst.msk [vmem:[%s1372_s5 + $0x78] sm:$0xff] %vm39_vm0, %v544_v3  ;;  %v523_v4 = vpop.f32.mrf.mxu1 }
 0x1c7   :  { %v513_v35 = vpop.f32.mrf.mxu0  ;;  %v524_v58 = vadd.f32 %v587_v55, %v523_v4 }
 0x1c8   :  { %v514_v6 = vadd.f32 %v587_v55, %v513_v35 }
 0x1c9   :  { %553 = vst.msk [vmem:[%s1372_s5 + $0x38] sm:$0xff] %vm39_vm0, %v524_v58 }
 0x1ca   :  { %549 = vst.msk [vmem:[%s1372_s5 + $0x18] sm:$0xff] %vm39_vm0, %v514_v6 }

// kernel: encoder_stage.20
= control target key start
LH: loop header
LB: loop body
LE: loop exit
PB: predicated region body
PF: predicated region fallthrough
CT: control target
= control target key end

     0   :  { %vm73_vm0 = vcmask 261120   ;;  %v215_v43 = vmov 32.0   ;;  %s354_s1 = inlined_call_operand.vmem [shape: f32[128,32], index: 1, kind: input, shape index: {}]   ;;  %s355_s2 = inlined_call_operand.vmem [shape: f32[1,32], index: 2, kind: input, shape index: {}]   ;;  %s356_s0 = inlined_call_operand.vmem [shape: f32[32,128], index: 0, kind: input, shape index: {}]   ;;  %s357_s3 = inlined_call_operand.vmem [shape: f32[1,32], index: 3, kind: input, shape index: {}]   ;;  %s358_s4 = inlined_call_operand.vmem [shape: f32[1,32], index: 4, kind: input, shape index: {}]   ;;  %s359_s5 = inlined_call_operand.vmem [shape: f32[32,32], index: 5, kind: output, shape index: {}]  }
   0x1   :  { %v40_v0 = vld [vmem:[%s354_s1 + $0x70] sm:$0xff]  ;;  %v41_v1 = vld [vmem:[%s354_s1 + $0x78] sm:$0xff]  ;;  %v38_v2 = vld [vmem:[%s354_s1 + $0x60] sm:$0xff]  ;;  %205 = vrcp.f32 %v215_v43 }
   0x2   :  { %v49_v3 = vpack.c.bf16 %v41_v1, %v40_v0  ;;  %v39_v4 = vld [vmem:[%s354_s1 + $0x68] sm:$0xff]  ;;  %v36_v6 = vld [vmem:[%s354_s1 + $0x50] sm:$0xff]  ;;  %v37_v7 = vld [vmem:[%s354_s1 + $0x58] sm:$0xff] }
   0x3   :  { %v48_v5 = vpack.c.bf16 %v39_v4, %v38_v2  ;;  %v47_v8 = vpack.c.bf16 %v37_v7, %v36_v6  ;;  %v34_v9 = vld [vmem:[%s354_s1 + $0x40] sm:$0xff]  ;;  %v35_v10 = vld [vmem:[%s354_s1 + $0x48] sm:$0xff]  ;;  %v32_v12 = vld [vmem:[%s354_s1 + $0x30] sm:$0xff] }
   0x4   :  { %54 = vmatpush.bf16.msra.mxu0 %v49_v3  ;;  %193 = vmatpush.bf16.msra.mxu1 %v49_v3  ;;  %v46_v11 = vpack.c.bf16 %v35_v10, %v34_v9  ;;  %v33_v13 = vld [vmem:[%s354_s1 + $0x38] sm:$0xff]  ;;  %v30_v15 = vld [vmem:[%s354_s1 + $0x20] sm:$0xff]  ;;  %v31_v16 = vld [vmem:[%s354_s1 + $0x28] sm:$0xff] }
   0x5   :  { %v45_v14 = vpack.c.bf16 %v33_v13, %v32_v12  ;;  %v44_v17 = vpack.c.bf16 %v31_v16, %v30_v15  ;;  %v28_v18 = vld [vmem:[%s354_s1 + $0x10] sm:$0xff]  ;;  %v29_v19 = vld [vmem:[%s354_s1 + $0x18] sm:$0xff]  ;;  %v26_v21 = vld [vmem:[%s354_s1] sm:$0xff] }
   0x6   :  { %v43_v20 = vpack.c.bf16 %v29_v19, %v28_v18  ;;  %v27_v22 = vld [vmem:[%s354_s1 + $0x8] sm:$0xff]  ;;  %v20_v23 = vld [vmem:[%s356_s0] sm:$0xff]  ;;  %v22_v26 = vld [vmem:[%s356_s0 + $0x10] sm:$0xff] }
   0x7   :  { %v42_v24 = vpack.c.bf16 %v27_v22, %v26_v21  ;;  %v21_v25 = vld [vmem:[%s356_s0 + $0x8] sm:$0xff]  ;;  %v23_v27 = vld [vmem:[%s356_s0 + $0x18] sm:$0xff]  ;;  %v202_v30 = vld [vmem:[%s355_s2] ss:$0 sm:$0xff]  ;;  %v206_v44 = vpop.eup %205 }
   0x8   :  { %55 = vmatpush.bf16.msra.mxu0 %v48_v5  ;;  %194 = vmatpush.bf16.msra.mxu1 %v48_v5  ;;  %v24_v28 = vpack.c.bf16 %v21_v25, %v20_v23  ;;  %v25_v29 = vpack.c.bf16 %v23_v27, %v22_v26  ;;  %v87_v45 = vmul.f32 32.0, %v206_v44  ;;  %vm91_vm1 = vweird.f32 %v206_v44 }
   0xa   :  { %v88_v46 = vsub.f32 1.0, %v87_v45 }
   0xc   :  { %56 = vmatpush.bf16.msra.mxu0 %v47_v8  ;;  %195 = vmatpush.bf16.msra.mxu1 %v47_v8  ;;  %v89_v47 = vmul.f32 %v206_v44, %v88_v46 }
   0xe   :  { %v90_v48 = vadd.f32 %v206_v44, %v89_v47 }
  0x10   :  { %57 = vmatpush.bf16.msra.mxu0 %v46_v11  ;;  %196 = vmatpush.bf16.msra.mxu1 %v46_v11  ;;  %v92_v49 = vsel %vm91_vm1, %v206_v44, %v90_v48 }
  0x14   :  { %58 = vmatpush.bf16.msra.mxu0 %v45_v14  ;;  %197 = vmatpush.bf16.msra.mxu1 %v45_v14 }
  0x18   :  { %59 = vmatpush.bf16.msra.mxu0 %v44_v17  ;;  %198 = vmatpush.bf16.msra.mxu1 %v44_v17 }
  0x1c   :  { %60 = vmatpush.bf16.msra.mxu0 %v43_v20  ;;  %199 = vmatpush.bf16.msra.mxu1 %v43_v20 }
  0x20   :  { %61 = vmatpush.bf16.msra.mxu0 %v42_v24  ;;  %200 = vmatpush.bf16.msra.mxu1 %v42_v24 }
  0x23   :  { %62 = vmatmul.bf16.vlgmr.msra.gmra.mxu0 %v24_v28  ;;  %67 = vmatmul.bf16.vlgmr.msra.gmra.mxu1 %v25_v29 }
  0xa0   :  { %v63_v31 = vpop.f32.mrf.mxu0  ;;  %v68_v32 = vpop.f32.mrf.mxu1 }
  0xa1   :  { %v64_v33 = vadd.f32 %v202_v30, %v63_v31  ;;  %v69_v34 = vadd.f32 %v202_v30, %v68_v32  ;;  %v203_v32 = vld [vmem:[%s357_s3] ss:$0 sm:$0xff] }
  0xa3   :  { %v80_v35 = vsel %vm73_vm0, %v69_v34, 0.0  ;;  %v74_v36 = vsel %vm73_vm0, %v64_v33, 0.0 }
  0xa4   :  { %81 = vadd.xlane.f32.xlu1 %v80_v35  ;;  %75 = vadd.xlane.f32.xlu0 %v74_v36 }
  0xa8   :  { %v65_v37 = vpop.f32.mrf.mxu0  ;;  %v70_v38 = vpop.f32.mrf.mxu1 }
  0xa9   :  { %v66_v39 = vadd.f32 %v202_v30, %v65_v37  ;;  %v71_v40 = vadd.f32 %v202_v30, %v70_v38  ;;  %v204_v37 = vld [vmem:[%s358_s4] ss:$0 sm:$0xff] }
  0xab   :  { %v83_v41 = vsel %vm73_vm0, %v71_v40, 0.0  ;;  %v77_v42 = vsel %vm73_vm0, %v66_v39, 0.0 }
  0xac   :  { %84 = vadd.xlane.f32.xlu1 %v83_v41  ;;  %78 = vadd.xlane.f32.xlu0 %v77_v42 }
 0x117   :  { %v82_v50 = vpop.xlane.xlu1 %81  ;;  %v76_v51 = vpop.xlane.xlu0 %75 }
 0x118   :  { %v95_v52 = vmul.f32 %v92_v49, %v82_v50  ;;  %v93_v53 = vmul.f32 %v92_v49, %v76_v51 }
 0x11a   :  { %v313_v54 = vsub.f32 %v69_v34, %v95_v52  ;;  %v97_v55 = vsub.f32 %v64_v33, %v93_v53 }
 0x11c   :  { %v103_v56 = vmul.f32 %v313_v54, %v313_v54  ;;  %v101_v57 = vmul.f32 %v97_v55, %v97_v55 }
 0x11e   :  { %v111_v58 = vsel %vm73_vm0, %v103_v56, 0.0  ;;  %v105_v59 = vsel %vm73_vm0, %v101_v57, 0.0 }
 0x11f   :  { %v85_v60 = vpop.xlane.xlu1 %84  ;;  %112 = vadd.xlane.f32.xlu0 %v111_v58  ;;  %106 = vadd.xlane.f32.xlu2 %v105_v59  ;;  %v79_v61 = vpop.xlane.xlu0 %78 }
 0x120   :  { %v96_v62 = vmul.f32 %v92_v49, %v85_v60  ;;  %v94_v63 = vmul.f32 %v92_v49, %v79_v61 }
 0x122   :  { %v319_v0 = vsub.f32 %v71_v40, %v96_v62  ;;  %v321_v1 = vsub.f32 %v66_v39, %v94_v63 }
 0x124   :  { %v104_v2 = vmul.f32 %v319_v0, %v319_v0  ;;  %v102_v3 = vmul.f32 %v321_v1, %v321_v1 }
 0x126   :  { %v114_v4 = vsel %vm73_vm0, %v104_v2, 0.0  ;;  %v108_v5 = vsel %vm73_vm0, %v102_v3, 0.0 }
 0x127   :  { %115 = vadd.xlane.f32.xlu1 %v114_v4  ;;  %109 = vadd.xlane.f32.xlu2 %v108_v5 }
 0x192   :  { %v107_v6 = vpop.xlane.xlu2 %106  ;;  %v113_v7 = vpop.xlane.xlu0 %112 }
 0x193   :  { %v117_v8 = vmul.f32 %v107_v6, %v92_v49  ;;  %v119_v9 = vmul.f32 %v113_v7, %v92_v49 }
 0x195   :  { %v121_v10 = vadd.f32 1e-05, %v117_v8  ;;  %v123_v11 = vadd.f32 1e-05, %v119_v9 }
 0x197   :  { %207 = vrsqrt.f32 %v121_v10  ;;  %vm131_vm4 = vweird.f32 %v121_v10  ;;  %vm151_vm6 = vweird.f32 %v123_v11 }
 0x198   :  { %209 = vrsqrt.f32 %v123_v11 }
 0x19a   :  { %v116_v12 = vpop.xlane.xlu1 %115  ;;  %v110_v13 = vpop.xlane.xlu2 %109 }
 0x19b   :  { %v120_v14 = vmul.f32 %v116_v12, %v92_v49  ;;  %v118_v15 = vmul.f32 %v110_v13, %v92_v49 }
 0x19d   :  { %v208_v16 = vpop.eup %207  ;;  %v124_v17 = vadd.f32 1e-05, %v120_v14  ;;  %v122_v18 = vadd.f32 1e-05, %v118_v15 }
 0x19e   :  { %v210_v19 = vpop.eup %209  ;;  %v126_v20 = vmul.f32 %v208_v16, %v121_v10  ;;  %vm132_vm2 = vweird.f32 %v208_v16 }
 0x19f   :  { %v146_v21 = vmul.f32 %v210_v19, %v123_v11  ;;  %211 = vrsqrt.f32 %v124_v17  ;;  %vm152_vm3 = vweird.f32 %v210_v19  ;;  %vm133_vm5 = vmor %vm131_vm4, %vm132_vm2  ;;  %vm161_vm10 = vweird.f32 %v124_v17 }
 0x1a0   :  { %v127_v22 = vmul.f32 %v208_v16, %v126_v20  ;;  %213 = vrsqrt.f32 %v122_v18  ;;  %vm153_vm7 = vmor %vm151_vm6, %vm152_vm3  ;;  %vm141_vm12 = vweird.f32 %v122_v18 }
 0x1a1   :  { %v147_v23 = vmul.f32 %v210_v19, %v146_v21 }
 0x1a2   :  { %v128_v24 = vmul.f32 0.5, %v127_v22 }
 0x1a3   :  { %v148_v25 = vmul.f32 0.5, %v147_v23 }
 0x1a4   :  { %v129_v26 = vsub.f32 1.5, %v128_v24 }
 0x1a5   :  { %v212_v27 = vpop.eup %211  ;;  %v149_v28 = vsub.f32 1.5, %v148_v25 }
 0x1a6   :  { %v214_v29 = vpop.eup %213  ;;  %v130_v30 = vmul.f32 %v208_v16, %v129_v26  ;;  %v156_v31 = vmul.f32 %v212_v27, %v124_v17  ;;  %vm162_vm8 = vweird.f32 %v212_v27 }
 0x1a7   :  { %v150_v33 = vmul.f32 %v210_v19, %v149_v28  ;;  %v136_v34 = vmul.f32 %v214_v29, %v122_v18  ;;  %vm142_vm9 = vweird.f32 %v214_v29  ;;  %vm163_vm11 = vmor %vm161_vm10, %vm162_vm8 }
 0x1a8   :  { %v134_v35 = vsel %vm133_vm5, %v208_v16, %v130_v30  ;;  %v157_v36 = vmul.f32 %v212_v27, %v156_v31  ;;  %vm143_vm13 = vmor %vm141_vm12, %vm142_vm9 }
 0x1a9   :  { %v165_v38 = vmul.f32 %v134_v35, %v97_v55  ;;  %v154_v39 = vsel %vm153_vm7, %v210_v19, %v150_v33  ;;  %v137_v40 = vmul.f32 %v214_v29, %v136_v34 }
 0x1aa   :  { %v167_v41 = vmul.f32 %v154_v39, %v313_v54  ;;  %v158_v42 = vmul.f32 0.5, %v157_v36 }
 0x1ab   :  { %v173_v43 = vmul.f32 %v203_v32, %v165_v38  ;;  %v138_v44 = vmul.f32 0.5, %v137_v40 }
 0x1ac   :  { %v175_v45 = vmul.f32 %v203_v32, %v167_v41  ;;  %v159_v46 = vsub.f32 1.5, %v158_v42 }
 0x1ad   :  { %v181_v47 = vadd.f32 %v204_v37, %v173_v43  ;;  %v139_v48 = vsub.f32 1.5, %v138_v44 }
 0x1ae   :  { %v183_v49 = vadd.f32 %v204_v37, %v175_v45  ;;  %v160_v50 = vmul.f32 %v212_v27, %v159_v46 }
 0x1af   :  { %185 = vst.msk [vmem:[%s359_s5] sm:$0xff] %vm73_vm0, %v181_v47  ;;  %v140_v51 = vmul.f32 %v214_v29, %v139_v48 }
 0x1b0   :  { %187 = vst.msk [vmem:[%s359_s5 + $0x10] sm:$0xff] %vm73_vm0, %v183_v49  ;;  %v164_v52 = vsel %vm163_vm11, %v212_v27, %v160_v50 }
 0x1b1   :  { %v168_v53 = vmul.f32 %v164_v52, %v319_v0  ;;  %v144_v54 = vsel %vm143_vm13, %v214_v29, %v140_v51 }
 0x1b2   :  { %v166_v55 = vmul.f32 %v144_v54, %v321_v1 }
 0x1b3   :  { %v176_v56 = vmul.f32 %v203_v32, %v168_v53 }
 0x1b4   :  { %v174_v57 = vmul.f32 %v203_v32, %v166_v55 }
 0x1b5   :  { %v184_v58 = vadd.f32 %v204_v37, %v176_v56 }
 0x1b6   :  { %v182_v59 = vadd.f32 %v204_v37, %v174_v57 }
 0x1b7   :  { %188 = vst.msk [vmem:[%s359_s5 + $0x18] sm:$0xff] %vm73_vm0, %v184_v58 }
 0x1b8   :  { %186 = vst.msk [vmem:[%s359_s5 + $0x8] sm:$0xff] %vm73_vm0, %v182_v59 }

// kernel: encoder_stage.21
= control target key start
LH: loop header
LB: loop body
LE: loop exit
PB: predicated region body
PF: predicated region fallthrough
CT: control target
= control target key end

     0   :  { %vm31_vm0 = vcmask 261120   ;;  %vm57_vm1 = vcmask 523264   ;;  %s130_s1 = inlined_call_operand.vmem [shape: f32[32,64], index: 1, kind: input, shape index: {}]   ;;  %s131_s0 = inlined_call_operand.vmem [shape: f32[32,32], index: 0, kind: input, shape index: {}]   ;;  %s132_s2 = inlined_call_operand.vmem [shape: f32[1,64], index: 2, kind: input, shape index: {}]   ;;  %s133_s3 = inlined_call_operand.vmem [shape: f32[32,64], index: 3, kind: output, shape index: {}]  }
   0x1   :  { %v23_v0 = vld [vmem:[%s130_s1 + $0x10] sm:$0xff]  ;;  %v24_v1 = vld [vmem:[%s130_s1 + $0x18] sm:$0xff]  ;;  %v21_v2 = vld [vmem:[%s130_s1] sm:$0xff] }
   0x2   :  { %v26_v3 = vpack.c.bf16 %v24_v1, %v23_v0  ;;  %v22_v4 = vld [vmem:[%s130_s1 + $0x8] sm:$0xff]  ;;  %v15_v5 = vld [vmem:[%s131_s0] sm:$0xff]  ;;  %v17_v8 = vld [vmem:[%s131_s0 + $0x10] sm:$0xff] }
   0x3   :  { %v25_v6 = vpack.c.bf16 %v22_v4, %v21_v2  ;;  %v16_v7 = vld [vmem:[%s131_s0 + $0x8] sm:$0xff]  ;;  %v18_v9 = vld [vmem:[%s131_s0 + $0x18] sm:$0xff]  ;;  %v70_v12 = vld [vmem:[%s132_s2] ss:$0 sm:$0xff] }
   0x4   :  { %44 = vmatpush.bf16.msra.mxu0 %v26_v3  ;;  %68 = vmatpush.bf16.msra.mxu1 %v26_v3  ;;  %v19_v10 = vpack.c.bf16 %v16_v7, %v15_v5  ;;  %v20_v11 = vpack.c.bf16 %v18_v9, %v17_v8 }
   0x8   :  { %45 = vmatpush.bf16.msra.mxu0 %v25_v6  ;;  %69 = vmatpush.bf16.msra.mxu1 %v25_v6 }
   0xb   :  { %66 = vmatmul.msk.bf16.vlgmr.msra.gmra.mxu0 %vm31_vm0, %v19_v10  ;;  %67 = vmatmul.msk.bf16.vlgmr.msra.gmra.mxu1 %vm31_vm0, %v20_v11 }
  0x88   :  { %v47_v13 = vpop.f32.mrf.mxu0  ;;  %v52_v14 = vpop.f32.mrf.mxu1 }
  0x89   :  { %v48_v15 = vadd.f32 %v70_v12, %v47_v13  ;;  %v53_v16 = vadd.f32 %v70_v12, %v52_v14 }
  0x8b   :  { %58 = vst.msk [vmem:[%s133_s3] sm:$0xff] %vm57_vm1, %v48_v15 }
  0x8c   :  { %60 = vst.msk [vmem:[%s133_s3 + $0x10] sm:$0xff] %vm57_vm1, %v53_v16 }
  0x90   :  { %v49_v17 = vpop.f32.mrf.mxu0  ;;  %v54_v18 = vpop.f32.mrf.mxu1 }
  0x91   :  { %v50_v19 = vadd.f32 %v70_v12, %v49_v17  ;;  %v55_v20 = vadd.f32 %v70_v12, %v54_v18 }
  0x93   :  { %59 = vst.msk [vmem:[%s133_s3 + $0x8] sm:$0xff] %vm57_vm1, %v50_v19 }
  0x94   :  { %61 = vst.msk [vmem:[%s133_s3 + $0x18] sm:$0xff] %vm57_vm1, %v55_v20 }

// kernel: encoder_stage.23
= control target key start
LH: loop header
LB: loop body
LE: loop exit
PB: predicated region body
PF: predicated region fallthrough
CT: control target
= control target key end

     0   :  { %vm52_vm0 = vcmask 261120   ;;  %s419_s1 = inlined_call_operand.vmem [shape: f32[32,32], index: 1, kind: input, shape index: {}]   ;;  %s420_s0 = inlined_call_operand.vmem [shape: f32[128,32], index: 0, kind: input, shape index: {}]   ;;  %s421_s2 = inlined_call_operand.vmem [shape: f32[1,32], index: 2, kind: input, shape index: {}]   ;;  %s422_s3 = inlined_call_operand.vmem [shape: f32[128,32], index: 3, kind: input, shape index: {}]   ;;  %s423_s4 = inlined_call_operand.vmem [shape: f32[128,32], index: 4, kind: output, shape index: {}]  }
   0x1   :  { %v44_v0 = vld [vmem:[%s419_s1 + $0x10] sm:$0xff]  ;;  %v45_v1 = vld [vmem:[%s419_s1 + $0x18] sm:$0xff]  ;;  %v42_v2 = vld [vmem:[%s419_s1] sm:$0xff] }
   0x2   :  { %v47_v3 = vpack.c.bf16 %v45_v1, %v44_v0  ;;  %v43_v4 = vld [vmem:[%s419_s1 + $0x8] sm:$0xff]  ;;  %v18_v5 = vld [vmem:[%s420_s0] sm:$0xff]  ;;  %v20_v18 = vld [vmem:[%s420_s0 + $0x10] sm:$0xff] }
   0x3   :  { %v19_v6 = vld [vmem:[%s420_s0 + $0x8] sm:$0xff]  ;;  %v46_v7 = vpack.c.bf16 %v43_v4, %v42_v2  ;;  %v22_v8 = vld [vmem:[%s420_s0 + $0x20] sm:$0xff]  ;;  %v21_v19 = vld [vmem:[%s420_s0 + $0x18] sm:$0xff] }
   0x4   :  { %83 = vmatpush.bf16.msra.mxu0 %v47_v3  ;;  %186 = vmatpush.bf16.msra.mxu1 %v47_v3  ;;  %v23_v9 = vld [vmem:[%s420_s0 + $0x28] sm:$0xff]  ;;  %v26_v10 = vld [vmem:[%s420_s0 + $0x40] sm:$0xff]  ;;  %v34_v14 = vpack.c.bf16 %v19_v6, %v18_v5  ;;  %v24_v20 = vld [vmem:[%s420_s0 + $0x30] sm:$0xff]  ;;  %v35_v26 = vpack.c.bf16 %v21_v19, %v20_v18 }
   0x5   :  { %187 = vmatpush.bf16.msra.mxu2 %v47_v3  ;;  %188 = vmatpush.bf16.msra.mxu3 %v47_v3  ;;  %v27_v11 = vld [vmem:[%s420_s0 + $0x48] sm:$0xff]  ;;  %v30_v12 = vld [vmem:[%s420_s0 + $0x60] sm:$0xff]  ;;  %v36_v15 = vpack.c.bf16 %v23_v9, %v22_v8  ;;  %v25_v21 = vld [vmem:[%s420_s0 + $0x38] sm:$0xff] }
   0x6   :  { %v31_v13 = vld [vmem:[%s420_s0 + $0x68] sm:$0xff]  ;;  %v38_v16 = vpack.c.bf16 %v27_v11, %v26_v10  ;;  %v28_v22 = vld [vmem:[%s420_s0 + $0x50] sm:$0xff]  ;;  %v29_v23 = vld [vmem:[%s420_s0 + $0x58] sm:$0xff]  ;;  %v37_v27 = vpack.c.bf16 %v25_v21, %v24_v20 }
   0x7   :  { %v40_v17 = vpack.c.bf16 %v31_v13, %v30_v12  ;;  %v32_v24 = vld [vmem:[%s420_s0 + $0x70] sm:$0xff]  ;;  %v33_v25 = vld [vmem:[%s420_s0 + $0x78] sm:$0xff]  ;;  %v39_v28 = vpack.c.bf16 %v29_v23, %v28_v22  ;;  %v289_v30 = vld [vmem:[%s421_s2] ss:$0 sm:$0xff] }
   0x8   :  { %84 = vmatpush.bf16.msra.mxu0 %v46_v7  ;;  %189 = vmatpush.bf16.msra.mxu1 %v46_v7  ;;  %v41_v29 = vpack.c.bf16 %v33_v25, %v32_v24  ;;  %v126_v32 = vld [vmem:[%s422_s3] sm:$0xff]  ;;  %v127_v46 = vld [vmem:[%s422_s3 + $0x8] sm:$0xff]  ;;  %v128_v62 = vld [vmem:[%s422_s3 + $0x10] sm:$0xff] }
   0x9   :  { %190 = vmatpush.bf16.msra.mxu2 %v46_v7  ;;  %191 = vmatpush.bf16.msra.mxu3 %v46_v7  ;;  %v130_v34 = vld [vmem:[%s422_s3 + $0x20] sm:$0xff]  ;;  %v131_v48 = vld [vmem:[%s422_s3 + $0x28] sm:$0xff]  ;;  %v132_v0 = vld [vmem:[%s422_s3 + $0x30] sm:$0xff] }
   0xa   :  { %v134_v40 = vld [vmem:[%s422_s3 + $0x40] sm:$0xff]  ;;  %v135_v56 = vld [vmem:[%s422_s3 + $0x48] sm:$0xff]  ;;  %v136_v8 = vld [vmem:[%s422_s3 + $0x50] sm:$0xff] }
   0xb   :  { %178 = vmatmul.msk.bf16.vlgmr.msra.gmra.mxu0 %vm52_vm0, %v34_v14  ;;  %180 = vmatmul.msk.bf16.vlgmr.msra.gmra.mxu1 %vm52_vm0, %v36_v15  ;;  %v138_v42 = vld [vmem:[%s422_s3 + $0x60] sm:$0xff]  ;;  %v139_v58 = vld [vmem:[%s422_s3 + $0x68] sm:$0xff]  ;;  %v140_v10 = vld [vmem:[%s422_s3 + $0x70] sm:$0xff] }
   0xc   :  { %182 = vmatmul.msk.bf16.vlgmr.msra.gmra.mxu2 %vm52_vm0, %v38_v16  ;;  %184 = vmatmul.msk.bf16.vlgmr.msra.gmra.mxu3 %vm52_vm0, %v40_v17  ;;  %v129_v14 = vld [vmem:[%s422_s3 + $0x18] sm:$0xff] }
   0xd   :  { %v133_v16 = vld [vmem:[%s422_s3 + $0x38] sm:$0xff] }
   0xe   :  { %v137_v24 = vld [vmem:[%s422_s3 + $0x58] sm:$0xff] }
  0x1b   :  { %179 = vmatmul.msk.bf16.gmra.mxu0 %vm52_vm0, %v35_v26  ;;  %181 = vmatmul.msk.bf16.gmra.mxu1 %vm52_vm0, %v37_v27  ;;  %v141_v26 = vld [vmem:[%s422_s3 + $0x78] sm:$0xff] }
  0x1c   :  { %183 = vmatmul.msk.bf16.gmra.mxu2 %vm52_vm0, %v39_v28  ;;  %185 = vmatmul.msk.bf16.gmra.mxu3 %vm52_vm0, %v41_v29 }
  0x88   :  { %v86_v31 = vpop.f32.mrf.mxu0  ;;  %v96_v33 = vpop.f32.mrf.mxu1 }
  0x89   :  { %v87_v35 = vadd.f32 %v289_v30, %v86_v31  ;;  %v97_v36 = vadd.f32 %v289_v30, %v96_v33 }
  0x8b   :  { %v142_v37 = vadd.f32 %v126_v32, %v87_v35  ;;  %v146_v38 = vadd.f32 %v130_v34, %v97_v36 }
  0x8d   :  { %158 = vst.msk [vmem:[%s423_s4] sm:$0xff] %vm52_vm0, %v142_v37 }
  0x8e   :  { %162 = vst.msk [vmem:[%s423_s4 + $0x20] sm:$0xff] %vm52_vm0, %v146_v38 }
  0x8f   :  { %v106_v39 = vpop.f32.mrf.mxu2  ;;  %v116_v41 = vpop.f32.mrf.mxu3 }
  0x90   :  { %v107_v43 = vadd.f32 %v289_v30, %v106_v39  ;;  %v117_v44 = vadd.f32 %v289_v30, %v116_v41  ;;  %v88_v45 = vpop.f32.mrf.mxu0  ;;  %v98_v47 = vpop.f32.mrf.mxu1 }
  0x91   :  { %v89_v49 = vadd.f32 %v289_v30, %v88_v45  ;;  %v99_v50 = vadd.f32 %v289_v30, %v98_v47 }
  0x92   :  { %v150_v51 = vadd.f32 %v134_v40, %v107_v43  ;;  %v154_v52 = vadd.f32 %v138_v42, %v117_v44 }
  0x93   :  { %v143_v53 = vadd.f32 %v127_v46, %v89_v49  ;;  %v147_v54 = vadd.f32 %v131_v48, %v99_v50 }
  0x94   :  { %166 = vst.msk [vmem:[%s423_s4 + $0x40] sm:$0xff] %vm52_vm0, %v150_v51 }
  0x95   :  { %170 = vst.msk [vmem:[%s423_s4 + $0x60] sm:$0xff] %vm52_vm0, %v154_v52 }
  0x96   :  { %159 = vst.msk [vmem:[%s423_s4 + $0x8] sm:$0xff] %vm52_vm0, %v143_v53 }
  0x97   :  { %163 = vst.msk [vmem:[%s423_s4 + $0x28] sm:$0xff] %vm52_vm0, %v147_v54  ;;  %v108_v55 = vpop.f32.mrf.mxu2  ;;  %v118_v57 = vpop.f32.mrf.mxu3 }
  0x98   :  { %v109_v59 = vadd.f32 %v289_v30, %v108_v55  ;;  %v119_v60 = vadd.f32 %v289_v30, %v118_v57  ;;  %v91_v61 = vpop.f32.mrf.mxu0  ;;  %v101_v63 = vpop.f32.mrf.mxu1 }
  0x99   :  { %v92_v1 = vadd.f32 %v289_v30, %v91_v61  ;;  %v102_v2 = vadd.f32 %v289_v30, %v101_v63 }
  0x9a   :  { %v151_v3 = vadd.f32 %v135_v56, %v109_v59  ;;  %v155_v4 = vadd.f32 %v139_v58, %v119_v60 }
  0x9b   :  { %v144_v5 = vadd.f32 %v128_v62, %v92_v1  ;;  %v148_v6 = vadd.f32 %v132_v0, %v102_v2 }
  0x9c   :  { %167 = vst.msk [vmem:[%s423_s4 + $0x48] sm:$0xff] %vm52_vm0, %v151_v3 }
  0x9d   :  { %171 = vst.msk [vmem:[%s423_s4 + $0x68] sm:$0xff] %vm52_vm0, %v155_v4 }
  0x9e   :  { %160 = vst.msk [vmem:[%s423_s4 + $0x10] sm:$0xff] %vm52_vm0, %v144_v5 }
  0x9f   :  { %164 = vst.msk [vmem:[%s423_s4 + $0x30] sm:$0xff] %vm52_vm0, %v148_v6  ;;  %v111_v7 = vpop.f32.mrf.mxu2  ;;  %v121_v9 = vpop.f32.mrf.mxu3 }
  0xa0   :  { %v112_v11 = vadd.f32 %v289_v30, %v111_v7  ;;  %v122_v12 = vadd.f32 %v289_v30, %v121_v9  ;;  %v93_v13 = vpop.f32.mrf.mxu0  ;;  %v103_v15 = vpop.f32.mrf.mxu1 }
  0xa1   :  { %v94_v17 = vadd.f32 %v289_v30, %v93_v13  ;;  %v104_v18 = vadd.f32 %v289_v30, %v103_v15 }
  0xa2   :  { %v152_v19 = vadd.f32 %v136_v8, %v112_v11  ;;  %v156_v20 = vadd.f32 %v140_v10, %v122_v12 }
  0xa3   :  { %v145_v21 = vadd.f32 %v129_v14, %v94_v17  ;;  %v149_v22 = vadd.f32 %v133_v16, %v104_v18 }
  0xa4   :  { %168 = vst.msk [vmem:[%s423_s4 + $0x50] sm:$0xff] %vm52_vm0, %v152_v19 }
  0xa5   :  { %172 = vst.msk [vmem:[%s423_s4 + $0x70] sm:$0xff] %vm52_vm0, %v156_v20 }
  0xa6   :  { %161 = vst.msk [vmem:[%s423_s4 + $0x18] sm:$0xff] %vm52_vm0, %v145_v21 }
  0xa7   :  { %165 = vst.msk [vmem:[%s423_s4 + $0x38] sm:$0xff] %vm52_vm0, %v149_v22  ;;  %v113_v23 = vpop.f32.mrf.mxu2  ;;  %v123_v25 = vpop.f32.mrf.mxu3 }
  0xa8   :  { %v114_v27 = vadd.f32 %v289_v30, %v113_v23  ;;  %v124_v28 = vadd.f32 %v289_v30, %v123_v25 }
  0xaa   :  { %v153_v29 = vadd.f32 %v137_v24, %v114_v27  ;;  %v157_v31 = vadd.f32 %v141_v26, %v124_v28 }
  0xac   :  { %169 = vst.msk [vmem:[%s423_s4 + $0x58] sm:$0xff] %vm52_vm0, %v153_v29 }
  0xad   :  { %173 = vst.msk [vmem:[%s423_s4 + $0x78] sm:$0xff] %vm52_vm0, %v157_v31 }

// kernel: encoder_stage.22
= control target key start
LH: loop header
LB: loop body
LE: loop exit
PB: predicated region body
PF: predicated region fallthrough
CT: control target
= control target key end

     0   :  { %s926_s9 = smov 0   ;;  %s928_s10 = smov 0   ;;  %s1156_s0 = inlined_call_operand.vmem [shape: f32[2,64,32], index: 0, kind: input, shape index: {}]   ;;  %s1157_s1 = inlined_call_operand.vmem [shape: f32[2,16,64], index: 1, kind: input, shape index: {}]   ;;  %s1158_s2 = inlined_call_operand.vmem [shape: f32[2,64,32], index: 2, kind: output, shape index: {}]  }
   0x1   :  { %s930_s11 = smov 0  }
   0x2 LB: > { %s24_s12 = sadd.s32 1, %s901_s10  ;;  %p763_p0 = scmp.ge.s32.totalorder %s905_s11, 1  ;;  %s905_s11 = sphi %s930_s11, %s12_s11   ;;  %s901_s10 = sphi %s928_s10, %s1160_s10   ;;  %s897_s9 = sphi %s926_s9, %s1159_s9  }
   0x3   : > { %p26_p1 = scmp.ge.s32.totalorder %s24_s12, 2  ;;  %p143_p2 = scmp.lt.s32.totalorder %s905_s11, 3 }
   0x5   : > { %s1162_s12 = smov (%p26_p1, %s24_s12), 0  ;;  %p144_p3 = pnand %p763_p0, %p143_p2 }
   0x6   : > { %p179_p4 = scmp.lt.s32.totalorder (!%p144_p3), %s897_s9, 1  ;;  %s907_s21 = smov (!%p144_p3), 112  }
   0x7   : > { %147 = sbr.rel (%p144_p3) target bundleno = 874 (0x36a), region = 28  ;;  %s908_s22 = smov (!%p144_p3), 80  }
   0x8   : > { %s909_s23 = smov (!%p144_p3), 96   ;;  %s910_s24 = smov (!%p144_p3), 16  }
   0xc   : > { %s1164_s9 = smov (!%p179_p4, %s897_s9), 1  ;;  %vm219_vm0 = vcmask 130048   ;;  %vm651_vm1 = vcmask 261120  }
   0xd   : > { %s789_s13 = sshll.u32 %s1164_s9, 4  ;;  %s788_s14 = sshll.u32 %s1164_s9, 6 }
   0xe   : > { %s192_s17 = scalar_lea.vmem %s1157_s1, %s789_s13  ;;  %s186_s20 = scalar_lea.vmem %s1156_s0, %s788_s14 }
   0xf   : > { %v212_v0 = vld [vmem:[%s192_s17] sm:$0xff]  ;;  %v213_v1 = vld [vmem:[%s192_s17 + $0x8] sm:$0xff]  ;;  %v206_v3 = vld [vmem:[%s186_s20 + $0x10] sm:$0xff]  ;;  %s1121_s27 = scalar_lea.vmem %s1158_s2, %s788_s14 }
  0x10   : > { %v956_v2 = vpack.c.bf16 %v213_v1, %v212_v0  ;;  %v207_v4 = vld [vmem:[%s186_s20 + $0x18] sm:$0xff]  ;;  %v210_v6 = vld [vmem:[%s186_s20 + $0x30] sm:$0xff]  ;;  %v204_v8 = vld [vmem:[%s186_s20] sm:$0xff] }
  0x11   : > { %v215_v5 = vpack.c.bf16 %v207_v4, %v206_v3  ;;  %v211_v7 = vld [vmem:[%s186_s20 + $0x38] sm:$0xff]  ;;  %v205_v9 = vld [vmem:[%s186_s20 + $0x8] sm:$0xff]  ;;  %v208_v11 = vld [vmem:[%s186_s20 + $0x20] sm:$0xff] }
  0x12   : > { %421 = vrot.lane.b32.xlu0 %v956_v2, %s907_s21  ;;  %v217_v10 = vpack.c.bf16 %v211_v7, %v210_v6  ;;  %v209_v12 = vld [vmem:[%s186_s20 + $0x28] sm:$0xff]  ;;  %v214_v13 = vpack.c.bf16 %v205_v9, %v204_v8  ;;  %v233_v15 = vsel %vm219_vm0, %v956_v2, 0 }
  0x13   : > { %415 = vrot.lane.b32.xlu1 %v215_v5, %s907_s21  ;;  %v216_v14 = vpack.c.bf16 %v209_v12, %v208_v11  ;;  %242 = vmatpush.bf16.xpose.msra.mxu0 %v233_v15 }
  0x14   : > { %419 = vrot.lane.b32.xlu2 %v217_v10, %s907_s21 }
  0x1a   : > { %413 = vrot.lane.b32.xlu0 %v214_v13, %s907_s21  ;;  %770 = vmatmul.msk.bf16.vlgmr.msra.gmra.mxu0 %vm219_vm0, %v214_v13 }
  0x1b   : > { %417 = vrot.lane.b32.xlu1 %v216_v14, %s907_s21 }
  0x2a   : > { %771 = vmatmul.msk.bf16.gmra.mxu0 %vm219_vm0, %v215_v5 }
  0x3a   : > { %772 = vmatmul.msk.bf16.gmra.mxu0 %vm219_vm0, %v216_v14 }
  0x4a   : > { %773 = vmatmul.msk.bf16.gmra.mxu0 %vm219_vm0, %v217_v10 }
  0x6e   : > { %v420_v21 = vpop.permute.xlu2 %419 }
  0x84   : > { %v422_v16 = vpop.permute.xlu0 %421 }
  0x85   : > { %v436_v17 = vsel %vm219_vm0, %v422_v16, 0  ;;  %v416_v19 = vpop.permute.xlu1 %415 }
  0x86   : > { %445 = vmatpush.bf16.xpose.msra.mxu2 %v436_v17 }
  0x8c   : > { %v414_v18 = vpop.permute.xlu0 %413 }
  0x8d   : > { %778 = vmatmul.msk.bf16.vlgmr.msra.gmra.mxu2 %vm219_vm0, %v414_v18  ;;  %v418_v20 = vpop.permute.xlu1 %417 }
  0x97   : > { %v244_v22 = vpop.f32.mrf.mxu0 }
  0x98   : > { %v977_v35 = vmul.f32 0.25, %v244_v22 }
  0x9a   : > { %v272_v39 = vsel %vm219_vm0, %v977_v35, -inf }
  0x9d   : > { %779 = vmatmul.msk.bf16.gmra.mxu2 %vm219_vm0, %v416_v19 }
  0x9f   : > { %v246_v25 = vpop.f32.mrf.mxu0 }
  0xa0   : > { %v971_v27 = vmul.f32 0.25, %v246_v25 }
  0xa2   : > { %v275_v30 = vsel %vm219_vm0, %v971_v27, -inf }
  0xa7   : > { %v249_v37 = vpop.f32.mrf.mxu0 }
  0xa8   : > { %v999_v56 = vmul.f32 0.25, %v249_v37 }
  0xaa   : > { %v278_v57 = vsel %vm219_vm0, %v999_v56, -inf }
  0xad   : > { %780 = vmatmul.msk.bf16.gmra.mxu2 %vm219_vm0, %v418_v20 }
  0xaf   : > { %v251_v43 = vpop.f32.mrf.mxu0 }
  0xb0   : > { %v983_v45 = vmul.f32 0.25, %v251_v43 }
  0xb2   : > { %v281_v48 = vsel %vm219_vm0, %v983_v45, -inf }
  0xb7   : > { %v254_v58 = vpop.f32.mrf.mxu0 }
  0xb8   : > { %v1003_v59 = vmul.f32 0.25, %v254_v58 }
  0xba   : > { %v284_v60 = vsel %vm219_vm0, %v1003_v59, -inf }
  0xbd   : > { %781 = vmatmul.msk.bf16.gmra.mxu2 %vm219_vm0, %v420_v21 }
  0xbf   : > { %v256_v5 = vpop.f32.mrf.mxu0 }
  0xc0   : > { %v1011_v7 = vmul.f32 0.25, %v256_v5 }
  0xc2   : > { %v287_v11 = vsel %vm219_vm0, %v1011_v7, -inf }
 0x110   : > { %v447_v23 = vpop.f32.mrf.mxu2 }
 0x111   : > { %v467_v24 = vmul.f32 0.25, %v447_v23  ;;  %v259_v23 = vpop.f32.mrf.mxu0 }
 0x113   : > { %v475_v26 = vsel %vm219_vm0, %v467_v24, -inf }
 0x114   : > { %476 = vmax.xlane.f32.xlu2 %v475_v26 }
 0x118   : > { %v449_v28 = vpop.f32.mrf.mxu2 }
 0x119   : > { %v468_v29 = vmul.f32 0.25, %v449_v28 }
 0x11b   : > { %v478_v31 = vsel %vm219_vm0, %v468_v29, -inf }
 0x11c   : > { %479 = vmax.xlane.f32.xlu0 %v478_v31  ;;  %276 = vmax.xlane.f32.xlu2 %v275_v30 }
 0x120   : > { %v452_v32 = vpop.f32.mrf.mxu2 }
 0x121   : > { %v469_v33 = vmul.f32 0.25, %v452_v32 }
 0x123   : > { %v481_v34 = vsel %vm219_vm0, %v469_v33, -inf }
 0x124   : > { %482 = vmax.xlane.f32.xlu1 %v481_v34 }
 0x128   : > { %v454_v36 = vpop.f32.mrf.mxu2 }
 0x129   : > { %v470_v38 = vmul.f32 0.25, %v454_v36 }
 0x12b   : > { %v484_v40 = vsel %vm219_vm0, %v470_v38, -inf }
 0x12c   : > { %273 = vmax.xlane.f32.xlu1 %v272_v39  ;;  %485 = vmax.xlane.f32.xlu2 %v484_v40 }
 0x130   : > { %v457_v41 = vpop.f32.mrf.mxu2 }
 0x131   : > { %v471_v42 = vmul.f32 0.25, %v457_v41 }
 0x133   : > { %v487_v44 = vsel %vm219_vm0, %v471_v42, -inf }
 0x134   : > { %488 = vmax.xlane.f32.xlu2 %v487_v44 }
 0x138   : > { %v459_v46 = vpop.f32.mrf.mxu2 }
 0x139   : > { %v985_v47 = vmul.f32 0.25, %v459_v46 }
 0x13b   : > { %v490_v49 = vsel %vm219_vm0, %v985_v47, -inf }
 0x13c   : > { %491 = vmax.xlane.f32.xlu0 %v490_v49  ;;  %282 = vmax.xlane.f32.xlu2 %v281_v48 }
 0x140   : > { %v462_v50 = vpop.f32.mrf.mxu2 }
 0x141   : > { %v991_v51 = vmul.f32 0.25, %v462_v50 }
 0x143   : > { %v493_v52 = vsel %vm219_vm0, %v991_v51, -inf }
 0x144   : > { %494 = vmax.xlane.f32.xlu0 %v493_v52 }
 0x148   : > { %v464_v53 = vpop.f32.mrf.mxu2 }
 0x149   : > { %v995_v54 = vmul.f32 0.25, %v464_v53 }
 0x14b   : > { %v496_v55 = vsel %vm219_vm0, %v995_v54, -inf }
 0x14c   : > { %497 = vmax.xlane.f32.xlu1 %v496_v55 }
 0x154   : > { %279 = vmax.xlane.f32.xlu1 %v278_v57 }
 0x15c   : > { %285 = vmax.xlane.f32.xlu1 %v284_v60 }
 0x187   : > { %v477_v61 = vpop.xlane.xlu2 %476 }
 0x188   : > { %v499_v62 = vsub.f32 %v467_v24, %v477_v61 }
 0x18a   : > { %v507_v63 = vmul.f32 1.442695, %v499_v62 }
 0x18c   : > { %819 = vpow2.f32 %v507_v63 }
 0x18f   : > { %v480_v0 = vpop.xlane.xlu0 %479  ;;  %v277_v8 = vpop.xlane.xlu2 %276 }
 0x190   : > { %v500_v1 = vsub.f32 %v468_v29, %v480_v0  ;;  %v1028_v29 = vmul.f32 0.25, %v259_v23 }
 0x192   : > { %v1007_v3 = vpop.eup %819  ;;  %v509_v4 = vmul.f32 1.442695, %v500_v1  ;;  %v290_v34 = vsel %vm219_vm0, %v1028_v29, -inf }
 0x193   : > { %v523_v6 = vsel %vm219_vm0, %v1007_v3, 0.0 }
 0x194   : > { %821 = vpow2.f32 %v509_v4  ;;  %524 = vadd.xlane.f32.xlu2 %v523_v6 }
 0x197   : > { %v483_v9 = vpop.xlane.xlu1 %482 }
 0x198   : > { %v501_v10 = vsub.f32 %v469_v33, %v483_v9  ;;  %v297_v33 = vsub.f32 %v971_v27, %v277_v8 }
 0x19a   : > { %v1015_v12 = vpop.eup %821  ;;  %v511_v13 = vmul.f32 1.442695, %v501_v10 }
 0x19b   : > { %v526_v14 = vsel %vm219_vm0, %v1015_v12, 0.0 }
 0x19c   : > { %823 = vpow2.f32 %v511_v13  ;;  %527 = vadd.xlane.f32.xlu0 %v526_v14  ;;  %288 = vmax.xlane.f32.xlu2 %v287_v11 }
 0x19f   : > { %v486_v15 = vpop.xlane.xlu2 %485  ;;  %v274_v21 = vpop.xlane.xlu1 %273 }
 0x1a0   : > { %v502_v16 = vsub.f32 %v470_v38, %v486_v15  ;;  %v296_v26 = vsub.f32 %v977_v35, %v274_v21  ;;  %v261_v35 = vpop.f32.mrf.mxu0  ;;  %v306_v38 = vmul.f32 1.442695, %v297_v33 }
 0x1a1   : > { %v1038_v37 = vmul.f32 0.25, %v261_v35 }
 0x1a2   : > { %v1019_v17 = vpop.eup %823  ;;  %v513_v18 = vmul.f32 1.442695, %v502_v16  ;;  %v304_v30 = vmul.f32 1.442695, %v296_v26 }
 0x1a3   : > { %v529_v19 = vsel %vm219_vm0, %v1019_v17, 0.0  ;;  %v293_v27 = vsel %vm219_vm0, %v1038_v37, -inf }
 0x1a4   : > { %530 = vadd.xlane.f32.xlu1 %v529_v19  ;;  %825 = vpow2.f32 %v513_v18 }
 0x1a7   : > { %v489_v20 = vpop.xlane.xlu2 %488 }
 0x1a8   : > { %v503_v22 = vsub.f32 %v471_v42, %v489_v20 }
 0x1aa   : > { %v515_v24 = vmul.f32 1.442695, %v503_v22  ;;  %v1023_v25 = vpop.eup %825 }
 0x1ab   : > { %v532_v28 = vsel %vm219_vm0, %v1023_v25, 0.0 }
 0x1ac   : > { %827 = vpow2.f32 %v515_v24  ;;  %533 = vadd.xlane.f32.xlu2 %v532_v28 }
 0x1ad   : > { %829 = vpow2.f32 %v304_v30 }
 0x1ae   : > { %831 = vpow2.f32 %v306_v38 }
 0x1af   : > { %v492_v31 = vpop.xlane.xlu0 %491  ;;  %v283_v53 = vpop.xlane.xlu2 %282 }
 0x1b0   : > { %567 = vrot.lane.b32.xlu0 %v956_v2, %s908_s22  ;;  %v504_v57 = vsub.f32 %v985_v47, %v492_v31 }
 0x1b2   : > { %v1031_v32 = vpop.eup %827  ;;  %v517_v63 = vmul.f32 1.442695, %v504_v57 }
 0x1b3   : > { %v535_v36 = vsel %vm219_vm0, %v1031_v32, 0.0  ;;  %v1041_v41 = vpop.eup %829 }
 0x1b4   : > { %536 = vadd.xlane.f32.xlu1 %v535_v36  ;;  %291 = vmax.xlane.f32.xlu2 %v290_v34  ;;  %v320_v43 = vsel %vm219_vm0, %v1041_v41, 0.0  ;;  %v1047_v46 = vpop.eup %831 }
 0x1b5   : > { %v323_v52 = vsel %vm219_vm0, %v1047_v46, 0.0 }
 0x1b7   : > { %v495_v39 = vpop.xlane.xlu0 %494 }
 0x1b8   : > { %v505_v40 = vsub.f32 %v991_v51, %v495_v39 }
 0x1ba   : > { %v519_v42 = vmul.f32 1.442695, %v505_v40 }
 0x1bc   : > { %833 = vpow2.f32 %v519_v42  ;;  %294 = vmax.xlane.f32.xlu1 %v293_v27  ;;  %321 = vadd.xlane.f32.xlu2 %v320_v43 }
 0x1bf   : > { %v498_v44 = vpop.xlane.xlu1 %497 }
 0x1c0   : > { %v506_v48 = vsub.f32 %v995_v54, %v498_v44  ;;  %v299_v54 = vsub.f32 %v983_v45, %v283_v53 }
 0x1c2   : > { %v1050_v49 = vpop.eup %833  ;;  %v521_v50 = vmul.f32 1.442695, %v506_v48  ;;  %v310_v0 = vmul.f32 1.442695, %v299_v54 }
 0x1c3   : > { %v541_v51 = vsel %vm219_vm0, %v1050_v49, 0.0 }
 0x1c4   : > { %835 = vpow2.f32 %v521_v50  ;;  %324 = vadd.xlane.f32.xlu1 %v323_v52  ;;  %542 = vadd.xlane.f32.xlu2 %v541_v51 }
 0x1c7   : > { %v280_v55 = vpop.xlane.xlu1 %279 }
 0x1c8   : > { %v298_v58 = vsub.f32 %v999_v56, %v280_v55 }
 0x1ca   : > { %v1058_v60 = vpop.eup %835  ;;  %v308_v61 = vmul.f32 1.442695, %v298_v58 }
 0x1cb   : > { %v544_v62 = vsel %vm219_vm0, %v1058_v60, 0.0 }
 0x1cc   : > { %837 = vpow2.f32 %v308_v61  ;;  %545 = vadd.xlane.f32.xlu1 %v544_v62 }
 0x1cd   : > { %839 = vpow2.f32 %v517_v63 }
 0x1ce   : > { %841 = vpow2.f32 %v310_v0 }
 0x1cf   : > { %v286_v1 = vpop.xlane.xlu1 %285 }
 0x1d0   : > { %v300_v4 = vsub.f32 %v1003_v59, %v286_v1 }
 0x1d2   : > { %v1064_v5 = vpop.eup %837  ;;  %v312_v56 = vmul.f32 1.442695, %v300_v4 }
 0x1d3   : > { %v326_v47 = vsel %vm219_vm0, %v1064_v5, 0.0  ;;  %v1068_v45 = vpop.eup %839 }
 0x1d4   : > { %327 = vadd.xlane.f32.xlu1 %v326_v47  ;;  %v1070_v6 = vpop.eup %841  ;;  %843 = vpow2.f32 %v312_v56  ;;  %v538_v8 = vsel %vm219_vm0, %v1068_v45, 0.0 }
 0x1d5   : > { %v329_v59 = vsel %vm219_vm0, %v1070_v6, 0.0 }
 0x1da   : > { %539 = vadd.xlane.f32.xlu0 %v538_v8  ;;  %v1077_v9 = vpop.eup %843 }
 0x1db   : > { %v332_v10 = vsel %vm219_vm0, %v1077_v9, 0.0 }
 0x1dc   : > { %330 = vadd.xlane.f32.xlu1 %v329_v59  ;;  %365 = vrot.lane.b32.xlu2 %v956_v2, %s909_s23 }
 0x1e2   : > { %333 = vadd.xlane.f32.xlu0 %v332_v10 }
 0x207   : > { %v525_v11 = vpop.xlane.xlu2 %524 }
 0x20f   : > { %v289_v13 = vpop.xlane.xlu2 %288  ;;  %v528_v16 = vpop.xlane.xlu0 %527 }
 0x210   : > { %v301_v14 = vsub.f32 %v1011_v7, %v289_v13 }
 0x212   : > { %v314_v15 = vmul.f32 1.442695, %v301_v14 }
 0x214   : > { %845 = vpow2.f32 %v314_v15 }
 0x215   : > { %847 = vrcp.f32 %v528_v16 }
 0x216   : > { %849 = vrcp.f32 %v525_v11 }
 0x217   : > { %v531_v21 = vpop.xlane.xlu1 %530 }
 0x21a   : > { %v1082_v18 = vpop.eup %845 }
 0x21b   : > { %v335_v2 = vsel %vm219_vm0, %v1082_v18, 0.0  ;;  %v848_v19 = vpop.eup %847 }
 0x21c   : > { %336 = vadd.xlane.f32.xlu1 %v335_v2  ;;  %v850_v20 = vpop.eup %849  ;;  %v556_v23 = vmul.f32 %v848_v19, %v1015_v12 }
 0x21d   : > { %v555_v7 = vmul.f32 %v850_v20, %v1007_v3 }
 0x21f   : > { %v534_v22 = vpop.xlane.xlu2 %533  ;;  %v563_v26 = vpack.c.bf16 %v556_v23, %v555_v7 }
 0x220   : > { %851 = vrcp.f32 %v534_v22 }
 0x221   : > { %853 = vrcp.f32 %v531_v21 }
 0x222   : > { %v568_v24 = vpop.permute.xlu0 %567 }
 0x223   : > { %589 = vmatpush.bf16.msra.mxu3 %v568_v24 }
 0x226   : > { %782 = vmatmul.msk.bf16.vlgmr.msra.gmra.mxu3 %vm219_vm0, %v563_v26  ;;  %v852_v34 = vpop.eup %851 }
 0x227   : > { %v537_v28 = vpop.xlane.xlu1 %536  ;;  %v292_v30 = vpop.xlane.xlu2 %291  ;;  %v558_v3 = vmul.f32 %v852_v34, %v1023_v25 }
 0x228   : > { %v302_v31 = vsub.f32 %v1028_v29, %v292_v30  ;;  %v854_v35 = vpop.eup %853 }
 0x229   : > { %v557_v40 = vmul.f32 %v854_v35, %v1019_v17 }
 0x22a   : > { %v316_v33 = vmul.f32 1.442695, %v302_v31 }
 0x22b   : > { %v564_v29 = vpack.c.bf16 %v558_v3, %v557_v40 }
 0x22c   : > { %855 = vpow2.f32 %v316_v33 }
 0x22f   : > { %v295_v36 = vpop.xlane.xlu1 %294  ;;  %v322_v38 = vpop.xlane.xlu2 %321 }
 0x230   : > { %v303_v12 = vsub.f32 %v1038_v37, %v295_v36 }
 0x232   : > { %v318_v39 = vmul.f32 1.442695, %v303_v12  ;;  %v1093_v27 = vpop.eup %855 }
 0x233   : > { %v338_v42 = vsel %vm219_vm0, %v1093_v27, 0.0 }
 0x234   : > { %857 = vpow2.f32 %v318_v39  ;;  %339 = vadd.xlane.f32.xlu0 %v338_v42 }
 0x235   : > { %859 = vrcp.f32 %v322_v38 }
 0x236   : > { %783 = vmatmul.msk.bf16.gmra.mxu3 %vm219_vm0, %v564_v29 }
 0x237   : > { %v325_v43 = vpop.xlane.xlu1 %324  ;;  %v543_v44 = vpop.xlane.xlu2 %542 }
 0x238   : > { %861 = vrcp.f32 %v325_v43 }
 0x239   : > { %863 = vrcp.f32 %v537_v28 }
 0x23a   : > { %v858_v37 = vpop.eup %857 }
 0x23b   : > { %v341_v25 = vsel %vm219_vm0, %v858_v37, 0.0  ;;  %v860_v48 = vpop.eup %859 }
 0x23c   : > { %342 = vadd.xlane.f32.xlu2 %v341_v25  ;;  %v352_v51 = vmul.f32 %v860_v48, %v1041_v41 }
 0x23e   : > { %v862_v17 = vpop.eup %861 }
 0x23f   : > { %v546_v50 = vpop.xlane.xlu1 %545  ;;  %v353_v52 = vmul.f32 %v862_v17, %v1047_v46  ;;  %v366_v53 = vpop.permute.xlu2 %365 }
 0x240   : > { %387 = vmatpush.bf16.msra.mxu1 %v366_v53  ;;  %v864_v61 = vpop.eup %863 }
 0x241   : > { %v360_v55 = vpack.c.bf16 %v353_v52, %v352_v51  ;;  %v559_v0 = vmul.f32 %v864_v61, %v1031_v32 }
 0x243   : > { %774 = vmatmul.msk.bf16.vlgmr.msra.gmra.mxu1 %vm219_vm0, %v360_v55 }
 0x247   : > { %v328_v57 = vpop.xlane.xlu1 %327 }
 0x248   : > { %865 = vrcp.f32 %v328_v57 }
 0x24d   : > { %v540_v58 = vpop.xlane.xlu0 %539 }
 0x24e   : > { %867 = vrcp.f32 %v540_v58  ;;  %v866_v62 = vpop.eup %865 }
 0x24f   : > { %v331_v54 = vpop.xlane.xlu1 %330  ;;  %v354_v4 = vmul.f32 %v866_v62, %v1064_v5 }
 0x250   : > { %869 = vrcp.f32 %v331_v54 }
 0x251   : > { %871 = vrcp.f32 %v546_v50 }
 0x252   : > { %873 = vrcp.f32 %v543_v44 }
 0x254   : > { %v868_v63 = vpop.eup %867 }
 0x255   : > { %v560_v41 = vmul.f32 %v868_v63, %v1068_v45  ;;  %v334_v11 = vpop.xlane.xlu0 %333 }
 0x256   : > { %v870_v46 = vpop.eup %869  ;;  %875 = vrcp.f32 %v334_v11 }
 0x257   : > { %v565_v1 = vpack.c.bf16 %v560_v41, %v559_v0  ;;  %v355_v47 = vmul.f32 %v870_v46, %v1070_v6  ;;  %v872_v8 = vpop.eup %871 }
 0x258   : > { %v874_v59 = vpop.eup %873  ;;  %v562_v10 = vmul.f32 %v872_v8, %v1058_v60 }
 0x259   : > { %784 = vmatmul.msk.bf16.gmra.mxu3 %vm219_vm0, %v565_v1  ;;  %v361_v56 = vpack.c.bf16 %v355_v47, %v354_v4  ;;  %v561_v32 = vmul.f32 %v874_v59, %v1050_v49 }
 0x25b   : > { %775 = vmatmul.msk.bf16.gmra.mxu1 %vm219_vm0, %v361_v56  ;;  %v566_v45 = vpack.c.bf16 %v562_v10, %v561_v32 }
 0x25c   : > { %v876_v6 = vpop.eup %875 }
 0x25d   : > { %v356_v14 = vmul.f32 %v876_v6, %v1077_v9 }
 0x269   : > { %785 = vmatmul.msk.bf16.gmra.mxu3 %vm219_vm0, %v566_v45 }
 0x28f   : > { %v337_v5 = vpop.xlane.xlu1 %336 }
 0x290   : > { %877 = vrcp.f32 %v337_v5 }
 0x296   : > { %v878_v13 = vpop.eup %877 }
 0x297   : > { %v357_v15 = vmul.f32 %v878_v13, %v1082_v18 }
 0x299   : > { %v362_v16 = vpack.c.bf16 %v357_v15, %v356_v14 }
 0x29b   : > { %776 = vmatmul.msk.bf16.gmra.mxu1 %vm219_vm0, %v362_v16 }
 0x2a7   : > { %v340_v49 = vpop.xlane.xlu0 %339 }
 0x2a8   : > { %879 = vrcp.f32 %v340_v49 }
 0x2a9   : > { %v591_v2 = vpop.f32.mrf.mxu3 }
 0x2aa   : > { %619 = vrot.lane.b32.xlu1 %v591_v2, %s910_s24 }
 0x2ae   : > { %v880_v20 = vpop.eup %879 }
 0x2af   : > { %v343_v60 = vpop.xlane.xlu2 %342  ;;  %v358_v22 = vmul.f32 %v880_v20, %v1093_v27 }
 0x2b0   : > { %881 = vrcp.f32 %v343_v60 }
 0x2b1   : > { %v593_v19 = vpop.f32.mrf.mxu3 }
 0x2b2   : > { %621 = vrot.lane.b32.xlu0 %v593_v19, %s910_s24 }
 0x2b6   : > { %v882_v21 = vpop.eup %881 }
 0x2b7   : > { %v359_v23 = vmul.f32 %v882_v21, %v858_v37 }
 0x2b9   : > { %v596_v9 = vpop.f32.mrf.mxu3  ;;  %v363_v18 = vpack.c.bf16 %v359_v23, %v358_v22 }
 0x2ba   : > { %623 = vrot.lane.b32.xlu1 %v596_v9, %s910_s24 }
 0x2bb   : > { %777 = vmatmul.msk.bf16.gmra.mxu1 %vm219_vm0, %v363_v18 }
 0x2c0   : > { %v389_v31 = vpop.f32.mrf.mxu1 }
 0x2c1   : > { %v598_v24 = vpop.f32.mrf.mxu3 }
 0x2c2   : > { %625 = vrot.lane.b32.xlu0 %v598_v24, %s910_s24 }
 0x2c8   : > { %v391_v33 = vpop.f32.mrf.mxu1 }
 0x2d8   : > { %v394_v36 = vpop.f32.mrf.mxu1 }
 0x2dc   : > { %v601_v7 = vpop.f32.mrf.mxu3 }
 0x2dd   : > { %627 = vrot.lane.b32.xlu1 %v601_v7, %s910_s24 }
 0x2e0   : > { %v396_v39 = vpop.f32.mrf.mxu1 }
 0x2e4   : > { %v603_v26 = vpop.f32.mrf.mxu3 }
 0x2e5   : > { %629 = vrot.lane.b32.xlu0 %v603_v26, %s910_s24 }
 0x2ec   : > { %v606_v28 = vpop.f32.mrf.mxu3 }
 0x2ed   : > { %631 = vrot.lane.b32.xlu2 %v606_v28, %s910_s24 }
 0x2f4   : > { %v608_v30 = vpop.f32.mrf.mxu3 }
 0x2f5   : > { %633 = vrot.lane.b32.xlu1 %v608_v30, %s910_s24 }
 0x318   : > { %v399_v42 = vpop.f32.mrf.mxu1 }
 0x31c   : > { %v620_v34 = vpop.permute.xlu1 %619 }
 0x31d   : > { %v643_v35 = vsel %vm219_vm0, %v389_v31, %v620_v34 }
 0x31e   : > { %652 = vst.msk [vmem:[%s1121_s27] sm:$0xff] %vm651_vm1, %v643_v35 }
 0x320   : > { %v401_v43 = vpop.f32.mrf.mxu1 }
 0x324   : > { %v622_v38 = vpop.permute.xlu0 %621 }
 0x325   : > { %v644_v12 = vsel %vm219_vm0, %v391_v33, %v622_v38 }
 0x326   : > { %653 = vst.msk [vmem:[%s1121_s27 + $0x8] sm:$0xff] %vm651_vm1, %v644_v12 }
 0x32c   : > { %v624_v3 = vpop.permute.xlu1 %623 }
 0x32d   : > { %v645_v40 = vsel %vm219_vm0, %v394_v36, %v624_v3 }
 0x32e   : > { %654 = vst.msk [vmem:[%s1121_s27 + $0x10] sm:$0xff] %vm651_vm1, %v645_v40 }
 0x334   : > { %v626_v27 = vpop.permute.xlu0 %625 }
 0x335   : > { %v646_v29 = vsel %vm219_vm0, %v396_v39, %v626_v27 }
 0x336   : > { %655 = vst.msk [vmem:[%s1121_s27 + $0x18] sm:$0xff] %vm651_vm1, %v646_v29 }
 0x338   : > { %v404_v44 = vpop.f32.mrf.mxu1 }
 0x340   : > { %v406_v52 = vpop.f32.mrf.mxu1 }
 0x347   : > { %v632_v37 = vpop.permute.xlu2 %631 }
 0x348   : > { %v649_v25 = vsel %vm219_vm0, %v404_v44, %v632_v37 }
 0x349   : > { %658 = vst.msk [vmem:[%s1121_s27 + $0x30] sm:$0xff] %vm651_vm1, %v649_v25 }
 0x34f   : > { %v628_v48 = vpop.permute.xlu1 %627 }
 0x350   : > { %v647_v17 = vsel %vm219_vm0, %v399_v42, %v628_v48 }
 0x351   : > { %656 = vst.msk [vmem:[%s1121_s27 + $0x20] sm:$0xff] %vm651_vm1, %v647_v17 }
 0x357   : > { %v630_v50 = vpop.permute.xlu0 %629 }
 0x358   : > { %v648_v51 = vsel %vm219_vm0, %v401_v43, %v630_v50 }
 0x359   : > { %657 = vst.msk [vmem:[%s1121_s27 + $0x28] sm:$0xff] %vm651_vm1, %v648_v51 }
 0x367   : > { %v634_v53 = vpop.permute.xlu1 %633 }
 0x368   : > { %v650_v55 = vsel %vm219_vm0, %v406_v52, %v634_v53 }
 0x369   : > { %659 = vst.msk [vmem:[%s1121_s27 + $0x38] sm:$0xff] %vm651_vm1, %v650_v55 }
 0x36a PF: > { %s12_s11 = sadd.s32 1, %s905_s11   ;;  %s1159_s9 = smov %s901_s10 }
 0x36b   : > { %p9_p5 = scmp.ge.s32.totalorder %s12_s11, 4   ;;  %s1160_s10 = smov %s1162_s12 }
 0x36d   :  { %11 = sbr.rel (!%p9_p5) target bundleno = 2 (0x2), region = 61 }

// kernel: encoder_stage.24
= control target key start
LH: loop header
LB: loop body
LE: loop exit
PB: predicated region body
PF: predicated region fallthrough
CT: control target
= control target key end

     0   :  { %vm37_vm0 = vcmask 261120   ;;  %v601_v32 = vmov 32.0   ;;  %s1277_s0 = inlined_call_operand.vmem [shape: f32[128,32], index: 0, kind: input, shape index: {}]   ;;  %s1278_s3 = inlined_call_operand.vmem [shape: f32[1,32], index: 3, kind: input, shape index: {}]   ;;  %s1279_s4 = inlined_call_operand.vmem [shape: f32[1,32], index: 4, kind: input, shape index: {}]   ;;  %s1280_s2 = inlined_call_operand.vmem [shape: f32[1,64], index: 2, kind: input, shape index: {}]   ;;  %s1281_s1 = inlined_call_operand.vmem [shape: f32[32,64], index: 1, kind: input, shape index: {}]   ;;  %s1282_s5 = inlined_call_operand.vmem [shape: f32[128,64], index: 5, kind: output, shape index: {}]  }
   0x1   :  { %v33_v0 = vld [vmem:[%s1277_s0 + $0x60] sm:$0xff]  ;;  %v650_v6 = vld [vmem:[%s1277_s0 + $0x68] sm:$0xff]  ;;  %v681_v14 = vld [vmem:[%s1277_s0 + $0x50] sm:$0xff]  ;;  %567 = vrcp.f32 %v601_v32 }
   0x2   :  { %v29_v1 = vld [vmem:[%s1277_s0 + $0x40] sm:$0xff]  ;;  %v74_v3 = vsel %vm37_vm0, %v33_v0, 0.0  ;;  %v655_v7 = vld [vmem:[%s1277_s0 + $0x48] sm:$0xff]  ;;  %v77_v9 = vsel %vm37_vm0, %v650_v6, 0.0  ;;  %v68_v17 = vsel %vm37_vm0, %v681_v14, 0.0  ;;  %v692_v18 = vld [vmem:[%s1277_s0 + $0x58] sm:$0xff] }
   0x3   :  { %v641_v2 = vld [vmem:[%s1277_s0] sm:$0xff]  ;;  %v62_v4 = vsel %vm37_vm0, %v29_v1, 0.0  ;;  %75 = vadd.xlane.f32.xlu1 %v74_v3  ;;  %v660_v8 = vld [vmem:[%s1277_s0 + $0x8] sm:$0xff]  ;;  %v65_v10 = vsel %vm37_vm0, %v655_v7, 0.0  ;;  %v697_v19 = vld [vmem:[%s1277_s0 + $0x70] sm:$0xff]  ;;  %v71_v21 = vsel %vm37_vm0, %v692_v18, 0.0 }
   0x4   :  { %v38_v5 = vsel %vm37_vm0, %v641_v2, 0.0  ;;  %63 = vadd.xlane.f32.xlu0 %v62_v4  ;;  %v41_v11 = vsel %vm37_vm0, %v660_v8, 0.0  ;;  %v671_v12 = vld [vmem:[%s1277_s0 + $0x20] sm:$0xff]  ;;  %v676_v13 = vld [vmem:[%s1277_s0 + $0x28] sm:$0xff]  ;;  %v702_v20 = vld [vmem:[%s1277_s0 + $0x78] sm:$0xff]  ;;  %v80_v22 = vsel %vm37_vm0, %v697_v19, 0.0 }
   0x5   :  { %39 = vadd.xlane.f32.xlu2 %v38_v5  ;;  %v50_v15 = vsel %vm37_vm0, %v671_v12, 0.0  ;;  %v53_v16 = vsel %vm37_vm0, %v676_v13, 0.0  ;;  %v83_v23 = vsel %vm37_vm0, %v702_v20, 0.0  ;;  %v713_v24 = vld [vmem:[%s1277_s0 + $0x10] sm:$0xff]  ;;  %v718_v25 = vld [vmem:[%s1277_s0 + $0x18] sm:$0xff] }
   0x6   :  { %v723_v26 = vld [vmem:[%s1277_s0 + $0x30] sm:$0xff]  ;;  %v44_v27 = vsel %vm37_vm0, %v713_v24, 0.0  ;;  %v47_v28 = vsel %vm37_vm0, %v718_v25, 0.0  ;;  %v734_v30 = vld [vmem:[%s1277_s0 + $0x38] sm:$0xff] }
   0x7   :  { %v56_v29 = vsel %vm37_vm0, %v723_v26, 0.0  ;;  %v59_v31 = vsel %vm37_vm0, %v734_v30, 0.0  ;;  %v568_v33 = vpop.eup %567 }
   0x8   :  { %v87_v34 = vmul.f32 32.0, %v568_v33  ;;  %vm91_vm1 = vweird.f32 %v568_v33 }
   0xa   :  { %v88_v35 = vsub.f32 1.0, %v87_v34 }
   0xb   :  { %78 = vadd.xlane.f32.xlu1 %v77_v9 }
   0xc   :  { %66 = vadd.xlane.f32.xlu0 %v65_v10  ;;  %v89_v36 = vmul.f32 %v568_v33, %v88_v35 }
   0xd   :  { %42 = vadd.xlane.f32.xlu2 %v41_v11 }
   0xe   :  { %v90_v37 = vadd.f32 %v568_v33, %v89_v36 }
  0x10   :  { %v738_v38 = vsel %vm91_vm1, %v568_v33, %v90_v37 }
  0x13   :  { %54 = vadd.xlane.f32.xlu1 %v53_v16 }
  0x14   :  { %51 = vadd.xlane.f32.xlu0 %v50_v15 }
  0x15   :  { %69 = vadd.xlane.f32.xlu2 %v68_v17 }
  0x1b   :  { %81 = vadd.xlane.f32.xlu1 %v80_v22 }
  0x1c   :  { %72 = vadd.xlane.f32.xlu0 %v71_v21 }
  0x1d   :  { %84 = vadd.xlane.f32.xlu2 %v83_v23 }
  0x23   :  { %48 = vadd.xlane.f32.xlu1 %v47_v28 }
  0x24   :  { %45 = vadd.xlane.f32.xlu0 %v44_v27 }
  0x25   :  { %57 = vadd.xlane.f32.xlu2 %v56_v29 }
  0x2c   :  { %60 = vadd.xlane.f32.xlu0 %v59_v31 }
  0x76   :  { %v76_v39 = vpop.xlane.xlu1 %75 }
  0x77   :  { %v64_v40 = vpop.xlane.xlu0 %63  ;;  %v105_v41 = vmul.f32 %v738_v38, %v76_v39 }
  0x78   :  { %v101_v42 = vmul.f32 %v738_v38, %v64_v40  ;;  %v40_v43 = vpop.xlane.xlu2 %39 }
  0x79   :  { %v742_v44 = vsub.f32 %v33_v0, %v105_v41  ;;  %v93_v56 = vmul.f32 %v738_v38, %v40_v43 }
  0x7a   :  { %v744_v45 = vsub.f32 %v29_v1, %v101_v42 }
  0x7b   :  { %v137_v47 = vmul.f32 %v742_v44, %v742_v44  ;;  %v772_v63 = vsub.f32 %v641_v2, %v93_v56 }
  0x7c   :  { %v133_v46 = vmul.f32 %v744_v45, %v744_v45 }
  0x7d   :  { %v177_v49 = vsel %vm37_vm0, %v137_v47, 0.0  ;;  %v125_v10 = vmul.f32 %v772_v63, %v772_v63 }
  0x7e   :  { %v165_v48 = vsel %vm37_vm0, %v133_v46, 0.0  ;;  %v79_v50 = vpop.xlane.xlu1 %78  ;;  %178 = vadd.xlane.f32.xlu0 %v177_v49 }
  0x7f   :  { %v67_v51 = vpop.xlane.xlu0 %66  ;;  %166 = vadd.xlane.f32.xlu1 %v165_v48  ;;  %v106_v52 = vmul.f32 %v738_v38, %v79_v50 }
  0x80   :  { %v102_v53 = vmul.f32 %v738_v38, %v67_v51  ;;  %v43_v54 = vpop.xlane.xlu2 %42 }
  0x81   :  { %v94_v55 = vmul.f32 %v738_v38, %v43_v54  ;;  %v757_v57 = vsub.f32 %v650_v6, %v106_v52 }
  0x82   :  { %v760_v58 = vsub.f32 %v655_v7, %v102_v53 }
  0x83   :  { %v763_v59 = vsub.f32 %v660_v8, %v94_v55  ;;  %v138_v60 = vmul.f32 %v757_v57, %v757_v57 }
  0x84   :  { %v134_v61 = vmul.f32 %v760_v58, %v760_v58 }
  0x85   :  { %v126_v62 = vmul.f32 %v763_v59, %v763_v59  ;;  %v180_v0 = vsel %vm37_vm0, %v138_v60, 0.0 }
  0x86   :  { %v168_v1 = vsel %vm37_vm0, %v134_v61, 0.0  ;;  %v55_v5 = vpop.xlane.xlu1 %54 }
  0x87   :  { %v52_v3 = vpop.xlane.xlu0 %51  ;;  %181 = vadd.xlane.f32.xlu1 %v180_v0  ;;  %169 = vadd.xlane.f32.xlu2 %v168_v1  ;;  %v144_v4 = vsel %vm37_vm0, %v126_v62, 0.0  ;;  %v98_v8 = vmul.f32 %v738_v38, %v55_v5 }
  0x88   :  { %v97_v6 = vmul.f32 %v738_v38, %v52_v3  ;;  %145 = vadd.xlane.f32.xlu0 %v144_v4  ;;  %v70_v7 = vpop.xlane.xlu2 %69 }
  0x89   :  { %v103_v9 = vmul.f32 %v738_v38, %v70_v7  ;;  %v789_v15 = vsub.f32 %v676_v13, %v98_v8 }
  0x8a   :  { %v781_v2 = vsub.f32 %v671_v12, %v97_v6  ;;  %v141_v12 = vsel %vm37_vm0, %v125_v10, 0.0  ;;  %v448_v6 = vld [vmem:[%s1281_s1 + $0x18] sm:$0xff] }
  0x8b   :  { %v786_v11 = vsub.f32 %v681_v14, %v103_v9  ;;  %v130_v29 = vmul.f32 %v789_v15, %v789_v15 }
  0x8c   :  { %v129_v16 = vmul.f32 %v781_v2, %v781_v2 }
  0x8d   :  { %v135_v17 = vmul.f32 %v786_v11, %v786_v11  ;;  %v156_v36 = vsel %vm37_vm0, %v130_v29, 0.0 }
  0x8e   :  { %v153_v21 = vsel %vm37_vm0, %v129_v16, 0.0  ;;  %v82_v14 = vpop.xlane.xlu1 %81 }
  0x8f   :  { %v73_v22 = vpop.xlane.xlu0 %72  ;;  %154 = vadd.xlane.f32.xlu1 %v153_v21  ;;  %142 = vadd.xlane.f32.xlu2 %v141_v12  ;;  %v171_v23 = vsel %vm37_vm0, %v135_v17, 0.0  ;;  %v107_v28 = vmul.f32 %v738_v38, %v82_v14  ;;  %v445_v21 = vld [vmem:[%s1281_s1] sm:$0xff]  ;;  %v446_v12 = vld [vmem:[%s1281_s1 + $0x8] sm:$0xff] }
  0x90   :  { %v104_v27 = vmul.f32 %v738_v38, %v73_v22  ;;  %172 = vadd.xlane.f32.xlu0 %v171_v23  ;;  %v85_v13 = vpop.xlane.xlu2 %84  ;;  %v449_v23 = vpack.c.bf16 %v446_v12, %v445_v21 }
  0x91   :  { %v108_v31 = vmul.f32 %v738_v38, %v85_v13  ;;  %v810_v34 = vsub.f32 %v697_v19, %v107_v28 }
  0x92   :  { %v804_v32 = vsub.f32 %v692_v18, %v104_v27 }
  0x93   :  { %v807_v33 = vsub.f32 %v702_v20, %v108_v31  ;;  %v139_v43 = vmul.f32 %v810_v34, %v810_v34 }
  0x94   :  { %v136_v35 = vmul.f32 %v804_v32, %v804_v32 }
  0x95   :  { %v140_v37 = vmul.f32 %v807_v33, %v807_v33  ;;  %v183_v51 = vsel %vm37_vm0, %v139_v43, 0.0 }
  0x96   :  { %v174_v39 = vsel %vm37_vm0, %v136_v35, 0.0  ;;  %v49_v20 = vpop.xlane.xlu1 %48 }
  0x97   :  { %175 = vadd.xlane.f32.xlu1 %v174_v39  ;;  %v46_v40 = vpop.xlane.xlu0 %45  ;;  %157 = vadd.xlane.f32.xlu2 %v156_v36  ;;  %v186_v18 = vsel %vm37_vm0, %v140_v37, 0.0  ;;  %v96_v42 = vmul.f32 %v738_v38, %v49_v20 }
  0x98   :  { %v95_v41 = vmul.f32 %v738_v38, %v46_v40  ;;  %187 = vadd.xlane.f32.xlu0 %v186_v18  ;;  %v58_v19 = vpop.xlane.xlu2 %57 }
  0x99   :  { %v99_v46 = vmul.f32 %v738_v38, %v58_v19  ;;  %v831_v49 = vsub.f32 %v718_v25, %v96_v42 }
  0x9a   :  { %v825_v47 = vsub.f32 %v713_v24, %v95_v41 }
  0x9b   :  { %v828_v48 = vsub.f32 %v723_v26, %v99_v46  ;;  %v128_v25 = vmul.f32 %v831_v49, %v831_v49 }
  0x9c   :  { %v127_v50 = vmul.f32 %v825_v47, %v825_v47 }
  0x9d   :  { %v131_v52 = vmul.f32 %v828_v48, %v828_v48  ;;  %v150_v60 = vsel %vm37_vm0, %v128_v25, 0.0 }
  0x9e   :  { %v147_v53 = vsel %vm37_vm0, %v127_v50, 0.0 }
  0x9f   :  { %148 = vadd.xlane.f32.xlu1 %v147_v53  ;;  %v61_v54 = vpop.xlane.xlu0 %60  ;;  %184 = vadd.xlane.f32.xlu2 %v183_v51  ;;  %v159_v24 = vsel %vm37_vm0, %v131_v52, 0.0 }
  0xa0   :  { %v100_v26 = vmul.f32 %v738_v38, %v61_v54  ;;  %160 = vadd.xlane.f32.xlu0 %v159_v24 }
  0xa2   :  { %v844_v55 = vsub.f32 %v734_v30, %v100_v26  ;;  %v447_v30 = vld [vmem:[%s1281_s1 + $0x10] sm:$0xff] }
  0xa3   :  { %v450_v7 = vpack.c.bf16 %v448_v6, %v447_v30 }
  0xa4   :  { %v132_v56 = vmul.f32 %v844_v55, %v844_v55 }
  0xa5   :  { %558 = vmatpush.bf16.msra.mxu2 %v450_v7  ;;  %559 = vmatpush.bf16.msra.mxu3 %v450_v7 }
  0xa6   :  { %v162_v61 = vsel %vm37_vm0, %v132_v56, 0.0  ;;  %485 = vmatpush.bf16.msra.mxu0 %v450_v7  ;;  %557 = vmatpush.bf16.msra.mxu1 %v450_v7 }
  0xa7   :  { %163 = vadd.xlane.f32.xlu1 %v162_v61  ;;  %151 = vadd.xlane.f32.xlu2 %v150_v60 }
  0xa9   :  { %561 = vmatpush.bf16.msra.mxu2 %v449_v23  ;;  %562 = vmatpush.bf16.msra.mxu3 %v449_v23 }
  0xaa   :  { %486 = vmatpush.bf16.msra.mxu0 %v449_v23  ;;  %560 = vmatpush.bf16.msra.mxu1 %v449_v23 }
  0xf1   :  { %v179_v0 = vpop.xlane.xlu0 %178 }
  0xf2   :  { %v167_v62 = vpop.xlane.xlu1 %166  ;;  %v201_v3 = vmul.f32 %v179_v0, %v738_v38 }
  0xf3   :  { %v197_v1 = vmul.f32 %v167_v62, %v738_v38 }
  0xf4   :  { %v852_v5 = vadd.f32 1e-05, %v201_v3 }
  0xf5   :  { %v213_v4 = vadd.f32 1e-05, %v197_v1 }
  0xf6   :  { %vm347_vm6 = vweird.f32 %v852_v5 }
  0xf7   :  { %569 = vrsqrt.f32 %v213_v4  ;;  %vm307_vm4 = vweird.f32 %v213_v4 }
  0xf8   :  { %571 = vrsqrt.f32 %v852_v5 }
  0xfa   :  { %v182_v8 = vpop.xlane.xlu1 %181  ;;  %v170_v9 = vpop.xlane.xlu2 %169 }
  0xfb   :  { %v202_v10 = vmul.f32 %v182_v8, %v738_v38  ;;  %v146_v16 = vpop.xlane.xlu0 %145  ;;  %v198_v17 = vmul.f32 %v170_v9, %v738_v38 }
  0xfc   :  { %v190_v22 = vmul.f32 %v146_v16, %v738_v38 }
  0xfd   :  { %v870_v14 = vpop.eup %569  ;;  %v872_v27 = vadd.f32 1e-05, %v202_v10  ;;  %v874_v13 = vadd.f32 1e-05, %v198_v17 }
  0xfe   :  { %v876_v28 = vpop.eup %571  ;;  %v302_v29 = vmul.f32 %v870_v14, %v213_v4  ;;  %v879_v31 = vadd.f32 1e-05, %v190_v22  ;;  %vm308_vm2 = vweird.f32 %v870_v14 }
  0xff   :  { %v342_v35 = vmul.f32 %v876_v28, %v852_v5  ;;  %573 = vrsqrt.f32 %v872_v27  ;;  %vm348_vm3 = vweird.f32 %v876_v28  ;;  %vm914_vm5 = vmor %vm307_vm4, %vm308_vm2  ;;  %vm357_vm8 = vweird.f32 %v872_v27 }
 0x100   :  { %v303_v36 = vmul.f32 %v870_v14, %v302_v29  ;;  %575 = vrsqrt.f32 %v879_v31  ;;  %vm922_vm7 = vmor %vm347_vm6, %vm348_vm3  ;;  %vm237_vm9 = vweird.f32 %v879_v31  ;;  %vm317_vm11 = vweird.f32 %v874_v13 }
 0x101   :  { %v343_v37 = vmul.f32 %v876_v28, %v342_v35  ;;  %577 = vrsqrt.f32 %v874_v13 }
 0x102   :  { %v304_v39 = vmul.f32 0.5, %v303_v36  ;;  %v155_v40 = vpop.xlane.xlu1 %154  ;;  %v143_v18 = vpop.xlane.xlu2 %142 }
 0x103   :  { %v344_v20 = vmul.f32 0.5, %v343_v37  ;;  %v193_v41 = vmul.f32 %v155_v40, %v738_v38  ;;  %v173_v19 = vpop.xlane.xlu0 %172  ;;  %v189_v42 = vmul.f32 %v143_v18, %v738_v38 }
 0x104   :  { %v305_v43 = vsub.f32 1.5, %v304_v39  ;;  %v199_v46 = vmul.f32 %v173_v19, %v738_v38  ;;  %v951_v39 = vld [vmem:[%s1278_s3] ss:$0 sm:$0xff] }
 0x105   :  { %v891_v50 = vpop.eup %573  ;;  %v345_v51 = vsub.f32 1.5, %v344_v20  ;;  %v894_v52 = vadd.f32 1e-05, %v193_v41  ;;  %v903_v26 = vadd.f32 1e-05, %v189_v42 }
 0x106   :  { %v896_v53 = vpop.eup %575  ;;  %v352_v54 = vmul.f32 %v891_v50, %v872_v27  ;;  %v901_v24 = vadd.f32 1e-05, %v199_v46  ;;  %v306_v56 = vmul.f32 %v870_v14, %v305_v43  ;;  %vm358_vm12 = vweird.f32 %v891_v50 }
 0x107   :  { %v578_v25 = vpop.eup %577  ;;  %v346_v60 = vmul.f32 %v876_v28, %v345_v51  ;;  %v232_v61 = vmul.f32 %v896_v53, %v879_v31  ;;  %579 = vrsqrt.f32 %v894_v52  ;;  %vm238_vm14 = vweird.f32 %v896_v53  ;;  %vm985_vm2 = vmor %vm357_vm8, %vm358_vm12 }
 0x108   :  { %v353_v62 = vmul.f32 %v891_v50, %v352_v54  ;;  %v312_v0 = vmul.f32 %v578_v25, %v874_v13  ;;  %581 = vrsqrt.f32 %v901_v24  ;;  %v310_v9 = vsel %vm914_vm5, %v870_v14, %v306_v56  ;;  %vm1007_vm5 = vmor %vm237_vm9, %vm238_vm14 }
 0x109   :  { %v233_v3 = vmul.f32 %v896_v53, %v232_v61  ;;  %v350_v5 = vsel %vm922_vm7, %v876_v28, %v346_v60  ;;  %583 = vrsqrt.f32 %v903_v26  ;;  %vm318_vm10 = vweird.f32 %v578_v25 }
 0x10a   :  { %v354_v4 = vmul.f32 0.5, %v353_v62  ;;  %v313_v6 = vmul.f32 %v578_v25, %v312_v0  ;;  %v176_v7 = vpop.xlane.xlu1 %175  ;;  %v158_v8 = vpop.xlane.xlu2 %157  ;;  %v389_v35 = vmul.f32 %v310_v9, %v744_v45  ;;  %v393_v36 = vmul.f32 %v350_v5, %v742_v44  ;;  %vm319_vm13 = vmor %vm317_vm11, %vm318_vm10 }
 0x10b   :  { %v188_v10 = vpop.xlane.xlu0 %187  ;;  %v234_v16 = vmul.f32 0.5, %v233_v3  ;;  %v200_v21 = vmul.f32 %v176_v7, %v738_v38  ;;  %v194_v14 = vmul.f32 %v158_v8, %v738_v38  ;;  %vm267_vm15 = vweird.f32 %v894_v52 }
 0x10c   :  { %v314_v17 = vmul.f32 0.5, %v313_v6  ;;  %v204_v12 = vmul.f32 %v188_v10, %v738_v38  ;;  %v355_v23 = vsub.f32 1.5, %v354_v4  ;;  %vm327_vm1 = vweird.f32 %v901_v24 }
 0x10d   :  { %v936_v22 = vpop.eup %579  ;;  %v946_v37 = vadd.f32 1e-05, %v200_v21  ;;  %v235_v18 = vsub.f32 1.5, %v234_v16  ;;  %v965_v42 = vadd.f32 1e-05, %v194_v14  ;;  %v409_v62 = vmul.f32 %v951_v39, %v389_v35 }
 0x10e   :  { %v315_v29 = vsub.f32 1.5, %v314_v17  ;;  %v262_v28 = vmul.f32 %v936_v22, %v894_v52  ;;  %v953_v40 = vpop.eup %581  ;;  %v956_v19 = vadd.f32 1e-05, %v204_v12  ;;  %v356_v44 = vmul.f32 %v891_v50, %v355_v23 }
 0x10f   :  { %v958_v45 = vpop.eup %583  ;;  %v322_v13 = vmul.f32 %v953_v40, %v901_v24  ;;  %585 = vrsqrt.f32 %v946_v37  ;;  %v990_v0 = vmul.f32 %v896_v53, %v235_v18  ;;  %vm227_vm3 = vweird.f32 %v903_v26 }
 0x110   :  { %v316_v20 = vmul.f32 %v578_v25, %v315_v29  ;;  %v263_v41 = vmul.f32 %v936_v22, %v262_v28  ;;  %v222_v51 = vmul.f32 %v958_v45, %v903_v26  ;;  %587 = vrsqrt.f32 %v956_v19 }
 0x111   :  { %v323_v56 = vmul.f32 %v953_v40, %v322_v13  ;;  %v413_v30 = vmul.f32 %v951_v39, %v393_v36  ;;  %v360_v27 = vsel %vm985_vm2, %v891_v50, %v356_v44  ;;  %589 = vrsqrt.f32 %v965_v42 }
 0x112   :  { %v320_v43 = vsel %vm319_vm13, %v578_v25, %v316_v20  ;;  %v264_v46 = vmul.f32 0.5, %v263_v41  ;;  %v149_v60 = vpop.xlane.xlu1 %148  ;;  %v979_v25 = vld [vmem:[%s1279_s4] ss:$0 sm:$0xff]  ;;  %v223_v1 = vmul.f32 %v958_v45, %v222_v51  ;;  %v185_v3 = vpop.xlane.xlu2 %184  ;;  %vm268_vm4 = vweird.f32 %v936_v22 }
 0x113   :  { %v390_v54 = vmul.f32 %v320_v43, %v760_v58  ;;  %v161_v61 = vpop.xlane.xlu0 %160  ;;  %v324_v6 = vmul.f32 0.5, %v323_v56  ;;  %v191_v8 = vmul.f32 %v149_v60, %v738_v38  ;;  %v203_v10 = vmul.f32 %v185_v3, %v738_v38  ;;  %vm1049_vm9 = vmor %vm267_vm15, %vm268_vm4 }
 0x114   :  { %v265_v4 = vsub.f32 1.5, %v264_v46  ;;  %v224_v7 = vmul.f32 0.5, %v223_v1  ;;  %v195_v9 = vmul.f32 %v161_v61, %v738_v38  ;;  %v429_v17 = vadd.f32 %v979_v25, %v409_v62 }
 0x115   :  { %v325_v50 = vsub.f32 1.5, %v324_v6  ;;  %v410_v16 = vmul.f32 %v951_v39, %v390_v54  ;;  %v394_v21 = vmul.f32 %v360_v27, %v757_v57  ;;  %v240_v12 = vsel %vm1007_vm5, %v896_v53, %v990_v0  ;;  %v1021_v14 = vpop.eup %585 }
 0x116   :  { %v225_v23 = vsub.f32 1.5, %v224_v7  ;;  %v1019_v31 = vadd.f32 1e-05, %v191_v8  ;;  %v1024_v29 = vmul.f32 %v936_v22, %v265_v4  ;;  %vm328_vm6 = vweird.f32 %v953_v40  ;;  %v1030_v57 = vpop.eup %587 }
 0x117   :  { %vm228_vm7 = vweird.f32 %v958_v45  ;;  %v1028_v28 = vadd.f32 1e-05, %v195_v9  ;;  %v332_v36 = vmul.f32 %v1021_v14, %v946_v37  ;;  %v1036_v18 = vadd.f32 1e-05, %v203_v10  ;;  %v1038_v20 = vpop.eup %589  ;;  %vm1078_vm14 = vmor %vm327_vm1, %vm328_vm6 }
 0x118   :  { %v226_v35 = vmul.f32 %v958_v45, %v225_v23  ;;  %591 = vrsqrt.f32 %v1019_v31  ;;  %v326_v41 = vmul.f32 %v953_v40, %v325_v50  ;;  %vm337_vm8 = vweird.f32 %v946_v37  ;;  %vm1067_vm12 = vmor %vm227_vm3, %vm228_vm7 }
 0x119   :  { %v372_v44 = vmul.f32 %v1030_v57, %v956_v19  ;;  %v430_v13 = vadd.f32 %v979_v25, %v410_v16  ;;  %v333_v46 = vmul.f32 %v1021_v14, %v332_v36  ;;  %vm377_vm10 = vweird.f32 %v956_v19 }
 0x11a   :  { %v272_v51 = vmul.f32 %v1038_v20, %v965_v42  ;;  %vm277_vm11 = vweird.f32 %v965_v42  ;;  %v414_v54 = vmul.f32 %v951_v39, %v394_v21  ;;  %v270_v52 = vsel %vm1049_vm9, %v936_v22, %v1024_v29  ;;  %v164_v61 = vpop.xlane.xlu1 %163  ;;  %v152_v1 = vpop.xlane.xlu2 %151 }
 0x11b   :  { %vm338_vm13 = vweird.f32 %v1021_v14  ;;  %v373_v60 = vmul.f32 %v1030_v57, %v372_v44  ;;  %593 = vrsqrt.f32 %v1028_v28  ;;  %v230_v26 = vsel %vm1067_vm12, %v958_v45, %v226_v35 }
 0x11c   :  { %v334_v62 = vmul.f32 0.5, %v333_v46  ;;  %v273_v58 = vmul.f32 %v1038_v20, %v272_v51  ;;  %595 = vrsqrt.f32 %v1036_v18  ;;  %v330_v3 = vsel %vm1078_vm14, %v953_v40, %v326_v41  ;;  %vm1108_vm1 = vmor %vm337_vm8, %vm338_vm13 }
 0x11d   :  { %v374_v27 = vmul.f32 0.5, %v373_v60  ;;  %v441_v24 = vpack.c.bf16 %v430_v13, %v429_v17  ;;  %v433_v4 = vadd.f32 %v979_v25, %v413_v30  ;;  %v434_v45 = vadd.f32 %v979_v25, %v414_v54 }
 0x11e   :  { %v1091_v6 = vpop.eup %591  ;;  %v335_v7 = vsub.f32 1.5, %v334_v62  ;;  %v274_v8 = vmul.f32 0.5, %v273_v58  ;;  %v196_v9 = vmul.f32 %v164_v61, %v738_v38  ;;  %v381_v50 = vmul.f32 %v230_v26, %v772_v63 }
 0x11f   :  { %v375_v10 = vsub.f32 1.5, %v374_v27  ;;  %v242_v16 = vmul.f32 %v1091_v6, %v1019_v31  ;;  %553 = vmatmul.msk.bf16.vlgmr.msra.gmra.mxu2 %vm37_vm0, %v441_v24  ;;  %v192_v40 = vmul.f32 %v152_v1, %v738_v38  ;;  %vm278_vm15 = vweird.f32 %v1038_v20 }
 0x120   :  { %v336_v30 = vmul.f32 %v1021_v14, %v335_v7  ;;  %v275_v17 = vsub.f32 1.5, %v274_v8  ;;  %v443_v21 = vpack.c.bf16 %v434_v45, %v433_v4  ;;  %vm378_vm2 = vweird.f32 %v1030_v57  ;;  %vm279_vm3 = vmor %vm277_vm11, %vm278_vm15 }
 0x121   :  { %v1102_v23 = vpop.eup %593  ;;  %v376_v29 = vmul.f32 %v1030_v57, %v375_v10  ;;  %v243_v38 = vmul.f32 %v1091_v6, %v242_v16  ;;  %v1115_v35 = vadd.f32 1e-05, %v196_v9  ;;  %v1124_v13 = vadd.f32 1e-05, %v192_v40  ;;  %vm1147_vm4 = vmor %vm377_vm10, %vm378_vm2 }
 0x122   :  { %v596_v36 = vpop.eup %595  ;;  %v340_v41 = vsel %vm1108_vm1, %v1021_v14, %v336_v30  ;;  %v276_v44 = vmul.f32 %v1038_v20, %v275_v17  ;;  %v282_v37 = vmul.f32 %v1102_v23, %v1028_v28  ;;  %555 = vmatmul.msk.bf16.vlgmr.msra.gmra.mxu3 %vm37_vm0, %v443_v21  ;;  %v382_v43 = vmul.f32 %v240_v12, %v763_v59 }
 0x123   :  { %v385_v46 = vmul.f32 %v270_v52, %v781_v2  ;;  %v362_v14 = vmul.f32 %v596_v36, %v1036_v18  ;;  %v401_v51 = vmul.f32 %v951_v39, %v381_v50  ;;  %v391_v54 = vmul.f32 %v330_v3, %v786_v11 }
 0x124   :  { %v392_v56 = vmul.f32 %v340_v41, %v804_v32  ;;  %v280_v5 = vsel %vm279_vm3, %v1038_v20, %v276_v44  ;;  %v283_v53 = vmul.f32 %v1102_v23, %v282_v37  ;;  %v244_v42 = vmul.f32 0.5, %v243_v38 }
 0x125   :  { %v386_v2 = vmul.f32 %v280_v5, %v789_v15  ;;  %v363_v0 = vmul.f32 %v596_v36, %v362_v14  ;;  %597 = vrsqrt.f32 %v1115_v35  ;;  %v380_v11 = vsel %vm1147_vm4, %v1030_v57, %v376_v29 }
 0x126   :  { %v284_v32 = vmul.f32 0.5, %v283_v53  ;;  %vm287_vm5 = vweird.f32 %v1028_v28  ;;  %599 = vrsqrt.f32 %v1124_v13  ;;  %vm368_vm6 = vweird.f32 %v596_v36 }
 0x127   :  { %v364_v19 = vmul.f32 0.5, %v363_v0  ;;  %v402_v12 = vmul.f32 %v951_v39, %v382_v43  ;;  %v421_v20 = vadd.f32 %v979_v25, %v401_v51  ;;  %v405_v52 = vmul.f32 %v951_v39, %v385_v46 }
 0x128   :  { %v285_v15 = vsub.f32 1.5, %v284_v32  ;;  %v406_v60 = vmul.f32 %v951_v39, %v386_v2  ;;  %v411_v61 = vmul.f32 %v951_v39, %v391_v54  ;;  %v245_v22 = vsub.f32 1.5, %v244_v42 }
 0x129   :  { %v365_v57 = vsub.f32 1.5, %v364_v19  ;;  %v422_v26 = vadd.f32 %v979_v25, %v402_v12  ;;  %v412_v62 = vmul.f32 %v951_v39, %v392_v56  ;;  %v396_v58 = vmul.f32 %v380_v11, %v807_v33 }
 0x12a   :  { %vm367_vm7 = vweird.f32 %v1036_v18  ;;  %v425_v1 = vadd.f32 %v979_v25, %v405_v52  ;;  %v426_v3 = vadd.f32 %v979_v25, %v406_v60  ;;  %vm288_vm8 = vweird.f32 %v1102_v23 }
 0x12b   :  { %v598_v27 = vpop.eup %597  ;;  %v366_v24 = vmul.f32 %v596_v36, %v365_v57  ;;  %v437_v4 = vpack.c.bf16 %v422_v26, %v421_v20  ;;  %v432_v7 = vadd.f32 %v979_v25, %v412_v62  ;;  %v286_v45 = vmul.f32 %v1102_v23, %v285_v15  ;;  %vm369_vm9 = vmor %vm367_vm7, %vm368_vm6 }
 0x12c   :  { %v600_v8 = vpop.eup %599  ;;  %v292_v33 = vmul.f32 %v598_v27, %v1115_v35  ;;  %v439_v9 = vpack.c.bf16 %v426_v3, %v425_v1  ;;  %v431_v18 = vadd.f32 %v979_v25, %v411_v61  ;;  %v246_v50 = vmul.f32 %v1091_v6, %v245_v22  ;;  %vm289_vm12 = vmor %vm287_vm5, %vm288_vm8 }
 0x12d   :  { %vm248_vm10 = vweird.f32 %v1091_v6  ;;  %v370_v10 = vsel %vm369_vm9, %v596_v36, %v366_v24  ;;  %v252_v16 = vmul.f32 %v600_v8, %v1124_v13  ;;  %549 = vmatmul.msk.bf16.vlgmr.msra.gmra.mxu0 %vm37_vm0, %v437_v4  ;;  %v416_v21 = vmul.f32 %v951_v39, %v396_v58 }
 0x12e   :  { %v395_v40 = vmul.f32 %v370_v10, %v810_v34  ;;  %v293_v30 = vmul.f32 %v598_v27, %v292_v33  ;;  %551 = vmatmul.msk.bf16.vlgmr.msra.gmra.mxu1 %vm37_vm0, %v439_v9  ;;  %v442_v17 = vpack.c.bf16 %v432_v7, %v431_v18  ;;  %vm247_vm11 = vweird.f32 %v1019_v31 }
 0x12f   :  { %v253_v63 = vmul.f32 %v600_v8, %v252_v16  ;;  %vm249_vm13 = vmor %vm247_vm11, %vm248_vm10  ;;  %v290_v29 = vsel %vm289_vm12, %v1102_v23, %v286_v45  ;;  %vm298_vm14 = vweird.f32 %v598_v27  ;;  %v436_v37 = vadd.f32 %v979_v25, %v416_v21 }
 0x130   :  { %v294_v38 = vmul.f32 0.5, %v293_v30  ;;  %554 = vmatmul.msk.bf16.gmra.mxu2 %vm37_vm0, %v442_v17  ;;  %v415_v34 = vmul.f32 %v951_v39, %v395_v40  ;;  %v250_v36 = vsel %vm249_vm13, %v1091_v6, %v246_v50  ;;  %v387_v28 = vmul.f32 %v290_v29, %v828_v48 }
 0x131   :  { %v254_v41 = vmul.f32 0.5, %v253_v63  ;;  %vm258_vm15 = vweird.f32 %v600_v8  ;;  %v383_v23 = vmul.f32 %v250_v36, %v825_v47  ;;  %vm297_vm1 = vweird.f32 %v1115_v35 }
 0x132   :  { %v295_v44 = vsub.f32 1.5, %v294_v38  ;;  %v435_v31 = vadd.f32 %v979_v25, %v415_v34  ;;  %vm299_vm2 = vmor %vm297_vm1, %vm298_vm14  ;;  %vm257_vm3 = vweird.f32 %v1124_v13  ;;  %v407_v48 = vmul.f32 %v951_v39, %v387_v28 }
 0x133   :  { %v255_v43 = vsub.f32 1.5, %v254_v41  ;;  %vm259_vm4 = vmor %vm257_vm3, %vm258_vm15  ;;  %v403_v47 = vmul.f32 %v951_v39, %v383_v23  ;;  %vm528_vm5 = vcmask 523264  }
 0x134   :  { %v296_v46 = vmul.f32 %v598_v27, %v295_v44  ;;  %v444_v14 = vpack.c.bf16 %v436_v37, %v435_v31  ;;  %v427_v59 = vadd.f32 %v979_v25, %v407_v48 }
 0x135   :  { %v256_v51 = vmul.f32 %v600_v8, %v255_v43  ;;  %v423_v2 = vadd.f32 %v979_v25, %v403_v47 }
 0x136   :  { %v300_v6 = vsel %vm299_vm2, %v598_v27, %v296_v46  ;;  %556 = vmatmul.msk.bf16.gmra.mxu3 %vm37_vm0, %v444_v14 }
 0x137   :  { %v388_v54 = vmul.f32 %v300_v6, %v844_v55  ;;  %v260_v56 = vsel %vm259_vm4, %v600_v8, %v256_v51 }
 0x138   :  { %v384_v5 = vmul.f32 %v260_v56, %v831_v49  ;;  %v566_v49 = vld [vmem:[%s1280_s2] ss:$0 sm:$0xff] }
 0x139   :  { %v408_v35 = vmul.f32 %v951_v39, %v388_v54 }
 0x13a   :  { %v404_v53 = vmul.f32 %v951_v39, %v384_v5 }
 0x13b   :  { %v428_v13 = vadd.f32 %v979_v25, %v408_v35 }
 0x13c   :  { %v424_v42 = vadd.f32 %v979_v25, %v404_v53 }
 0x13d   :  { %v440_v55 = vpack.c.bf16 %v428_v13, %v427_v59 }
 0x13e   :  { %v438_v0 = vpack.c.bf16 %v424_v42, %v423_v2 }
 0x13f   :  { %552 = vmatmul.msk.bf16.gmra.mxu1 %vm37_vm0, %v440_v55 }
 0x140   :  { %550 = vmatmul.msk.bf16.gmra.mxu0 %vm37_vm0, %v438_v0 }
 0x1a2   :  { %v508_v11 = vpop.f32.mrf.mxu2 }
 0x1a3   :  { %v509_v39 = vadd.f32 %v566_v49, %v508_v11 }
 0x1a5   :  { %537 = vst.msk [vmem:[%s1282_s5 + $0x40] sm:$0xff] %vm528_vm5, %v509_v39  ;;  %v518_v32 = vpop.f32.mrf.mxu3 }
 0x1a6   :  { %v519_v25 = vadd.f32 %v566_v49, %v518_v32 }
 0x1a8   :  { %541 = vst.msk [vmem:[%s1282_s5 + $0x60] sm:$0xff] %vm528_vm5, %v519_v25 }
 0x1aa   :  { %v488_v19 = vpop.f32.mrf.mxu0  ;;  %v510_v12 = vpop.f32.mrf.mxu2 }
 0x1ab   :  { %v489_v20 = vadd.f32 %v566_v49, %v488_v19  ;;  %v511_v15 = vadd.f32 %v566_v49, %v510_v12  ;;  %v498_v52 = vpop.f32.mrf.mxu1 }
 0x1ac   :  { %v499_v60 = vadd.f32 %v566_v49, %v498_v52 }
 0x1ad   :  { %529 = vst.msk [vmem:[%s1282_s5] sm:$0xff] %vm528_vm5, %v489_v20  ;;  %v520_v61 = vpop.f32.mrf.mxu3 }
 0x1ae   :  { %538 = vst.msk [vmem:[%s1282_s5 + $0x48] sm:$0xff] %vm528_vm5, %v511_v15  ;;  %v521_v22 = vadd.f32 %v566_v49, %v520_v61 }
 0x1af   :  { %533 = vst.msk [vmem:[%s1282_s5 + $0x20] sm:$0xff] %vm528_vm5, %v499_v60 }
 0x1b0   :  { %542 = vst.msk [vmem:[%s1282_s5 + $0x68] sm:$0xff] %vm528_vm5, %v521_v22 }
 0x1b2   :  { %v490_v57 = vpop.f32.mrf.mxu0 }
 0x1b3   :  { %v491_v26 = vadd.f32 %v566_v49, %v490_v57  ;;  %v513_v62 = vpop.f32.mrf.mxu2  ;;  %v500_v58 = vpop.f32.mrf.mxu1 }
 0x1b4   :  { %v514_v1 = vadd.f32 %v566_v49, %v513_v62  ;;  %v501_v3 = vadd.f32 %v566_v49, %v500_v58 }
 0x1b5   :  { %530 = vst.msk [vmem:[%s1282_s5 + $0x8] sm:$0xff] %vm528_vm5, %v491_v26 }
 0x1b6   :  { %539 = vst.msk [vmem:[%s1282_s5 + $0x50] sm:$0xff] %vm528_vm5, %v514_v1 }
 0x1b7   :  { %534 = vst.msk [vmem:[%s1282_s5 + $0x28] sm:$0xff] %vm528_vm5, %v501_v3 }
 0x1b9   :  { %v523_v27 = vpop.f32.mrf.mxu3 }
 0x1ba   :  { %v524_v24 = vadd.f32 %v566_v49, %v523_v27 }
 0x1bb   :  { %v515_v4 = vpop.f32.mrf.mxu2 }
 0x1bc   :  { %v516_v7 = vadd.f32 %v566_v49, %v515_v4  ;;  %543 = vst.msk [vmem:[%s1282_s5 + $0x70] sm:$0xff] %vm528_vm5, %v524_v24  ;;  %v503_v8 = vpop.f32.mrf.mxu1 }
 0x1bd   :  { %v493_v45 = vpop.f32.mrf.mxu0  ;;  %v504_v33 = vadd.f32 %v566_v49, %v503_v8 }
 0x1be   :  { %540 = vst.msk [vmem:[%s1282_s5 + $0x58] sm:$0xff] %vm528_vm5, %v516_v7  ;;  %v494_v9 = vadd.f32 %v566_v49, %v493_v45 }
 0x1bf   :  { %535 = vst.msk [vmem:[%s1282_s5 + $0x30] sm:$0xff] %vm528_vm5, %v504_v33 }
 0x1c0   :  { %531 = vst.msk [vmem:[%s1282_s5 + $0x10] sm:$0xff] %vm528_vm5, %v494_v9 }
 0x1c1   :  { %v525_v18 = vpop.f32.mrf.mxu3 }
 0x1c2   :  { %v526_v50 = vadd.f32 %v566_v49, %v525_v18 }
 0x1c4   :  { %544 = vst.msk [vmem:[%s1282_s5 + $0x78] sm:$0xff] %vm528_vm5, %v526_v50  ;;  %v505_v10 = vpop.f32.mrf.mxu1 }
 0x1c5   :  { %v495_v16 = vpop.f32.mrf.mxu0  ;;  %v506_v40 = vadd.f32 %v566_v49, %v505_v10 }
 0x1c6   :  { %v496_v30 = vadd.f32 %v566_v49, %v495_v16 }
 0x1c7   :  { %536 = vst.msk [vmem:[%s1282_s5 + $0x38] sm:$0xff] %vm528_vm5, %v506_v40 }
 0x1c8   :  { %532 = vst.msk [vmem:[%s1282_s5 + $0x18] sm:$0xff] %vm528_vm5, %v496_v30 }

// kernel: encoder_stage.25
= control target key start
LH: loop header
LB: loop body
LE: loop exit
PB: predicated region body
PF: predicated region fallthrough
CT: control target
= control target key end

     0   :  { %s810_s12 = smov 0   ;;  %s1190_s0 = inlined_call_operand.vmem [shape: f32[2,10,10,64], index: 0, kind: input, shape index: {}]   ;;  %s1191_s1 = inlined_call_operand.vmem [shape: f32[9,64], index: 1, kind: input, shape index: {}]   ;;  %s1192_s2 = inlined_call_operand.vmem [shape: f32[1,64], index: 2, kind: input, shape index: {}]   ;;  %s1193_s3 = inlined_call_operand.vmem [shape: f32[2,8,8,64], index: 3, kind: output, shape index: {}]  }
   0x1 LB: > { %s760_s13 = sadd.s32 4294967295, %s788_s12   ;;  %p764_p0 = scmp.ge.s32.totalorder %s788_s12, 1  ;;  %s788_s12 = sphi %s810_s12, %s13_s12  }
   0x2   : > { %p137_p1 = scmp.lt.s32.totalorder %s788_s12, 3 }
   0x4   : > { %p138_p2 = pnand %p764_p0, %p137_p1 }
   0x5   : > { %p161_p3 = scmp.lt.s32.totalorder (!%p138_p2), %s760_s13, 1 }
   0x6   : > { %141 = sbr.rel (%p138_p2) target bundleno = 112 (0x70), region = 32 }
   0xb   : > { %v191_v0 = vld [vmem:[%s1191_s1] sm:$0xff]  ;;  %s1195_s13 = smov (!%p161_p3, %s760_s13), 1  ;;  %vm243_vm0 = vcmask 1046528   ;;  %vm317_vm1 = vcmask 1045504   ;;  %v861_v25 = vld [vmem:[%s1191_s1 + $0x8] ss:$0 sm:$0xff] }
   0xc   : > { %s771_s16 = smul.u32 160, %s1195_s13  ;;  %v824_v1 = vperm.slane %v191_v0, 0  ;;  %v826_v2 = vperm.slane %v191_v0, 1  ;;  %v828_v3 = vperm.slane %v191_v0, 2  ;;  %v830_v4 = vperm.slane %v191_v0, 3  ;;  %s770_s22 = sshll.u32 %s1195_s13, 6 }
   0xd   : > { %v832_v5 = vperm.slane %v191_v0, 4  ;;  %v839_v6 = vperm.slane %v191_v0, 5  ;;  %v843_v9 = vperm.slane %v191_v0, 6  ;;  %v845_v10 = vperm.slane %v191_v0, 7  ;;  %s937_s27 = scalar_lea.vmem %s1193_s3, %s770_s22 }
   0xe   : > { %s837_s19 = scalar_lea.vmem %s1190_s0, %s771_s16  ;;  %vm696_vm2 = vcmask 523264  }
   0xf   : > { %v171_v7 = vld [vmem:[%s837_s19] sm:$0xff]  ;;  %v172_v8 = vld [vmem:[%s837_s19 + $0x8] sm:$0x3]  ;;  %v173_v11 = vld [vmem:[%s837_s19 + $0x10] sm:$0xff] }
  0x10   : > { %v174_v12 = vld [vmem:[%s837_s19 + $0x18] sm:$0x3]  ;;  %v194_v13 = vmul.f32 %v824_v1, %v171_v7  ;;  %v211_v14 = vmul.f32 %v826_v2, %v171_v7  ;;  %v212_v15 = vmul.f32 %v826_v2, %v172_v8  ;;  %v285_v16 = vmul.f32 %v828_v3, %v171_v7  ;;  %v864_v26 = vld [vmem:[%s837_s19 + $0x20] sm:$0xff]  ;;  %v873_v35 = vld [vmem:[%s837_s19 + $0x28] sm:$0x3] }
  0x11   : > { %v286_v17 = vmul.f32 %v828_v3, %v172_v8  ;;  %v359_v18 = vmul.f32 %v830_v4, %v173_v11  ;;  %v376_v19 = vmul.f32 %v832_v5, %v173_v11  ;;  %v377_v20 = vmul.f32 %v832_v5, %v174_v12 }
  0x12   : > { %v244_v21 = vrot.slane %v211_v14, 1  ;;  %v245_v22 = vrot.slane %v212_v15, 1  ;;  %v318_v23 = vrot.slane %v285_v16, 2  ;;  %v449_v24 = vmul.f32 %v839_v6, %v173_v11 }
  0x13   : > { %v319_v27 = vrot.slane %v286_v17, 2  ;;  %v408_v28 = vrot.slane %v376_v19, 1  ;;  %v409_v29 = vrot.slane %v377_v20, 1  ;;  %v450_v30 = vmul.f32 %v839_v6, %v174_v12  ;;  %v907_v17 = vld [vmem:[%s837_s19 + $0x38] sm:$0x3] }
  0x14   : > { %v246_v31 = vsel %vm243_vm0, %v244_v21, %v245_v22  ;;  %v481_v32 = vrot.slane %v449_v24, 2  ;;  %v522_v33 = vmul.f32 %v843_v9, %v864_v26  ;;  %v539_v34 = vmul.f32 %v845_v10, %v864_v26 }
  0x15   : > { %v276_v36 = vadd.f32 %v246_v31, %v194_v13  ;;  %v320_v37 = vsel %vm317_vm1, %v318_v23, %v319_v27  ;;  %v410_v38 = vsel %vm243_vm0, %v408_v28, %v409_v29  ;;  %v482_v39 = vrot.slane %v450_v30, 2  ;;  %v903_v13 = vld [vmem:[%s837_s19 + $0x30] sm:$0xff] }
  0x16   : > { %v540_v40 = vmul.f32 %v845_v10, %v873_v35  ;;  %v571_v41 = vrot.slane %v539_v34, 1  ;;  %v612_v42 = vmul.f32 %v861_v25, %v864_v26  ;;  %v613_v43 = vmul.f32 %v861_v25, %v873_v35 }
  0x17   : > { %v350_v44 = vadd.f32 %v320_v37, %v276_v36  ;;  %v483_v45 = vsel %vm317_vm1, %v481_v32, %v482_v39  ;;  %v195_v46 = vmul.f32 %v824_v1, %v173_v11  ;;  %v213_v47 = vmul.f32 %v826_v2, %v173_v11 }
  0x18   : > { %v572_v48 = vrot.slane %v540_v40, 1  ;;  %v644_v49 = vrot.slane %v612_v42, 2  ;;  %v645_v50 = vrot.slane %v613_v43, 2  ;;  %v214_v51 = vmul.f32 %v826_v2, %v174_v12 }
  0x19   : > { %v367_v52 = vadd.f32 %v359_v18, %v350_v44  ;;  %v247_v53 = vrot.slane %v213_v47, 1  ;;  %v287_v54 = vmul.f32 %v828_v3, %v173_v11  ;;  %v288_v55 = vmul.f32 %v828_v3, %v174_v12 }
  0x1a   : > { %v573_v56 = vsel %vm243_vm0, %v571_v41, %v572_v48  ;;  %v646_v57 = vsel %vm317_vm1, %v644_v49, %v645_v50  ;;  %v248_v58 = vrot.slane %v214_v51, 1  ;;  %v360_v59 = vmul.f32 %v830_v4, %v864_v26 }
  0x1b   : > { %v440_v60 = vadd.f32 %v410_v38, %v367_v52  ;;  %v321_v61 = vrot.slane %v287_v54, 2  ;;  %v322_v62 = vrot.slane %v288_v55, 2  ;;  %v378_v63 = vmul.f32 %v832_v5, %v864_v26 }
  0x1c   : > { %v249_v0 = vsel %vm243_vm0, %v247_v53, %v248_v58  ;;  %v379_v7 = vmul.f32 %v832_v5, %v873_v35  ;;  %v451_v8 = vmul.f32 %v839_v6, %v864_v26  ;;  %v452_v11 = vmul.f32 %v839_v6, %v873_v35 }
  0x1d   : > { %v513_v12 = vadd.f32 %v483_v45, %v440_v60  ;;  %v277_v14 = vadd.f32 %v249_v0, %v195_v46  ;;  %v323_v15 = vsel %vm317_vm1, %v321_v61, %v322_v62  ;;  %v411_v16 = vrot.slane %v378_v63, 1  ;;  %v959_v60 = vld [vmem:[%s837_s19 + $0x40] sm:$0xff] }
  0x1e   : > { %v412_v18 = vrot.slane %v379_v7, 1  ;;  %v484_v19 = vrot.slane %v451_v8, 2  ;;  %v485_v20 = vrot.slane %v452_v11, 2  ;;  %v523_v21 = vmul.f32 %v843_v9, %v903_v13  ;;  %v963_v8 = vld [vmem:[%s837_s19 + $0x48] sm:$0x3] }
  0x1f   : > { %v530_v22 = vadd.f32 %v522_v33, %v513_v12  ;;  %v351_v23 = vadd.f32 %v323_v15, %v277_v14  ;;  %v541_v24 = vmul.f32 %v845_v10, %v903_v13  ;;  %v542_v27 = vmul.f32 %v845_v10, %v907_v17  ;;  %v925_v33 = vld [vmem:[%s1192_s2] ss:$0 sm:$0xff] }
  0x20   : > { %v413_v28 = vsel %vm243_vm0, %v411_v16, %v412_v18  ;;  %v486_v29 = vsel %vm317_vm1, %v484_v19, %v485_v20  ;;  %v614_v30 = vmul.f32 %v861_v25, %v903_v13  ;;  %v615_v31 = vmul.f32 %v861_v25, %v907_v17 }
  0x21   : > { %v603_v32 = vadd.f32 %v573_v56, %v530_v22  ;;  %v368_v34 = vadd.f32 %v360_v59, %v351_v23  ;;  %v574_v36 = vrot.slane %v541_v24, 1  ;;  %v575_v37 = vrot.slane %v542_v27, 1 }
  0x22   : > { %v647_v38 = vrot.slane %v614_v30, 2  ;;  %v648_v39 = vrot.slane %v615_v31, 2  ;;  %v196_v40 = vmul.f32 %v824_v1, %v864_v26  ;;  %v215_v41 = vmul.f32 %v826_v2, %v864_v26 }
  0x23   : > { %v676_v42 = vadd.f32 %v646_v57, %v603_v32  ;;  %v441_v43 = vadd.f32 %v413_v28, %v368_v34  ;;  %v576_v44 = vsel %vm243_vm0, %v574_v36, %v575_v37  ;;  %v216_v45 = vmul.f32 %v826_v2, %v873_v35 }
  0x24   : > { %v649_v46 = vsel %vm317_vm1, %v647_v38, %v648_v39  ;;  %v250_v47 = vrot.slane %v215_v41, 1  ;;  %v289_v48 = vmul.f32 %v828_v3, %v864_v26  ;;  %v290_v49 = vmul.f32 %v828_v3, %v873_v35 }
  0x25   : > { %v688_v50 = vadd.f32 %v925_v33, %v676_v42  ;;  %v514_v51 = vadd.f32 %v486_v29, %v441_v43  ;;  %v251_v52 = vrot.slane %v216_v45, 1  ;;  %v361_v53 = vmul.f32 %v830_v4, %v903_v13 }
  0x26   : > { %v324_v54 = vrot.slane %v289_v48, 2  ;;  %v325_v55 = vrot.slane %v290_v49, 2  ;;  %v380_v56 = vmul.f32 %v832_v5, %v903_v13  ;;  %v381_v57 = vmul.f32 %v832_v5, %v907_v17  ;;  %v997_v48 = vld [vmem:[%s837_s19 + $0x50] sm:$0xff] }
  0x27   : > { %697 = vst.msk [vmem:[%s937_s27] sm:$0xff] %vm696_vm2, %v688_v50  ;;  %v531_v26 = vadd.f32 %v523_v21, %v514_v51  ;;  %v252_v35 = vsel %vm243_vm0, %v250_v47, %v251_v52  ;;  %v453_v58 = vmul.f32 %v839_v6, %v903_v13  ;;  %v454_v59 = vmul.f32 %v839_v6, %v907_v17 }
  0x28   : > { %v278_v61 = vadd.f32 %v252_v35, %v196_v40  ;;  %v326_v62 = vsel %vm317_vm1, %v324_v54, %v325_v55  ;;  %v414_v63 = vrot.slane %v380_v56, 1  ;;  %v415_v0 = vrot.slane %v381_v57, 1  ;;  %v1009_v55 = vld [vmem:[%s837_s19 + $0x58] sm:$0x3] }
  0x29   : > { %v604_v7 = vadd.f32 %v576_v44, %v531_v26  ;;  %v487_v11 = vrot.slane %v453_v58, 2  ;;  %v488_v12 = vrot.slane %v454_v59, 2  ;;  %v524_v14 = vmul.f32 %v843_v9, %v959_v60 }
  0x2a   : > { %v352_v15 = vadd.f32 %v326_v62, %v278_v61  ;;  %v416_v16 = vsel %vm243_vm0, %v414_v63, %v415_v0  ;;  %v543_v18 = vmul.f32 %v845_v10, %v959_v60  ;;  %v544_v19 = vmul.f32 %v845_v10, %v963_v8 }
  0x2b   : > { %v677_v20 = vadd.f32 %v649_v46, %v604_v7  ;;  %v489_v21 = vsel %vm317_vm1, %v487_v11, %v488_v12  ;;  %v616_v22 = vmul.f32 %v861_v25, %v959_v60  ;;  %v617_v23 = vmul.f32 %v861_v25, %v963_v8 }
  0x2c   : > { %v369_v24 = vadd.f32 %v361_v53, %v352_v15  ;;  %v577_v27 = vrot.slane %v543_v18, 1  ;;  %v578_v28 = vrot.slane %v544_v19, 1  ;;  %v197_v29 = vmul.f32 %v824_v1, %v903_v13 }
  0x2d   : > { %v689_v30 = vadd.f32 %v925_v33, %v677_v20  ;;  %v650_v31 = vrot.slane %v616_v22, 2  ;;  %v651_v32 = vrot.slane %v617_v23, 2  ;;  %v217_v34 = vmul.f32 %v826_v2, %v903_v13 }
  0x2e   : > { %v442_v36 = vadd.f32 %v416_v16, %v369_v24  ;;  %v579_v37 = vsel %vm243_vm0, %v577_v27, %v578_v28  ;;  %v218_v38 = vmul.f32 %v826_v2, %v907_v17  ;;  %v291_v39 = vmul.f32 %v828_v3, %v903_v13 }
  0x2f   : > { %698 = vst.msk [vmem:[%s937_s27 + $0x8] sm:$0xff] %vm696_vm2, %v689_v30  ;;  %v652_v40 = vsel %vm317_vm1, %v650_v31, %v651_v32  ;;  %v253_v41 = vrot.slane %v217_v34, 1  ;;  %v292_v42 = vmul.f32 %v828_v3, %v907_v17  ;;  %v362_v43 = vmul.f32 %v830_v4, %v959_v60 }
  0x30   : > { %v515_v44 = vadd.f32 %v489_v21, %v442_v36  ;;  %v254_v45 = vrot.slane %v218_v38, 1  ;;  %v327_v46 = vrot.slane %v291_v39, 2  ;;  %v382_v47 = vmul.f32 %v832_v5, %v959_v60 }
  0x31   : > { %v328_v13 = vrot.slane %v292_v42, 2  ;;  %v383_v49 = vmul.f32 %v832_v5, %v963_v8  ;;  %v455_v50 = vmul.f32 %v839_v6, %v959_v60  ;;  %v456_v17 = vmul.f32 %v839_v6, %v963_v8 }
  0x32   : > { %v532_v51 = vadd.f32 %v524_v14, %v515_v44  ;;  %v255_v52 = vsel %vm243_vm0, %v253_v41, %v254_v45  ;;  %v417_v53 = vrot.slane %v382_v47, 1  ;;  %v525_v54 = vmul.f32 %v843_v9, %v997_v48  ;;  %v1049_v45 = vld [vmem:[%s837_s19 + $0x60] sm:$0xff] }
  0x33   : > { %v279_v56 = vadd.f32 %v255_v52, %v197_v29  ;;  %v329_v57 = vsel %vm317_vm1, %v327_v46, %v328_v13  ;;  %v418_v26 = vrot.slane %v383_v49, 1  ;;  %v490_v35 = vrot.slane %v455_v50, 2  ;;  %v1053_v49 = vld [vmem:[%s837_s19 + $0x68] sm:$0x3] }
  0x34   : > { %v605_v58 = vadd.f32 %v579_v37, %v532_v51  ;;  %v491_v59 = vrot.slane %v456_v17, 2  ;;  %v545_v61 = vmul.f32 %v845_v10, %v997_v48  ;;  %v546_v62 = vmul.f32 %v845_v10, %v1009_v55 }
  0x35   : > { %v353_v63 = vadd.f32 %v329_v57, %v279_v56  ;;  %v419_v0 = vsel %vm243_vm0, %v417_v53, %v418_v26  ;;  %v618_v7 = vmul.f32 %v861_v25, %v997_v48  ;;  %v619_v11 = vmul.f32 %v861_v25, %v1009_v55 }
  0x36   : > { %v678_v12 = vadd.f32 %v652_v40, %v605_v58  ;;  %v492_v14 = vsel %vm317_vm1, %v490_v35, %v491_v59  ;;  %v580_v15 = vrot.slane %v545_v61, 1  ;;  %v581_v16 = vrot.slane %v546_v62, 1 }
  0x37   : > { %v370_v18 = vadd.f32 %v362_v43, %v353_v63  ;;  %v653_v19 = vrot.slane %v618_v7, 2  ;;  %v654_v20 = vrot.slane %v619_v11, 2  ;;  %v198_v21 = vmul.f32 %v824_v1, %v959_v60 }
  0x38   : > { %v690_v22 = vadd.f32 %v925_v33, %v678_v12  ;;  %v582_v23 = vsel %vm243_vm0, %v580_v15, %v581_v16  ;;  %v219_v24 = vmul.f32 %v826_v2, %v959_v60  ;;  %v220_v27 = vmul.f32 %v826_v2, %v963_v8 }
  0x39   : > { %v443_v28 = vadd.f32 %v419_v0, %v370_v18  ;;  %v655_v29 = vsel %vm317_vm1, %v653_v19, %v654_v20  ;;  %v293_v30 = vmul.f32 %v828_v3, %v959_v60  ;;  %v294_v31 = vmul.f32 %v828_v3, %v963_v8 }
  0x3a   : > { %699 = vst.msk [vmem:[%s937_s27 + $0x10] sm:$0xff] %vm696_vm2, %v690_v22  ;;  %v256_v32 = vrot.slane %v219_v24, 1  ;;  %v257_v34 = vrot.slane %v220_v27, 1  ;;  %v363_v36 = vmul.f32 %v830_v4, %v997_v48  ;;  %v384_v37 = vmul.f32 %v832_v5, %v997_v48 }
  0x3b   : > { %v516_v38 = vadd.f32 %v492_v14, %v443_v28  ;;  %v330_v39 = vrot.slane %v293_v30, 2  ;;  %v331_v40 = vrot.slane %v294_v31, 2  ;;  %v385_v60 = vmul.f32 %v832_v5, %v1009_v55 }
  0x3c   : > { %v258_v41 = vsel %vm243_vm0, %v256_v32, %v257_v34  ;;  %v420_v8 = vrot.slane %v384_v37, 1  ;;  %v457_v42 = vmul.f32 %v839_v6, %v997_v48  ;;  %v458_v43 = vmul.f32 %v839_v6, %v1009_v55  ;;  %v1092_v34 = vld [vmem:[%s837_s19 + $0x70] sm:$0xff] }
  0x3d   : > { %v533_v44 = vadd.f32 %v525_v54, %v516_v38  ;;  %v280_v46 = vadd.f32 %v258_v41, %v198_v21  ;;  %v332_v47 = vsel %vm317_vm1, %v330_v39, %v331_v40  ;;  %v421_v13 = vrot.slane %v385_v60, 1 }
  0x3e   : > { %v493_v50 = vrot.slane %v457_v42, 2  ;;  %v494_v17 = vrot.slane %v458_v43, 2  ;;  %v526_v51 = vmul.f32 %v843_v9, %v1049_v45  ;;  %v547_v52 = vmul.f32 %v845_v10, %v1049_v45  ;;  %v1100_v42 = vld [vmem:[%s837_s19 + $0x78] sm:$0x3] }
  0x3f   : > { %v606_v53 = vadd.f32 %v582_v23, %v533_v44  ;;  %v354_v56 = vadd.f32 %v332_v47, %v280_v46  ;;  %v422_v54 = vsel %vm243_vm0, %v420_v8, %v421_v13  ;;  %v548_v57 = vmul.f32 %v845_v10, %v1053_v49 }
  0x40   : > { %v495_v26 = vsel %vm317_vm1, %v493_v50, %v494_v17  ;;  %v583_v35 = vrot.slane %v547_v52, 1  ;;  %v620_v58 = vmul.f32 %v861_v25, %v1049_v45  ;;  %v621_v59 = vmul.f32 %v861_v25, %v1053_v49 }
  0x41   : > { %v679_v61 = vadd.f32 %v655_v29, %v606_v53  ;;  %v371_v62 = vadd.f32 %v363_v36, %v354_v56  ;;  %v584_v63 = vrot.slane %v548_v57, 1  ;;  %v199_v0 = vmul.f32 %v824_v1, %v997_v48 }
  0x42   : > { %v656_v7 = vrot.slane %v620_v58, 2  ;;  %v657_v11 = vrot.slane %v621_v59, 2  ;;  %v221_v12 = vmul.f32 %v826_v2, %v997_v48  ;;  %v222_v14 = vmul.f32 %v826_v2, %v1009_v55 }
  0x43   : > { %v691_v15 = vadd.f32 %v925_v33, %v679_v61  ;;  %v444_v16 = vadd.f32 %v422_v54, %v371_v62  ;;  %v585_v18 = vsel %vm243_vm0, %v583_v35, %v584_v63  ;;  %v295_v19 = vmul.f32 %v828_v3, %v997_v48 }
  0x44   : > { %v658_v20 = vsel %vm317_vm1, %v656_v7, %v657_v11  ;;  %v259_v21 = vrot.slane %v221_v12, 1  ;;  %v260_v22 = vrot.slane %v222_v14, 1  ;;  %v296_v23 = vmul.f32 %v828_v3, %v1009_v55 }
  0x45   : > { %700 = vst.msk [vmem:[%s937_s27 + $0x18] sm:$0xff] %vm696_vm2, %v691_v15  ;;  %v517_v24 = vadd.f32 %v495_v26, %v444_v16  ;;  %v333_v27 = vrot.slane %v295_v19, 2  ;;  %v364_v28 = vmul.f32 %v830_v4, %v1049_v45  ;;  %v386_v29 = vmul.f32 %v832_v5, %v1049_v45 }
  0x46   : > { %v261_v48 = vsel %vm243_vm0, %v259_v21, %v260_v22  ;;  %v334_v30 = vrot.slane %v296_v23, 2  ;;  %v387_v31 = vmul.f32 %v832_v5, %v1053_v49  ;;  %v459_v55 = vmul.f32 %v839_v6, %v1049_v45 }
  0x47   : > { %v534_v32 = vadd.f32 %v526_v51, %v517_v24  ;;  %v281_v36 = vadd.f32 %v261_v48, %v199_v0  ;;  %v423_v37 = vrot.slane %v386_v29, 1  ;;  %v460_v38 = vmul.f32 %v839_v6, %v1053_v49 }
  0x48   : > { %v335_v39 = vsel %vm317_vm1, %v333_v27, %v334_v30  ;;  %v424_v40 = vrot.slane %v387_v31, 1  ;;  %v496_v60 = vrot.slane %v459_v55, 2  ;;  %v527_v41 = vmul.f32 %v843_v9, %v1092_v34  ;;  %v187_v30 = vld [vmem:[%s837_s19 + $0x80] sm:$0xff]  ;;  %v188_v31 = vld [vmem:[%s837_s19 + $0x88] sm:$0x3] }
  0x49   : > { %v607_v8 = vadd.f32 %v585_v18, %v534_v32  ;;  %v355_v43 = vadd.f32 %v335_v39, %v281_v36  ;;  %v497_v44 = vrot.slane %v460_v38, 2  ;;  %v549_v46 = vmul.f32 %v845_v10, %v1092_v34 }
  0x4a   : > { %v425_v47 = vsel %vm243_vm0, %v423_v37, %v424_v40  ;;  %v550_v13 = vmul.f32 %v845_v10, %v1100_v42  ;;  %v622_v50 = vmul.f32 %v861_v25, %v1092_v34  ;;  %v623_v17 = vmul.f32 %v861_v25, %v1100_v42 }
  0x4b   : > { %v680_v51 = vadd.f32 %v658_v20, %v607_v8  ;;  %v372_v52 = vadd.f32 %v364_v28, %v355_v43  ;;  %v498_v53 = vsel %vm317_vm1, %v496_v60, %v497_v44  ;;  %v586_v56 = vrot.slane %v549_v46, 1 }
  0x4c   : > { %v587_v54 = vrot.slane %v550_v13, 1  ;;  %v659_v57 = vrot.slane %v622_v50, 2  ;;  %v660_v26 = vrot.slane %v623_v17, 2  ;;  %v200_v35 = vmul.f32 %v824_v1, %v1049_v45 }
  0x4d   : > { %v692_v58 = vadd.f32 %v925_v33, %v680_v51  ;;  %v445_v59 = vadd.f32 %v425_v47, %v372_v52  ;;  %v223_v61 = vmul.f32 %v826_v2, %v1049_v45  ;;  %v224_v62 = vmul.f32 %v826_v2, %v1053_v49 }
  0x4e   : > { %v588_v63 = vsel %vm243_vm0, %v586_v56, %v587_v54  ;;  %v661_v0 = vsel %vm317_vm1, %v659_v57, %v660_v26  ;;  %v297_v7 = vmul.f32 %v828_v3, %v1049_v45  ;;  %v298_v11 = vmul.f32 %v828_v3, %v1053_v49 }
  0x4f   : > { %701 = vst.msk [vmem:[%s937_s27 + $0x20] sm:$0xff] %vm696_vm2, %v692_v58  ;;  %v518_v12 = vadd.f32 %v498_v53, %v445_v59  ;;  %v262_v14 = vrot.slane %v223_v61, 1  ;;  %v263_v15 = vrot.slane %v224_v62, 1  ;;  %v365_v16 = vmul.f32 %v830_v4, %v1092_v34 }
  0x50   : > { %v336_v18 = vrot.slane %v297_v7, 2  ;;  %v337_v19 = vrot.slane %v298_v11, 2  ;;  %v388_v20 = vmul.f32 %v832_v5, %v1092_v34  ;;  %v389_v45 = vmul.f32 %v832_v5, %v1100_v42 }
  0x51   : > { %v535_v21 = vadd.f32 %v527_v41, %v518_v12  ;;  %v264_v49 = vsel %vm243_vm0, %v262_v14, %v263_v15  ;;  %v461_v22 = vmul.f32 %v839_v6, %v1092_v34  ;;  %v462_v23 = vmul.f32 %v839_v6, %v1100_v42 }
  0x52   : > { %v282_v24 = vadd.f32 %v264_v49, %v200_v35  ;;  %v338_v27 = vsel %vm317_vm1, %v336_v18, %v337_v19  ;;  %v426_v28 = vrot.slane %v388_v20, 1  ;;  %v427_v29 = vrot.slane %v389_v45, 1 }
  0x53   : > { %v608_v48 = vadd.f32 %v588_v63, %v535_v21  ;;  %v499_v55 = vrot.slane %v461_v22, 2  ;;  %v500_v32 = vrot.slane %v462_v23, 2  ;;  %v528_v37 = vmul.f32 %v843_v9, %v187_v30  ;;  %v189_v63 = vld [vmem:[%s837_s19 + $0x90] sm:$0xff] }
  0x54   : > { %v356_v36 = vadd.f32 %v338_v27, %v282_v24  ;;  %v551_v38 = vmul.f32 %v845_v10, %v187_v30  ;;  %v552_v39 = vmul.f32 %v845_v10, %v188_v31  ;;  %v428_v60 = vsel %vm243_vm0, %v426_v28, %v427_v29 }
  0x55   : > { %v681_v40 = vadd.f32 %v661_v0, %v608_v48  ;;  %v624_v41 = vmul.f32 %v861_v25, %v187_v30  ;;  %v625_v8 = vmul.f32 %v861_v25, %v188_v31  ;;  %v501_v44 = vsel %vm317_vm1, %v499_v55, %v500_v32 }
  0x56   : > { %v373_v43 = vadd.f32 %v365_v16, %v356_v36  ;;  %v589_v46 = vrot.slane %v551_v38, 1  ;;  %v590_v47 = vrot.slane %v552_v39, 1  ;;  %v225_v51 = vmul.f32 %v826_v2, %v1092_v34 }
  0x57   : > { %v693_v13 = vadd.f32 %v925_v33, %v681_v40  ;;  %v662_v50 = vrot.slane %v624_v41, 2  ;;  %v663_v17 = vrot.slane %v625_v8, 2  ;;  %v201_v53 = vmul.f32 %v824_v1, %v1092_v34 }
  0x58   : > { %v446_v52 = vadd.f32 %v428_v60, %v373_v43  ;;  %v226_v56 = vmul.f32 %v826_v2, %v1100_v42  ;;  %v299_v54 = vmul.f32 %v828_v3, %v1092_v34  ;;  %v591_v57 = vsel %vm243_vm0, %v589_v46, %v590_v47  ;;  %v190_v2 = vld [vmem:[%s837_s19 + $0x98] sm:$0x3] }
  0x59   : > { %702 = vst.msk [vmem:[%s937_s27 + $0x28] sm:$0xff] %vm696_vm2, %v693_v13  ;;  %v664_v26 = vsel %vm317_vm1, %v662_v50, %v663_v17  ;;  %v265_v35 = vrot.slane %v225_v51, 1  ;;  %v300_v58 = vmul.f32 %v828_v3, %v1100_v42  ;;  %v390_v1 = vmul.f32 %v832_v5, %v187_v30 }
  0x5a   : > { %v519_v59 = vadd.f32 %v501_v44, %v446_v52  ;;  %v266_v61 = vrot.slane %v226_v56, 1  ;;  %v339_v62 = vrot.slane %v299_v54, 2  ;;  %v391_v34 = vmul.f32 %v832_v5, %v188_v31 }
  0x5b   : > { %v340_v0 = vrot.slane %v300_v58, 2  ;;  %v463_v7 = vmul.f32 %v839_v6, %v187_v30  ;;  %v464_v11 = vmul.f32 %v839_v6, %v188_v31  ;;  %v366_v15 = vmul.f32 %v830_v4, %v187_v30 }
  0x5c   : > { %v536_v12 = vadd.f32 %v528_v37, %v519_v59  ;;  %v267_v14 = vsel %vm243_vm0, %v265_v35, %v266_v61  ;;  %v429_v3 = vrot.slane %v390_v1, 1  ;;  %v430_v18 = vrot.slane %v391_v34, 1 }
  0x5d   : > { %v283_v42 = vadd.f32 %v267_v14, %v201_v53  ;;  %v341_v16 = vsel %vm317_vm1, %v339_v62, %v340_v0  ;;  %v502_v19 = vrot.slane %v463_v7, 2  ;;  %v503_v45 = vrot.slane %v464_v11, 2 }
  0x5e   : > { %v609_v20 = vadd.f32 %v591_v57, %v536_v12  ;;  %v553_v5 = vmul.f32 %v845_v10, %v189_v63  ;;  %v554_v21 = vmul.f32 %v845_v10, %v190_v2  ;;  %v431_v22 = vsel %vm243_vm0, %v429_v3, %v430_v18 }
  0x5f   : > { %v357_v49 = vadd.f32 %v341_v16, %v283_v42  ;;  %v626_v23 = vmul.f32 %v861_v25, %v189_v63  ;;  %v627_v4 = vmul.f32 %v861_v25, %v190_v2  ;;  %v504_v28 = vsel %vm317_vm1, %v502_v19, %v503_v45 }
  0x60   : > { %v682_v6 = vadd.f32 %v664_v26, %v609_v20  ;;  %v592_v29 = vrot.slane %v553_v5, 1  ;;  %v593_v48 = vrot.slane %v554_v21, 1  ;;  %v529_v31 = vmul.f32 %v843_v9, %v189_v63 }
  0x61   : > { %v374_v24 = vadd.f32 %v366_v15, %v357_v49  ;;  %v665_v10 = vrot.slane %v626_v23, 2  ;;  %v666_v55 = vrot.slane %v627_v4, 2 }
  0x62   : > { %v694_v27 = vadd.f32 %v925_v33, %v682_v6  ;;  %v594_v36 = vsel %vm243_vm0, %v592_v29, %v593_v48 }
  0x63   : > { %v447_v30 = vadd.f32 %v431_v22, %v374_v24  ;;  %v667_v25 = vsel %vm317_vm1, %v665_v10, %v666_v55 }
  0x64   : > { %703 = vst.msk [vmem:[%s937_s27 + $0x30] sm:$0xff] %vm696_vm2, %v694_v27 }
  0x65   : > { %v520_v32 = vadd.f32 %v504_v28, %v447_v30 }
  0x67   : > { %v537_v37 = vadd.f32 %v529_v31, %v520_v32 }
  0x69   : > { %v610_v38 = vadd.f32 %v594_v36, %v537_v37 }
  0x6b   : > { %v683_v39 = vadd.f32 %v667_v25, %v610_v38 }
  0x6d   : > { %v695_v40 = vadd.f32 %v925_v33, %v683_v39 }
  0x6f   : > { %704 = vst.msk [vmem:[%s937_s27 + $0x38] sm:$0xff] %vm696_vm2, %v695_v40 }
  0x70 PF: > { %s13_s12 = sadd.s32 1, %s788_s12  }
  0x71   : > { %p10_p4 = scmp.ge.s32.totalorder %s13_s12, 4  }
  0x73   :  { %12 = sbr.rel (!%p10_p4) target bundleno = 1 (0x1), region = 62 }

// kernel: encoder_stage.26
= control target key start
LH: loop header
LB: loop body
LE: loop exit
PB: predicated region body
PF: predicated region fallthrough
CT: control target
= control target key end

     0   :  { %vm202_vm0 = vcmask 523264   ;;  %vm308_vm1 = vcmask 261120   ;;  %s738_s1 = inlined_call_operand.vmem [shape: f32[64,32], index: 1, kind: input, shape index: {}]   ;;  %s739_s0 = inlined_call_operand.vmem [shape: f32[128,64], index: 0, kind: input, shape index: {}]   ;;  %s740_s2 = inlined_call_operand.vmem [shape: f32[1,32], index: 2, kind: input, shape index: {}]   ;;  %s741_s3 = inlined_call_operand.vmem [shape: f32[128,32], index: 3, kind: input, shape index: {}]   ;;  %s742_s4 = inlined_call_operand.vmem [shape: f32[128,32], index: 4, kind: output, shape index: {}]  }
   0x1   :  { %v192_v0 = vld [vmem:[%s738_s1 + $0x30] sm:$0xff]  ;;  %v193_v1 = vld [vmem:[%s738_s1 + $0x38] sm:$0xff]  ;;  %v190_v2 = vld [vmem:[%s738_s1 + $0x20] sm:$0xff] }
   0x2   :  { %v197_v3 = vpack.c.bf16 %v193_v1, %v192_v0  ;;  %v191_v4 = vld [vmem:[%s738_s1 + $0x28] sm:$0xff]  ;;  %v188_v5 = vld [vmem:[%s738_s1 + $0x10] sm:$0xff]  ;;  %v189_v6 = vld [vmem:[%s738_s1 + $0x18] sm:$0xff] }
   0x3   :  { %v196_v7 = vpack.c.bf16 %v191_v4, %v190_v2  ;;  %v186_v8 = vld [vmem:[%s738_s1] sm:$0xff]  ;;  %v187_v9 = vld [vmem:[%s738_s1 + $0x8] sm:$0xff]  ;;  %v195_v11 = vpack.c.bf16 %v189_v6, %v188_v5  ;;  %v501_v44 = vld [vmem:[%s739_s0 + $0x10] sm:$0xff] }
   0x4   :  { %v434_v10 = vld [vmem:[%s739_s0] sm:$0xff]  ;;  %231 = vmatpush.bf16.msra.mxu0 %v197_v3  ;;  %337 = vmatpush.bf16.msra.mxu1 %v197_v3  ;;  %v436_v12 = vpack.c.bf16 %v187_v9, %v186_v8  ;;  %v441_v13 = vld [vmem:[%s739_s0 + $0x8] sm:$0xff]  ;;  %v509_v49 = vld [vmem:[%s739_s0 + $0x18] sm:$0xff]  ;;  %v36_v2 = vmul.f32 %v501_v44, %v501_v44 }
   0x5   :  { %v34_v14 = vmul.f32 %v434_v10, %v434_v10  ;;  %v448_v15 = vld [vmem:[%s739_s0 + $0x20] sm:$0xff]  ;;  %v453_v16 = vld [vmem:[%s739_s0 + $0x28] sm:$0xff]  ;;  %338 = vmatpush.bf16.msra.mxu2 %v197_v3  ;;  %339 = vmatpush.bf16.msra.mxu3 %v197_v3  ;;  %v35_v17 = vmul.f32 %v441_v13, %v441_v13  ;;  %v514_v50 = vld [vmem:[%s739_s0 + $0x30] sm:$0xff]  ;;  %v37_v3 = vmul.f32 %v509_v49, %v509_v49 }
   0x6   :  { %v38_v18 = vmul.f32 %v448_v15, %v448_v15  ;;  %v39_v19 = vmul.f32 %v453_v16, %v453_v16  ;;  %v464_v20 = vld [vmem:[%s739_s0 + $0x40] sm:$0xff]  ;;  %v469_v21 = vld [vmem:[%s739_s0 + $0x48] sm:$0xff]  ;;  %v522_v55 = vld [vmem:[%s739_s0 + $0x38] sm:$0xff]  ;;  %v40_v4 = vmul.f32 %v514_v50, %v514_v50 }
   0x7   :  { %v474_v22 = vld [vmem:[%s739_s0 + $0x60] sm:$0xff]  ;;  %v50_v23 = vmul.f32 %v34_v14, %v434_v10  ;;  %v42_v24 = vmul.f32 %v464_v20, %v464_v20  ;;  %v43_v25 = vmul.f32 %v469_v21, %v469_v21  ;;  %v484_v26 = vld [vmem:[%s739_s0 + $0x68] sm:$0xff]  ;;  %v51_v28 = vmul.f32 %v35_v17, %v441_v13  ;;  %v527_v56 = vld [vmem:[%s739_s0 + $0x50] sm:$0xff] }
   0x8   :  { %v46_v27 = vmul.f32 %v474_v22, %v474_v22  ;;  %v54_v29 = vmul.f32 %v38_v18, %v448_v15  ;;  %v55_v30 = vmul.f32 %v39_v19, %v453_v16  ;;  %v47_v31 = vmul.f32 %v484_v26, %v484_v26  ;;  %232 = vmatpush.bf16.msra.mxu0 %v196_v7  ;;  %v532_v57 = vld [vmem:[%s739_s0 + $0x58] sm:$0xff] }
   0x9   :  { %340 = vmatpush.bf16.msra.mxu1 %v196_v7  ;;  %v66_v32 = vmul.f32 0.044715, %v50_v23  ;;  %v58_v33 = vmul.f32 %v42_v24, %v464_v20  ;;  %v59_v34 = vmul.f32 %v43_v25, %v469_v21  ;;  %341 = vmatpush.bf16.msra.mxu2 %v196_v7  ;;  %v67_v36 = vmul.f32 0.044715, %v51_v28 }
   0xa   :  { %v62_v35 = vmul.f32 %v46_v27, %v474_v22  ;;  %342 = vmatpush.bf16.msra.mxu3 %v196_v7  ;;  %v70_v37 = vmul.f32 0.044715, %v54_v29  ;;  %v71_v38 = vmul.f32 0.044715, %v55_v30  ;;  %v63_v39 = vmul.f32 %v47_v31, %v484_v26 }
   0xb   :  { %v82_v40 = vadd.f32 %v66_v32, %v434_v10  ;;  %v74_v41 = vmul.f32 0.044715, %v58_v33  ;;  %v75_v42 = vmul.f32 0.044715, %v59_v34  ;;  %v83_v45 = vadd.f32 %v67_v36, %v441_v13 }
   0xc   :  { %v78_v43 = vmul.f32 0.044715, %v62_v35  ;;  %v86_v46 = vadd.f32 %v70_v37, %v448_v15  ;;  %v87_v47 = vadd.f32 %v71_v38, %v453_v16  ;;  %v79_v48 = vmul.f32 0.044715, %v63_v39  ;;  %233 = vmatpush.bf16.msra.mxu0 %v195_v11 }
   0xd   :  { %343 = vmatpush.bf16.msra.mxu1 %v195_v11  ;;  %v98_v51 = vmul.f32 0.7978846, %v82_v40  ;;  %v90_v52 = vadd.f32 %v74_v41, %v464_v20  ;;  %v91_v53 = vadd.f32 %v75_v42, %v469_v21  ;;  %344 = vmatpush.bf16.msra.mxu2 %v195_v11  ;;  %v99_v58 = vmul.f32 0.7978846, %v83_v45 }
   0xe   :  { %v94_v54 = vadd.f32 %v78_v43, %v474_v22  ;;  %345 = vmatpush.bf16.msra.mxu3 %v195_v11  ;;  %v102_v59 = vmul.f32 0.7978846, %v86_v46  ;;  %v103_v60 = vmul.f32 0.7978846, %v87_v47  ;;  %v95_v61 = vadd.f32 %v79_v48, %v484_v26 }
   0xf   :  { %350 = vtanh.f32 %v98_v51  ;;  %v106_v62 = vmul.f32 0.7978846, %v90_v52  ;;  %v107_v63 = vmul.f32 0.7978846, %v91_v53  ;;  %v41_v5 = vmul.f32 %v522_v55, %v522_v55 }
  0x10   :  { %v110_v0 = vmul.f32 0.7978846, %v94_v54  ;;  %352 = vtanh.f32 %v99_v58  ;;  %v111_v1 = vmul.f32 0.7978846, %v95_v61  ;;  %234 = vmatpush.bf16.msra.mxu0 %v436_v12  ;;  %v44_v6 = vmul.f32 %v527_v56, %v527_v56 }
  0x11   :  { %346 = vmatpush.bf16.msra.mxu1 %v436_v12  ;;  %354 = vtanh.f32 %v102_v59  ;;  %347 = vmatpush.bf16.msra.mxu2 %v436_v12  ;;  %v52_v7 = vmul.f32 %v36_v2, %v501_v44  ;;  %v53_v8 = vmul.f32 %v37_v3, %v509_v49  ;;  %v45_v9 = vmul.f32 %v532_v57, %v532_v57 }
  0x12   :  { %348 = vmatpush.bf16.msra.mxu3 %v436_v12  ;;  %356 = vtanh.f32 %v103_v60  ;;  %v56_v11 = vmul.f32 %v40_v4, %v514_v50  ;;  %v57_v14 = vmul.f32 %v41_v5, %v522_v55  ;;  %v60_v17 = vmul.f32 %v44_v6, %v527_v56  ;;  %v568_v4 = vld [vmem:[%s739_s0 + $0x70] sm:$0xff] }
  0x13   :  { %358 = vtanh.f32 %v106_v62  ;;  %v68_v18 = vmul.f32 0.044715, %v52_v7  ;;  %v69_v19 = vmul.f32 0.044715, %v53_v8  ;;  %v61_v12 = vmul.f32 %v45_v9, %v532_v57 }
  0x14   :  { %360 = vtanh.f32 %v107_v63  ;;  %v72_v24 = vmul.f32 0.044715, %v56_v11  ;;  %v73_v25 = vmul.f32 0.044715, %v57_v14  ;;  %v76_v27 = vmul.f32 0.044715, %v60_v17 }
  0x15   :  { %v351_v23 = vpop.eup %350  ;;  %362 = vtanh.f32 %v110_v0  ;;  %v84_v30 = vadd.f32 %v68_v18, %v501_v44  ;;  %v85_v31 = vadd.f32 %v69_v19, %v509_v49  ;;  %v77_v36 = vmul.f32 0.044715, %v61_v12 }
  0x16   :  { %v353_v28 = vpop.eup %352  ;;  %v130_v29 = vadd.f32 1.0, %v351_v23  ;;  %364 = vtanh.f32 %v111_v1  ;;  %v88_v34 = vadd.f32 %v72_v24, %v514_v50  ;;  %v89_v35 = vadd.f32 %v73_v25, %v522_v55 }
  0x17   :  { %v355_v32 = vpop.eup %354  ;;  %v131_v33 = vadd.f32 1.0, %v353_v28  ;;  %v100_v40 = vmul.f32 0.7978846, %v84_v30  ;;  %v101_v41 = vmul.f32 0.7978846, %v85_v31  ;;  %v92_v6 = vadd.f32 %v76_v27, %v527_v56 }
  0x18   :  { %v357_v37 = vpop.eup %356  ;;  %v146_v38 = vmul.f32 0.5, %v130_v29  ;;  %v134_v39 = vadd.f32 1.0, %v355_v32  ;;  %v104_v46 = vmul.f32 0.7978846, %v88_v34  ;;  %v105_v47 = vmul.f32 0.7978846, %v89_v35 }
  0x19   :  { %v359_v42 = vpop.eup %358  ;;  %v147_v43 = vmul.f32 0.5, %v131_v33  ;;  %v135_v45 = vadd.f32 1.0, %v357_v37  ;;  %366 = vtanh.f32 %v100_v40  ;;  %v93_v9 = vadd.f32 %v77_v36, %v532_v57 }
  0x1a   :  { %v361_v48 = vpop.eup %360  ;;  %v162_v51 = vmul.f32 %v146_v38, %v434_v10  ;;  %v150_v52 = vmul.f32 0.5, %v134_v39  ;;  %v138_v53 = vadd.f32 1.0, %v359_v42  ;;  %368 = vtanh.f32 %v101_v41 }
  0x1b   :  { %v363_v54 = vpop.eup %362  ;;  %v163_v58 = vmul.f32 %v147_v43, %v441_v13  ;;  %v151_v59 = vmul.f32 0.5, %v135_v45  ;;  %v139_v60 = vadd.f32 1.0, %v361_v48  ;;  %370 = vtanh.f32 %v104_v46  ;;  %v573_v13 = vld [vmem:[%s739_s0 + $0x78] sm:$0xff] }
  0x1c   :  { %v365_v61 = vpop.eup %364  ;;  %v166_v62 = vmul.f32 %v150_v52, %v448_v15  ;;  %v154_v63 = vmul.f32 0.5, %v138_v53  ;;  %v142_v0 = vadd.f32 1.0, %v363_v54  ;;  %372 = vtanh.f32 %v105_v47 }
  0x1d   :  { %v178_v1 = vpack.c.bf16 %v163_v58, %v162_v51  ;;  %v167_v2 = vmul.f32 %v151_v59, %v453_v16  ;;  %v155_v3 = vmul.f32 0.5, %v139_v60  ;;  %v143_v10 = vadd.f32 1.0, %v365_v61 }
  0x1e   :  { %v170_v15 = vmul.f32 %v154_v63, %v464_v20  ;;  %v158_v5 = vmul.f32 0.5, %v142_v0  ;;  %v108_v17 = vmul.f32 0.7978846, %v92_v6  ;;  %v48_v18 = vmul.f32 %v568_v4, %v568_v4 }
  0x1f   :  { %329 = vmatmul.msk.bf16.vlgmr.msra.gmra.mxu0 %vm202_vm0, %v178_v1  ;;  %v180_v16 = vpack.c.bf16 %v167_v2, %v166_v62  ;;  %v171_v7 = vmul.f32 %v155_v3, %v469_v21  ;;  %v159_v8 = vmul.f32 0.5, %v143_v10  ;;  %v367_v11 = vpop.eup %366  ;;  %v49_v20 = vmul.f32 %v573_v13, %v573_v13  ;;  %v276_v10 = vld [vmem:[%s741_s3] sm:$0xff] }
  0x20   :  { %v174_v14 = vmul.f32 %v158_v5, %v474_v22  ;;  %v369_v19 = vpop.eup %368  ;;  %v132_v21 = vadd.f32 1.0, %v367_v11  ;;  %v109_v24 = vmul.f32 0.7978846, %v93_v9  ;;  %374 = vtanh.f32 %v108_v17 }
  0x21   :  { %331 = vmatmul.msk.bf16.vlgmr.msra.gmra.mxu1 %vm202_vm0, %v180_v16  ;;  %v182_v12 = vpack.c.bf16 %v171_v7, %v170_v15  ;;  %v175_v23 = vmul.f32 %v159_v8, %v484_v26  ;;  %v371_v25 = vpop.eup %370  ;;  %v133_v27 = vadd.f32 1.0, %v369_v19  ;;  %v64_v22 = vmul.f32 %v48_v18, %v568_v4  ;;  %v277_v8 = vld [vmem:[%s741_s3 + $0x8] sm:$0xff] }
  0x22   :  { %v65_v28 = vmul.f32 %v49_v20, %v573_v13  ;;  %v148_v30 = vmul.f32 0.5, %v132_v21  ;;  %v136_v31 = vadd.f32 1.0, %v371_v25  ;;  %376 = vtanh.f32 %v109_v24  ;;  %v373_v32 = vpop.eup %372  ;;  %v281_v18 = vld [vmem:[%s741_s3 + $0x28] sm:$0xff]  ;;  %v288_v21 = vld [vmem:[%s741_s3 + $0x60] sm:$0xff] }
  0x23   :  { %333 = vmatmul.msk.bf16.vlgmr.msra.gmra.mxu2 %vm202_vm0, %v182_v12  ;;  %v184_v29 = vpack.c.bf16 %v175_v23, %v174_v14  ;;  %v149_v33 = vmul.f32 0.5, %v133_v27  ;;  %v80_v34 = vmul.f32 0.044715, %v64_v22  ;;  %v137_v26 = vadd.f32 1.0, %v373_v32  ;;  %v284_v14 = vld [vmem:[%s741_s3 + $0x40] sm:$0xff]  ;;  %v285_v32 = vld [vmem:[%s741_s3 + $0x48] sm:$0xff] }
  0x24   :  { %v81_v35 = vmul.f32 0.044715, %v65_v28  ;;  %v152_v36 = vmul.f32 0.5, %v136_v31  ;;  %v164_v39 = vmul.f32 %v148_v30, %v501_v44 }
  0x25   :  { %335 = vmatmul.msk.bf16.vlgmr.msra.gmra.mxu3 %vm202_vm0, %v184_v29  ;;  %v96_v37 = vadd.f32 %v80_v34, %v568_v4  ;;  %v165_v40 = vmul.f32 %v149_v33, %v509_v49  ;;  %v153_v41 = vmul.f32 0.5, %v137_v26  ;;  %v278_v29 = vld [vmem:[%s741_s3 + $0x10] sm:$0xff] }
  0x26   :  { %v97_v38 = vadd.f32 %v81_v35, %v573_v13  ;;  %v375_v42 = vpop.eup %374  ;;  %v168_v47 = vmul.f32 %v152_v36, %v514_v50  ;;  %v282_v34 = vld [vmem:[%s741_s3 + $0x30] sm:$0xff] }
  0x27   :  { %v112_v43 = vmul.f32 0.7978846, %v96_v37  ;;  %v169_v48 = vmul.f32 %v153_v41, %v522_v55  ;;  %v140_v51 = vadd.f32 1.0, %v375_v42  ;;  %v179_v53 = vpack.c.bf16 %v165_v40, %v164_v39 }
  0x28   :  { %v113_v45 = vmul.f32 0.7978846, %v97_v38  ;;  %v377_v46 = vpop.eup %376  ;;  %v289_v38 = vld [vmem:[%s741_s3 + $0x68] sm:$0xff] }
  0x29   :  { %v141_v52 = vadd.f32 1.0, %v377_v46  ;;  %378 = vtanh.f32 %v112_v43  ;;  %v156_v54 = vmul.f32 0.5, %v140_v51  ;;  %v181_v59 = vpack.c.bf16 %v169_v48, %v168_v47  ;;  %v286_v48 = vld [vmem:[%s741_s3 + $0x50] sm:$0xff] }
  0x2a   :  { %380 = vtanh.f32 %v113_v45  ;;  %v279_v45 = vld [vmem:[%s741_s3 + $0x18] sm:$0xff] }
  0x2b   :  { %v157_v58 = vmul.f32 0.5, %v141_v52  ;;  %v172_v44 = vmul.f32 %v156_v54, %v527_v56  ;;  %v283_v52 = vld [vmem:[%s741_s3 + $0x38] sm:$0xff] }
  0x2d   :  { %v173_v49 = vmul.f32 %v157_v58, %v532_v57  ;;  %v608_v57 = vld [vmem:[%s740_s2] ss:$0 sm:$0xff] }
  0x2f   :  { %330 = vmatmul.msk.bf16.gmra.mxu0 %vm202_vm0, %v179_v53  ;;  %v379_v60 = vpop.eup %378  ;;  %v183_v61 = vpack.c.bf16 %v173_v49, %v172_v44 }
  0x30   :  { %v381_v62 = vpop.eup %380  ;;  %v144_v50 = vadd.f32 1.0, %v379_v60  ;;  %v290_v60 = vld [vmem:[%s741_s3 + $0x70] sm:$0xff] }
  0x31   :  { %332 = vmatmul.msk.bf16.gmra.mxu1 %vm202_vm0, %v181_v59  ;;  %v145_v55 = vadd.f32 1.0, %v381_v62 }
  0x32   :  { %v160_v63 = vmul.f32 0.5, %v144_v50  ;;  %v287_v50 = vld [vmem:[%s741_s3 + $0x58] sm:$0xff] }
  0x33   :  { %334 = vmatmul.msk.bf16.gmra.mxu2 %vm202_vm0, %v183_v61  ;;  %v161_v0 = vmul.f32 0.5, %v145_v55 }
  0x34   :  { %v176_v1 = vmul.f32 %v160_v63, %v568_v4  ;;  %v280_v4 = vld [vmem:[%s741_s3 + $0x20] sm:$0xff] }
  0x35   :  { %v177_v2 = vmul.f32 %v161_v0, %v573_v13 }
  0x37   :  { %v185_v56 = vpack.c.bf16 %v177_v2, %v176_v1  ;;  %v291_v2 = vld [vmem:[%s741_s3 + $0x78] sm:$0xff] }
  0x39   :  { %336 = vmatmul.msk.bf16.gmra.mxu3 %vm202_vm0, %v185_v56 }
  0x9c   :  { %v236_v3 = vpop.f32.mrf.mxu0 }
  0x9d   :  { %v237_v15 = vadd.f32 %v608_v57, %v236_v3 }
  0x9e   :  { %v246_v5 = vpop.f32.mrf.mxu1 }
  0x9f   :  { %v292_v13 = vadd.f32 %v276_v10, %v237_v15  ;;  %v247_v6 = vadd.f32 %v608_v57, %v246_v5 }
  0xa1   :  { %309 = vst.msk [vmem:[%s742_s4] sm:$0xff] %vm308_vm1, %v292_v13  ;;  %v296_v16 = vadd.f32 %v280_v4, %v247_v6 }
  0xa3   :  { %313 = vst.msk [vmem:[%s742_s4 + $0x20] sm:$0xff] %vm308_vm1, %v296_v16 }
  0xa4   :  { %v238_v7 = vpop.f32.mrf.mxu0 }
  0xa5   :  { %v239_v9 = vadd.f32 %v608_v57, %v238_v7 }
  0xa6   :  { %v256_v11 = vpop.f32.mrf.mxu2  ;;  %v248_v17 = vpop.f32.mrf.mxu1 }
  0xa7   :  { %v257_v20 = vadd.f32 %v608_v57, %v256_v11  ;;  %v293_v19 = vadd.f32 %v277_v8, %v239_v9  ;;  %v249_v12 = vadd.f32 %v608_v57, %v248_v17 }
  0xa8   :  { %v266_v23 = vpop.f32.mrf.mxu3 }
  0xa9   :  { %v300_v24 = vadd.f32 %v284_v14, %v257_v20  ;;  %v267_v25 = vadd.f32 %v608_v57, %v266_v23  ;;  %310 = vst.msk [vmem:[%s742_s4 + $0x8] sm:$0xff] %vm308_vm1, %v293_v19  ;;  %v297_v27 = vadd.f32 %v281_v18, %v249_v12 }
  0xab   :  { %317 = vst.msk [vmem:[%s742_s4 + $0x40] sm:$0xff] %vm308_vm1, %v300_v24  ;;  %v304_v22 = vadd.f32 %v288_v21, %v267_v25 }
  0xac   :  { %314 = vst.msk [vmem:[%s742_s4 + $0x28] sm:$0xff] %vm308_vm1, %v297_v27  ;;  %v241_v28 = vpop.f32.mrf.mxu0 }
  0xad   :  { %321 = vst.msk [vmem:[%s742_s4 + $0x60] sm:$0xff] %vm308_vm1, %v304_v22  ;;  %v242_v30 = vadd.f32 %v608_v57, %v241_v28 }
  0xae   :  { %v258_v31 = vpop.f32.mrf.mxu2  ;;  %v251_v33 = vpop.f32.mrf.mxu1 }
  0xaf   :  { %v259_v35 = vadd.f32 %v608_v57, %v258_v31  ;;  %v294_v26 = vadd.f32 %v278_v29, %v242_v30  ;;  %v252_v36 = vadd.f32 %v608_v57, %v251_v33 }
  0xb0   :  { %v268_v37 = vpop.f32.mrf.mxu3 }
  0xb1   :  { %v301_v39 = vadd.f32 %v285_v32, %v259_v35  ;;  %v269_v40 = vadd.f32 %v608_v57, %v268_v37  ;;  %311 = vst.msk [vmem:[%s742_s4 + $0x10] sm:$0xff] %vm308_vm1, %v294_v26  ;;  %v298_v41 = vadd.f32 %v282_v34, %v252_v36 }
  0xb3   :  { %318 = vst.msk [vmem:[%s742_s4 + $0x48] sm:$0xff] %vm308_vm1, %v301_v39  ;;  %v305_v42 = vadd.f32 %v289_v38, %v269_v40 }
  0xb4   :  { %315 = vst.msk [vmem:[%s742_s4 + $0x30] sm:$0xff] %vm308_vm1, %v298_v41  ;;  %v243_v43 = vpop.f32.mrf.mxu0 }
  0xb5   :  { %322 = vst.msk [vmem:[%s742_s4 + $0x68] sm:$0xff] %vm308_vm1, %v305_v42  ;;  %v244_v46 = vadd.f32 %v608_v57, %v243_v43 }
  0xb6   :  { %v261_v47 = vpop.f32.mrf.mxu2  ;;  %v253_v51 = vpop.f32.mrf.mxu1 }
  0xb7   :  { %v262_v53 = vadd.f32 %v608_v57, %v261_v47  ;;  %v295_v54 = vadd.f32 %v279_v45, %v244_v46  ;;  %v254_v58 = vadd.f32 %v608_v57, %v253_v51 }
  0xb9   :  { %v302_v59 = vadd.f32 %v286_v48, %v262_v53  ;;  %312 = vst.msk [vmem:[%s742_s4 + $0x18] sm:$0xff] %vm308_vm1, %v295_v54  ;;  %v299_v44 = vadd.f32 %v283_v52, %v254_v58 }
  0xbb   :  { %319 = vst.msk [vmem:[%s742_s4 + $0x50] sm:$0xff] %vm308_vm1, %v302_v59 }
  0xbc   :  { %316 = vst.msk [vmem:[%s742_s4 + $0x38] sm:$0xff] %vm308_vm1, %v299_v44  ;;  %v271_v49 = vpop.f32.mrf.mxu3 }
  0xbd   :  { %v272_v61 = vadd.f32 %v608_v57, %v271_v49 }
  0xbe   :  { %v263_v62 = vpop.f32.mrf.mxu2 }
  0xbf   :  { %v264_v55 = vadd.f32 %v608_v57, %v263_v62  ;;  %v306_v63 = vadd.f32 %v290_v60, %v272_v61 }
  0xc1   :  { %v303_v0 = vadd.f32 %v287_v50, %v264_v55  ;;  %323 = vst.msk [vmem:[%s742_s4 + $0x70] sm:$0xff] %vm308_vm1, %v306_v63 }
  0xc3   :  { %320 = vst.msk [vmem:[%s742_s4 + $0x58] sm:$0xff] %vm308_vm1, %v303_v0 }
  0xc4   :  { %v273_v1 = vpop.f32.mrf.mxu3 }
  0xc5   :  { %v274_v56 = vadd.f32 %v608_v57, %v273_v1 }
  0xc7   :  { %v307_v3 = vadd.f32 %v291_v2, %v274_v56 }
  0xc9   :  { %324 = vst.msk [vmem:[%s742_s4 + $0x78] sm:$0xff] %vm308_vm1, %v307_v3 }

// kernel: encoder_stage.35
= control target key start
LH: loop header
LB: loop body
LE: loop exit
PB: predicated region body
PF: predicated region fallthrough
CT: control target
= control target key end

     0   :  { %vm31_vm0 = vcmask 261120   ;;  %s1006_s0 = inlined_call_operand.vmem [shape: f32[128,32], index: 0, kind: input, shape index: {}]   ;;  %s1007_s1 = inlined_call_operand.vmem [shape: f32[1,32], index: 1, kind: input, shape index: {}]   ;;  %s1008_s2 = inlined_call_operand.vmem [shape: f32[1,32], index: 2, kind: input, shape index: {}]   ;;  %s1009_s3 = inlined_call_operand.hbm [shape: f32[128,32], index: 3, kind: output, shape index: {}]  }
   0x1   :  { %v558_v0 = vld [vmem:[%s1006_s0 + $0x20] sm:$0xff]  ;;  %v17_v1 = vld [vmem:[%s1006_s0 + $0x10] sm:$0xff]  ;;  %v573_v6 = vld [vmem:[%s1006_s0 + $0x28] sm:$0xff] }
   0x2   :  { %v15_v2 = vld [vmem:[%s1006_s0] sm:$0xff]  ;;  %v44_v3 = vsel %vm31_vm0, %v558_v0, 0.0  ;;  %v38_v4 = vsel %vm31_vm0, %v17_v1, 0.0  ;;  %v578_v7 = vld [vmem:[%s1006_s0 + $0x18] sm:$0xff]  ;;  %v583_v8 = vld [vmem:[%s1006_s0 + $0x8] sm:$0xff] }
   0x3   :  { %v32_v5 = vsel %vm31_vm0, %v15_v2, 0.0  ;;  %45 = vadd.xlane.f32.xlu2 %v44_v3  ;;  %39 = vadd.xlane.f32.xlu1 %v38_v4 }
   0x4   :  { %33 = vadd.xlane.f32.xlu0 %v32_v5 }
   0x5   :  { %8 = vsyncpa [#allocation3], 0  ;;  %v47_v9 = vsel %vm31_vm0, %v573_v6, 0.0  ;;  %v41_v10 = vsel %vm31_vm0, %v578_v7, 0.0  ;;  %v35_v11 = vsel %vm31_vm0, %v583_v8, 0.0  ;;  %v594_v12 = vld [vmem:[%s1006_s0 + $0x40] sm:$0xff] }
   0x6   :  { %v599_v13 = vld [vmem:[%s1006_s0 + $0x38] sm:$0xff]  ;;  %v604_v14 = vld [vmem:[%s1006_s0 + $0x30] sm:$0xff]  ;;  %v56_v15 = vsel %vm31_vm0, %v594_v12, 0.0  ;;  %v625_v20 = vld [vmem:[%s1006_s0 + $0x48] sm:$0xff]  ;;  %v531_v32 = vmov 32.0   ;;  %s453_s22 = sshll.u32 %s1009_s3, 4  ;;  %s454_s22 = int_to_ptr.hbm [resolvable:$true] %s453_s22 }
   0x7   :  { %v53_v16 = vsel %vm31_vm0, %v599_v13, 0.0  ;;  %v50_v17 = vsel %vm31_vm0, %v604_v14, 0.0  ;;  %v615_v18 = vld [vmem:[%s1006_s0 + $0x58] sm:$0xff]  ;;  %v620_v19 = vld [vmem:[%s1006_s0 + $0x50] sm:$0xff]  ;;  %v59_v23 = vsel %vm31_vm0, %v625_v20, 0.0  ;;  %v641_v25 = vld [vmem:[%s1006_s0 + $0x68] sm:$0xff]  ;;  %471 = vrcp.f32 %v531_v32 }
   0x8   :  { %v65_v21 = vsel %vm31_vm0, %v615_v18, 0.0  ;;  %v62_v22 = vsel %vm31_vm0, %v620_v19, 0.0  ;;  %v636_v24 = vld [vmem:[%s1006_s0 + $0x70] sm:$0xff]  ;;  %v646_v26 = vld [vmem:[%s1006_s0 + $0x60] sm:$0xff]  ;;  %v71_v28 = vsel %vm31_vm0, %v641_v25, 0.0  ;;  %v657_v30 = vld [vmem:[%s1006_s0 + $0x78] sm:$0xff] }
   0x9   :  { %v74_v27 = vsel %vm31_vm0, %v636_v24, 0.0  ;;  %v68_v29 = vsel %vm31_vm0, %v646_v26, 0.0  ;;  %v77_v31 = vsel %vm31_vm0, %v657_v30, 0.0  ;;  %s533_s23 = smov 128   ;;  %s534_s24 = smov 8  }
   0xb   :  { %48 = vadd.xlane.f32.xlu2 %v47_v9  ;;  %42 = vadd.xlane.f32.xlu1 %v41_v10 }
   0xc   :  { %36 = vadd.xlane.f32.xlu0 %v35_v11 }
   0xd   :  { %v472_v33 = vpop.eup %471 }
   0xe   :  { %v81_v34 = vmul.f32 32.0, %v472_v33  ;;  %vm85_vm1 = vweird.f32 %v472_v33 }
  0x10   :  { %v82_v35 = vsub.f32 1.0, %v81_v34 }
  0x12   :  { %v83_v36 = vmul.f32 %v472_v33, %v82_v35 }
  0x13   :  { %57 = vadd.xlane.f32.xlu2 %v56_v15  ;;  %54 = vadd.xlane.f32.xlu1 %v53_v16 }
  0x14   :  { %51 = vadd.xlane.f32.xlu0 %v50_v17  ;;  %v84_v37 = vadd.f32 %v472_v33, %v83_v36 }
  0x16   :  { %v661_v38 = vsel %vm85_vm1, %v472_v33, %v84_v37 }
  0x1b   :  { %66 = vadd.xlane.f32.xlu2 %v65_v21  ;;  %63 = vadd.xlane.f32.xlu1 %v62_v22 }
  0x1c   :  { %60 = vadd.xlane.f32.xlu0 %v59_v23 }
  0x23   :  { %75 = vadd.xlane.f32.xlu2 %v74_v27  ;;  %72 = vadd.xlane.f32.xlu1 %v71_v28 }
  0x24   :  { %69 = vadd.xlane.f32.xlu0 %v68_v29 }
  0x2c   :  { %78 = vadd.xlane.f32.xlu0 %v77_v31 }
  0x76   :  { %v46_v39 = vpop.xlane.xlu2 %45  ;;  %v40_v40 = vpop.xlane.xlu1 %39 }
  0x77   :  { %v89_v41 = vmul.f32 %v661_v38, %v40_v40  ;;  %v34_v42 = vpop.xlane.xlu0 %33  ;;  %v91_v58 = vmul.f32 %v661_v38, %v46_v39 }
  0x78   :  { %v87_v43 = vmul.f32 %v661_v38, %v34_v42 }
  0x79   :  { %v665_v44 = vsub.f32 %v17_v1, %v89_v41 }
  0x7a   :  { %v667_v45 = vsub.f32 %v15_v2, %v87_v43  ;;  %v697_v2 = vsub.f32 %v558_v0, %v91_v58 }
  0x7b   :  { %v121_v46 = vmul.f32 %v665_v44, %v665_v44 }
  0x7c   :  { %v119_v47 = vmul.f32 %v667_v45, %v667_v45  ;;  %v123_v11 = vmul.f32 %v697_v2, %v697_v2 }
  0x7d   :  { %v141_v48 = vsel %vm31_vm0, %v121_v46, 0.0 }
  0x7e   :  { %v49_v49 = vpop.xlane.xlu2 %48  ;;  %v43_v50 = vpop.xlane.xlu1 %42  ;;  %142 = vadd.xlane.f32.xlu0 %v141_v48  ;;  %v135_v51 = vsel %vm31_vm0, %v119_v47, 0.0 }
  0x7f   :  { %v92_v52 = vmul.f32 %v661_v38, %v49_v49  ;;  %v90_v53 = vmul.f32 %v661_v38, %v43_v50  ;;  %136 = vadd.xlane.f32.xlu1 %v135_v51  ;;  %v37_v54 = vpop.xlane.xlu0 %36 }
  0x80   :  { %v88_v55 = vmul.f32 %v661_v38, %v37_v54 }
  0x81   :  { %v679_v56 = vsub.f32 %v573_v6, %v92_v52  ;;  %v682_v57 = vsub.f32 %v578_v7, %v90_v53 }
  0x82   :  { %v686_v59 = vsub.f32 %v583_v8, %v88_v55 }
  0x83   :  { %v124_v60 = vmul.f32 %v679_v56, %v679_v56  ;;  %v122_v61 = vmul.f32 %v682_v57, %v682_v57 }
  0x84   :  { %v120_v62 = vmul.f32 %v686_v59, %v686_v59 }
  0x85   :  { %v150_v63 = vsel %vm31_vm0, %v124_v60, 0.0  ;;  %v144_v1 = vsel %vm31_vm0, %v122_v61, 0.0 }
  0x86   :  { %v58_v3 = vpop.xlane.xlu2 %57  ;;  %151 = vadd.xlane.f32.xlu0 %v150_v63  ;;  %v138_v4 = vsel %vm31_vm0, %v120_v62, 0.0  ;;  %v55_v5 = vpop.xlane.xlu1 %54 }
  0x87   :  { %v95_v6 = vmul.f32 %v661_v38, %v58_v3  ;;  %145 = vadd.xlane.f32.xlu1 %v144_v1  ;;  %139 = vadd.xlane.f32.xlu2 %v138_v4  ;;  %v52_v7 = vpop.xlane.xlu0 %51  ;;  %v94_v9 = vmul.f32 %v661_v38, %v55_v5 }
  0x88   :  { %v93_v8 = vmul.f32 %v661_v38, %v52_v7 }
  0x89   :  { %v704_v10 = vsub.f32 %v594_v12, %v95_v6  ;;  %v714_v16 = vsub.f32 %v599_v13, %v94_v9  ;;  %v147_v12 = vsel %vm31_vm0, %v123_v11, 0.0 }
  0x8a   :  { %v707_v0 = vsub.f32 %v604_v14, %v93_v8 }
  0x8b   :  { %v127_v15 = vmul.f32 %v704_v10, %v704_v10  ;;  %v126_v31 = vmul.f32 %v714_v16, %v714_v16 }
  0x8c   :  { %v125_v17 = vmul.f32 %v707_v0, %v707_v0 }
  0x8d   :  { %v159_v21 = vsel %vm31_vm0, %v127_v15, 0.0  ;;  %v156_v36 = vsel %vm31_vm0, %v126_v31, 0.0 }
  0x8e   :  { %v67_v22 = vpop.xlane.xlu2 %66  ;;  %160 = vadd.xlane.f32.xlu0 %v159_v21  ;;  %v153_v14 = vsel %vm31_vm0, %v125_v17, 0.0  ;;  %v64_v23 = vpop.xlane.xlu1 %63 }
  0x8f   :  { %v98_v27 = vmul.f32 %v661_v38, %v67_v22  ;;  %148 = vadd.xlane.f32.xlu2 %v147_v12  ;;  %154 = vadd.xlane.f32.xlu1 %v153_v14  ;;  %v61_v28 = vpop.xlane.xlu0 %60  ;;  %v97_v29 = vmul.f32 %v661_v38, %v64_v23 }
  0x90   :  { %v96_v13 = vmul.f32 %v661_v38, %v61_v28 }
  0x91   :  { %v727_v32 = vsub.f32 %v615_v18, %v98_v27  ;;  %v735_v35 = vsub.f32 %v620_v19, %v97_v29 }
  0x92   :  { %v730_v33 = vsub.f32 %v625_v20, %v96_v13 }
  0x93   :  { %v130_v34 = vmul.f32 %v727_v32, %v727_v32  ;;  %v129_v46 = vmul.f32 %v735_v35, %v735_v35 }
  0x94   :  { %v128_v37 = vmul.f32 %v730_v33, %v730_v33 }
  0x95   :  { %v168_v39 = vsel %vm31_vm0, %v130_v34, 0.0  ;;  %v165_v51 = vsel %vm31_vm0, %v129_v46, 0.0 }
  0x96   :  { %v76_v40 = vpop.xlane.xlu2 %75  ;;  %169 = vadd.xlane.f32.xlu0 %v168_v39  ;;  %v162_v18 = vsel %vm31_vm0, %v128_v37, 0.0  ;;  %v73_v41 = vpop.xlane.xlu1 %72 }
  0x97   :  { %v101_v20 = vmul.f32 %v661_v38, %v76_v40  ;;  %157 = vadd.xlane.f32.xlu2 %v156_v36  ;;  %163 = vadd.xlane.f32.xlu1 %v162_v18  ;;  %v70_v42 = vpop.xlane.xlu0 %69  ;;  %v100_v43 = vmul.f32 %v661_v38, %v73_v41 }
  0x98   :  { %v99_v19 = vmul.f32 %v661_v38, %v70_v42 }
  0x99   :  { %v748_v47 = vsub.f32 %v636_v24, %v101_v20  ;;  %v756_v50 = vsub.f32 %v641_v25, %v100_v43 }
  0x9a   :  { %v751_v48 = vsub.f32 %v646_v26, %v99_v19 }
  0x9b   :  { %v133_v49 = vmul.f32 %v748_v47, %v748_v47  ;;  %v132_v55 = vmul.f32 %v756_v50, %v756_v50 }
  0x9c   :  { %v131_v52 = vmul.f32 %v751_v48, %v751_v48 }
  0x9d   :  { %v177_v53 = vsel %vm31_vm0, %v133_v49, 0.0  ;;  %v174_v58 = vsel %vm31_vm0, %v132_v55, 0.0 }
  0x9e   :  { %178 = vadd.xlane.f32.xlu0 %v177_v53  ;;  %v171_v24 = vsel %vm31_vm0, %v131_v52, 0.0 }
  0x9f   :  { %166 = vadd.xlane.f32.xlu2 %v165_v51  ;;  %172 = vadd.xlane.f32.xlu1 %v171_v24  ;;  %v79_v26 = vpop.xlane.xlu0 %78  ;;  %v803_v51 = vld [vmem:[%s1007_s1] ss:$0 sm:$0xff] }
  0xa0   :  { %v102_v54 = vmul.f32 %v661_v38, %v79_v26 }
  0xa2   :  { %v767_v25 = vsub.f32 %v657_v30, %v102_v54 }
  0xa4   :  { %v134_v60 = vmul.f32 %v767_v25, %v767_v25 }
  0xa6   :  { %v180_v61 = vsel %vm31_vm0, %v134_v60, 0.0  ;;  %v818_v60 = vld [vmem:[%s1008_s2] ss:$0 sm:$0xff]  ;;  %s532_s2 = smov [#allocation2]  }
  0xa7   :  { %175 = vadd.xlane.f32.xlu2 %v174_v58  ;;  %181 = vadd.xlane.f32.xlu1 %v180_v61  ;;  %s451_s19 = sshll.u32 %s532_s2, 4  ;;  %s452_s19 = int_to_ptr.vmem [resolvable:$true] %s451_s19 }
  0xf1   :  { %v143_v62 = vpop.xlane.xlu0 %142 }
  0xf2   :  { %v137_v63 = vpop.xlane.xlu1 %136  ;;  %v185_v1 = vmul.f32 %v143_v62, %v661_v38 }
  0xf3   :  { %v183_v3 = vmul.f32 %v137_v63, %v661_v38 }
  0xf4   :  { %v201_v4 = vadd.f32 1e-05, %v185_v1 }
  0xf5   :  { %v199_v5 = vadd.f32 1e-05, %v183_v3 }
  0xf6   :  { %473 = vrsqrt.f32 %v201_v4  ;;  %vm241_vm4 = vweird.f32 %v201_v4 }
  0xf7   :  { %475 = vrsqrt.f32 %v199_v5  ;;  %vm221_vm5 = vweird.f32 %v199_v5 }
  0xf9   :  { %v152_v30 = vpop.xlane.xlu0 %151 }
  0xfa   :  { %v146_v6 = vpop.xlane.xlu1 %145  ;;  %v140_v7 = vpop.xlane.xlu2 %139  ;;  %v188_v8 = vmul.f32 %v152_v30, %v661_v38 }
  0xfb   :  { %v186_v9 = vmul.f32 %v146_v6, %v661_v38  ;;  %v184_v11 = vmul.f32 %v140_v7, %v661_v38 }
  0xfc   :  { %v474_v15 = vpop.eup %473  ;;  %v778_v17 = vadd.f32 1e-05, %v188_v8 }
  0xfd   :  { %v476_v21 = vpop.eup %475  ;;  %v236_v22 = vmul.f32 %v474_v15, %v201_v4  ;;  %v780_v12 = vadd.f32 1e-05, %v186_v9  ;;  %v782_v14 = vadd.f32 1e-05, %v184_v11  ;;  %vm242_vm2 = vweird.f32 %v474_v15 }
  0xfe   :  { %v216_v23 = vmul.f32 %v476_v21, %v199_v5  ;;  %477 = vrsqrt.f32 %v778_v17  ;;  %vm222_vm3 = vweird.f32 %v476_v21  ;;  %vm243_vm6 = vmor %vm241_vm4, %vm242_vm2  ;;  %vm271_vm8 = vweird.f32 %v778_v17 }
  0xff   :  { %v237_v27 = vmul.f32 %v474_v15, %v236_v22  ;;  %479 = vrsqrt.f32 %v780_v12  ;;  %vm223_vm7 = vmor %vm221_vm5, %vm222_vm3  ;;  %vm251_vm12 = vweird.f32 %v780_v12  ;;  %vm231_vm13 = vweird.f32 %v782_v14 }
 0x100   :  { %v217_v28 = vmul.f32 %v476_v21, %v216_v23  ;;  %481 = vrsqrt.f32 %v782_v14 }
 0x101   :  { %v238_v13 = vmul.f32 0.5, %v237_v27  ;;  %v161_v29 = vpop.xlane.xlu0 %160 }
 0x102   :  { %v218_v31 = vmul.f32 0.5, %v217_v28  ;;  %v149_v34 = vpop.xlane.xlu2 %148  ;;  %v155_v36 = vpop.xlane.xlu1 %154  ;;  %v191_v18 = vmul.f32 %v161_v29, %v661_v38 }
 0x103   :  { %v239_v37 = vsub.f32 1.5, %v238_v13  ;;  %v187_v39 = vmul.f32 %v149_v34, %v661_v38  ;;  %v189_v40 = vmul.f32 %v155_v36, %v661_v38 }
 0x104   :  { %v790_v41 = vpop.eup %477  ;;  %v219_v20 = vsub.f32 1.5, %v218_v31  ;;  %v813_v58 = vadd.f32 1e-05, %v191_v18 }
 0x105   :  { %v792_v42 = vpop.eup %479  ;;  %v240_v19 = vmul.f32 %v474_v15, %v239_v37  ;;  %v266_v43 = vmul.f32 %v790_v41, %v778_v17  ;;  %v796_v46 = vadd.f32 1e-05, %v187_v39  ;;  %v808_v24 = vadd.f32 1e-05, %v189_v40 }
 0x106   :  { %v798_v49 = vpop.eup %481  ;;  %v220_v52 = vmul.f32 %v476_v21, %v219_v20  ;;  %v246_v53 = vmul.f32 %v792_v42, %v780_v12  ;;  %vm272_vm9 = vweird.f32 %v790_v41  ;;  %vm252_vm10 = vweird.f32 %v792_v42 }
 0x107   :  { %v244_v26 = vsel %vm243_vm6, %v474_v15, %v240_v19  ;;  %v226_v54 = vmul.f32 %v798_v49, %v782_v14  ;;  %v267_v55 = vmul.f32 %v790_v41, %v266_v43  ;;  %483 = vrsqrt.f32 %v796_v46  ;;  %vm273_vm14 = vmor %vm271_vm8, %vm272_vm9 }
 0x108   :  { %v224_v61 = vsel %vm223_vm7, %v476_v21, %v220_v52  ;;  %v377_v62 = vmul.f32 %v244_v26, %v665_v44  ;;  %v247_v63 = vmul.f32 %v792_v42, %v246_v53  ;;  %485 = vrsqrt.f32 %v808_v24  ;;  %vm253_vm15 = vmor %vm251_vm12, %vm252_vm10 }
 0x109   :  { %v375_v1 = vmul.f32 %v224_v61, %v667_v45  ;;  %v227_v3 = vmul.f32 %v798_v49, %v226_v54  ;;  %v268_v4 = vmul.f32 0.5, %v267_v55  ;;  %487 = vrsqrt.f32 %v813_v58  ;;  %v170_v27 = vpop.xlane.xlu0 %169 }
 0x10a   :  { %v397_v5 = vmul.f32 %v803_v51, %v377_v62  ;;  %v248_v30 = vmul.f32 0.5, %v247_v63  ;;  %v158_v6 = vpop.xlane.xlu2 %157  ;;  %v164_v15 = vpop.xlane.xlu1 %163  ;;  %vm232_vm11 = vweird.f32 %v798_v49  ;;  %vm261_vm1 = vweird.f32 %v796_v46 }
 0x10b   :  { %v395_v44 = vmul.f32 %v803_v51, %v375_v1  ;;  %v228_v7 = vmul.f32 0.5, %v227_v3  ;;  %v269_v8 = vsub.f32 1.5, %v268_v4  ;;  %v190_v11 = vmul.f32 %v158_v6, %v661_v38  ;;  %vm233_vm2 = vmor %vm231_vm13, %vm232_vm11 }
 0x10c   :  { %v417_v45 = vadd.f32 %v818_v60, %v397_v5  ;;  %v249_v9 = vsub.f32 1.5, %v248_v30  ;;  %v192_v14 = vmul.f32 %v164_v15, %v661_v38  ;;  %v194_v39 = vmul.f32 %v170_v27, %v661_v38 }
 0x10d   :  { %v415_v21 = vadd.f32 %v818_v60, %v395_v44  ;;  %v229_v22 = vsub.f32 1.5, %v228_v7  ;;  %v270_v23 = vmul.f32 %v790_v41, %v269_v8  ;;  %v837_v28 = vpop.eup %483  ;;  %v847_v29 = vadd.f32 1e-05, %v190_v11 }
 0x10e   :  { %433 = vst.msk [vmem:[#allocation2 + $0x10] sm:$0xff] %vm31_vm0, %v417_v45  ;;  %v250_v13 = vmul.f32 %v792_v42, %v249_v9  ;;  %v256_v12 = vmul.f32 %v837_v28, %v796_v46  ;;  %v858_v17 = vpop.eup %485  ;;  %vm281_vm3 = vweird.f32 %v808_v24  ;;  %vm262_vm4 = vweird.f32 %v837_v28 }
 0x10f   :  { %431 = vst.msk [vmem:[#allocation2] sm:$0xff] %vm31_vm0, %v415_v21  ;;  %v230_v31 = vmul.f32 %v798_v49, %v229_v22  ;;  %v274_v34 = vsel %vm273_vm14, %v790_v41, %v270_v23  ;;  %489 = vrsqrt.f32 %v847_v29  ;;  %v488_v40 = vpop.eup %487  ;;  %v276_v19 = vmul.f32 %v858_v17, %v808_v24  ;;  %vm263_vm7 = vmor %vm261_vm1, %vm262_vm4 }
 0x110   :  { %v254_v36 = vsel %vm253_vm15, %v792_v42, %v250_v13  ;;  %v380_v37 = vmul.f32 %v274_v34, %v679_v56  ;;  %v257_v20 = vmul.f32 %v837_v28, %v256_v12  ;;  %v296_v56 = vmul.f32 %v488_v40, %v813_v58 }
 0x111   :  { %v378_v18 = vmul.f32 %v254_v36, %v682_v57  ;;  %v234_v41 = vsel %vm233_vm2, %v798_v49, %v230_v31  ;;  %v277_v57 = vmul.f32 %v858_v17, %v276_v19  ;;  %v883_v1 = vadd.f32 1e-05, %v194_v39  ;;  %v179_v9 = vpop.xlane.xlu0 %178 }
 0x112   :  { %v376_v42 = vmul.f32 %v234_v41, %v686_v59  ;;  %v400_v43 = vmul.f32 %v803_v51, %v380_v37  ;;  %v167_v52 = vpop.xlane.xlu2 %166  ;;  %v258_v26 = vmul.f32 0.5, %v257_v20  ;;  %v297_v55 = vmul.f32 %v488_v40, %v296_v56  ;;  %v173_v30 = vpop.xlane.xlu1 %172 }
 0x113   :  { %v398_v53 = vmul.f32 %v803_v51, %v378_v18  ;;  %v880_v59 = vadd.f32 1e-05, %v192_v14  ;;  %v278_v63 = vmul.f32 0.5, %v277_v57  ;;  %vm301_vm5 = vweird.f32 %v813_v58 }
 0x114   :  { %v396_v49 = vmul.f32 %v803_v51, %v376_v42  ;;  %v420_v54 = vadd.f32 %v818_v60, %v400_v43  ;;  %v259_v62 = vsub.f32 1.5, %v258_v26  ;;  %v298_v5 = vmul.f32 0.5, %v297_v55 }
 0x115   :  { %v418_v61 = vadd.f32 %v818_v60, %v398_v53  ;;  %v885_v3 = vpop.eup %489  ;;  %491 = vrsqrt.f32 %v880_v59  ;;  %v279_v44 = vsub.f32 1.5, %v278_v63  ;;  %vm282_vm6 = vweird.f32 %v858_v17 }
 0x116   :  { %v416_v4 = vadd.f32 %v818_v60, %v396_v49  ;;  %436 = vst.msk [vmem:[#allocation2 + $0x28] sm:$0xff] %vm31_vm0, %v420_v54  ;;  %v260_v6 = vmul.f32 %v837_v28, %v259_v62  ;;  %v286_v7 = vmul.f32 %v885_v3, %v847_v29  ;;  %v299_v8 = vsub.f32 1.5, %v298_v5  ;;  %vm283_vm9 = vmor %vm281_vm3, %vm282_vm6 }
 0x117   :  { %434 = vst.msk [vmem:[#allocation2 + $0x18] sm:$0xff] %vm31_vm0, %v418_v61  ;;  %vm302_vm8 = vweird.f32 %v488_v40  ;;  %493 = vrsqrt.f32 %v883_v1  ;;  %v193_v45 = vmul.f32 %v167_v52, %v661_v38  ;;  %v280_v15 = vmul.f32 %v858_v17, %v279_v44 }
 0x118   :  { %432 = vst.msk [vmem:[#allocation2 + $0x8] sm:$0xff] %vm31_vm0, %v416_v4  ;;  %v264_v11 = vsel %vm263_vm7, %v837_v28, %v260_v6  ;;  %v287_v21 = vmul.f32 %v885_v3, %v286_v7  ;;  %v195_v22 = vmul.f32 %v173_v30, %v661_v38  ;;  %v300_v46 = vmul.f32 %v488_v40, %v299_v8  ;;  %vm303_vm11 = vmor %vm301_vm5, %vm302_vm8 }
 0x119   :  { %v379_v23 = vmul.f32 %v264_v11, %v697_v2  ;;  %vm291_vm10 = vweird.f32 %v847_v29  ;;  %v911_v27 = vadd.f32 1e-05, %v193_v45  ;;  %v284_v13 = vsel %vm283_vm9, %v858_v17, %v280_v15 }
 0x11a   :  { %v288_v28 = vmul.f32 0.5, %v287_v21  ;;  %v916_v31 = vadd.f32 1e-05, %v195_v22  ;;  %v197_v34 = vmul.f32 %v179_v9, %v661_v38  ;;  %v176_v12 = vpop.xlane.xlu2 %175  ;;  %v381_v14 = vmul.f32 %v284_v13, %v707_v0  ;;  %v182_v57 = vpop.xlane.xlu1 %181 }
 0x11b   :  { %v492_v2 = vpop.eup %491  ;;  %v399_v24 = vmul.f32 %v803_v51, %v379_v23  ;;  %v304_v36 = vsel %vm303_vm11, %v488_v40, %v300_v46  ;;  %495 = vrsqrt.f32 %v911_v27  ;;  %vm292_vm12 = vweird.f32 %v885_v3 }
 0x11c   :  { %v383_v37 = vmul.f32 %v304_v36, %v704_v10  ;;  %v289_v17 = vsub.f32 1.5, %v288_v28  ;;  %v306_v58 = vmul.f32 %v492_v2, %v880_v59  ;;  %v401_v41 = vmul.f32 %v803_v51, %v381_v14  ;;  %vm293_vm13 = vmor %vm291_vm10, %vm292_vm12 }
 0x11d   :  { %v494_v39 = vpop.eup %493  ;;  %v419_v18 = vadd.f32 %v818_v60, %v399_v24  ;;  %497 = vrsqrt.f32 %v916_v31  ;;  %v196_v20 = vmul.f32 %v176_v12, %v661_v38  ;;  %vm311_vm14 = vweird.f32 %v880_v59 }
 0x11e   :  { %v403_v0 = vmul.f32 %v803_v51, %v383_v37  ;;  %v290_v40 = vmul.f32 %v885_v3, %v289_v17  ;;  %v307_v19 = vmul.f32 %v492_v2, %v306_v58  ;;  %v326_v10 = vmul.f32 %v494_v39, %v883_v1 }
 0x11f   :  { %435 = vst.msk [vmem:[#allocation2 + $0x20] sm:$0xff] %vm31_vm0, %v419_v18  ;;  %v421_v42 = vadd.f32 %v818_v60, %v401_v41  ;;  %v937_v43 = vadd.f32 1e-05, %v197_v34  ;;  %vm331_vm15 = vweird.f32 %v883_v1  ;;  %v945_v29 = vadd.f32 1e-05, %v196_v20 }
 0x120   :  { %v423_v56 = vadd.f32 %v818_v60, %v403_v0  ;;  %v294_v52 = vsel %vm293_vm13, %v885_v3, %v290_v40  ;;  %v308_v53 = vmul.f32 0.5, %v307_v19  ;;  %v327_v26 = vmul.f32 %v494_v39, %v326_v10 }
 0x121   :  { %v496_v49 = vpop.eup %495  ;;  %437 = vst.msk [vmem:[#allocation2 + $0x30] sm:$0xff] %vm31_vm0, %v421_v42  ;;  %v382_v54 = vmul.f32 %v294_v52, %v714_v16  ;;  %499 = vrsqrt.f32 %v937_v43  ;;  %vm312_vm1 = vweird.f32 %v492_v2  ;;  %vm332_vm2 = vweird.f32 %v494_v39 }
 0x122   :  { %439 = vst.msk [vmem:[#allocation2 + $0x40] sm:$0xff] %vm31_vm0, %v423_v56  ;;  %v309_v55 = vsub.f32 1.5, %v308_v53  ;;  %v328_v61 = vmul.f32 0.5, %v327_v26  ;;  %v316_v62 = vmul.f32 %v496_v49, %v911_v27  ;;  %501 = vrsqrt.f32 %v945_v29  ;;  %vm313_vm3 = vmor %vm311_vm14, %vm312_vm1 }
 0x123   :  { %v498_v63 = vpop.eup %497  ;;  %v402_v3 = vmul.f32 %v803_v51, %v382_v54  ;;  %v198_v16 = vmul.f32 %v182_v57, %v661_v38  ;;  %vm333_vm4 = vmor %vm331_vm15, %vm332_vm2  ;;  %vm322_vm5 = vweird.f32 %v496_v49  ;;  %vm321_vm6 = vweird.f32 %v911_v27 }
 0x124   :  { %v310_v4 = vmul.f32 %v492_v2, %v309_v55  ;;  %v329_v5 = vsub.f32 1.5, %v328_v61  ;;  %v317_v30 = vmul.f32 %v496_v49, %v316_v62  ;;  %v336_v6 = vmul.f32 %v498_v63, %v916_v31  ;;  %vm323_vm8 = vmor %vm321_vm6, %vm322_vm5 }
 0x125   :  { %v422_v44 = vadd.f32 %v818_v60, %v402_v3  ;;  %v956_v7 = vadd.f32 1e-05, %v198_v16  ;;  %vm342_vm7 = vweird.f32 %v498_v63  ;;  %vm341_vm9 = vweird.f32 %v916_v31 }
 0x126   :  { %v314_v8 = vsel %vm313_vm3, %v492_v2, %v310_v4  ;;  %v330_v45 = vmul.f32 %v494_v39, %v329_v5  ;;  %v318_v9 = vmul.f32 0.5, %v317_v30  ;;  %v337_v11 = vmul.f32 %v498_v63, %v336_v6  ;;  %vm343_vm10 = vmor %vm341_vm9, %vm342_vm7 }
 0x127   :  { %v500_v15 = vpop.eup %499  ;;  %438 = vst.msk [vmem:[#allocation2 + $0x38] sm:$0xff] %vm31_vm0, %v422_v44  ;;  %v384_v38 = vmul.f32 %v314_v8, %v730_v33  ;;  %503 = vrsqrt.f32 %v956_v7  ;;  %vm361_vm11 = vweird.f32 %v937_v43  ;;  %vm351_vm15 = vweird.f32 %v945_v29 }
 0x128   :  { %v334_v59 = vsel %vm333_vm4, %v494_v39, %v330_v45  ;;  %v319_v21 = vsub.f32 1.5, %v318_v9  ;;  %v338_v22 = vmul.f32 0.5, %v337_v11  ;;  %v356_v23 = vmul.f32 %v500_v15, %v937_v43  ;;  %v502_v46 = vpop.eup %501 }
 0x129   :  { %v404_v13 = vmul.f32 %v803_v51, %v384_v38  ;;  %v386_v28 = vmul.f32 %v334_v59, %v727_v32  ;;  %v346_v12 = vmul.f32 %v502_v46, %v945_v29  ;;  %vm362_vm12 = vweird.f32 %v500_v15 }
 0x12a   :  { %v320_v33 = vmul.f32 %v496_v49, %v319_v21  ;;  %v339_v34 = vsub.f32 1.5, %v338_v22  ;;  %v357_v1 = vmul.f32 %v500_v15, %v356_v23  ;;  %vm352_vm13 = vweird.f32 %v502_v46  ;;  %vm363_vm14 = vmor %vm361_vm11, %vm362_vm12 }
 0x12b   :  { %v424_v2 = vadd.f32 %v818_v60, %v404_v13  ;;  %v406_v24 = vmul.f32 %v803_v51, %v386_v28  ;;  %v347_v32 = vmul.f32 %v502_v46, %v346_v12  ;;  %vm353_vm1 = vmor %vm351_vm15, %vm352_vm13  ;;  %vm371_vm3 = vweird.f32 %v956_v7 }
 0x12c   :  { %v324_v14 = vsel %vm323_vm8, %v496_v49, %v320_v33  ;;  %v340_v36 = vmul.f32 %v498_v63, %v339_v34  ;;  %v358_v37 = vmul.f32 0.5, %v357_v1 }
 0x12d   :  { %v504_v17 = vpop.eup %503  ;;  %440 = vst.msk [vmem:[#allocation2 + $0x48] sm:$0xff] %vm31_vm0, %v424_v2  ;;  %v426_v27 = vadd.f32 %v818_v60, %v406_v24  ;;  %v385_v58 = vmul.f32 %v324_v14, %v735_v35  ;;  %v348_v41 = vmul.f32 0.5, %v347_v32 }
 0x12e   :  { %v344_v39 = vsel %vm343_vm10, %v498_v63, %v340_v36  ;;  %v359_v18 = vsub.f32 1.5, %v358_v37  ;;  %v366_v31 = vmul.f32 %v504_v17, %v956_v7  ;;  %vm372_vm2 = vweird.f32 %v504_v17 }
 0x12f   :  { %442 = vst.msk [vmem:[#allocation2 + $0x58] sm:$0xff] %vm31_vm0, %v426_v27  ;;  %v405_v20 = vmul.f32 %v803_v51, %v385_v58  ;;  %v387_v0 = vmul.f32 %v344_v39, %v751_v48  ;;  %v349_v19 = vsub.f32 1.5, %v348_v41  ;;  %vm373_vm4 = vmor %vm371_vm3, %vm372_vm2 }
 0x130   :  { %v360_v40 = vmul.f32 %v500_v15, %v359_v18  ;;  %v367_v35 = vmul.f32 %v504_v17, %v366_v31 }
 0x131   :  { %v425_v10 = vadd.f32 %v818_v60, %v405_v20  ;;  %v407_v42 = vmul.f32 %v803_v51, %v387_v0  ;;  %v350_v52 = vmul.f32 %v502_v46, %v349_v19 }
 0x132   :  { %v364_v56 = vsel %vm363_vm14, %v500_v15, %v360_v40  ;;  %v368_v53 = vmul.f32 0.5, %v367_v35 }
 0x133   :  { %441 = vst.msk [vmem:[#allocation2 + $0x50] sm:$0xff] %vm31_vm0, %v425_v10  ;;  %v427_v48 = vadd.f32 %v818_v60, %v407_v42  ;;  %v389_v26 = vmul.f32 %v364_v56, %v748_v47  ;;  %v354_v57 = vsel %vm353_vm1, %v502_v46, %v350_v52 }
 0x134   :  { %v369_v49 = vsub.f32 1.5, %v368_v53  ;;  %v388_v54 = vmul.f32 %v354_v57, %v756_v50 }
 0x135   :  { %443 = vst.msk [vmem:[#allocation2 + $0x60] sm:$0xff] %vm31_vm0, %v427_v48  ;;  %v409_v43 = vmul.f32 %v803_v51, %v389_v26 }
 0x136   :  { %v370_v55 = vmul.f32 %v504_v17, %v369_v49  ;;  %v408_v61 = vmul.f32 %v803_v51, %v388_v54 }
 0x137   :  { %v429_v29 = vadd.f32 %v818_v60, %v409_v43 }
 0x138   :  { %v374_v62 = vsel %vm373_vm4, %v504_v17, %v370_v55  ;;  %v428_v47 = vadd.f32 %v818_v60, %v408_v61 }
 0x139   :  { %445 = vst.msk [vmem:[#allocation2 + $0x70] sm:$0xff] %vm31_vm0, %v429_v29  ;;  %v390_v63 = vmul.f32 %v374_v62, %v767_v25 }
 0x13a   :  { %444 = vst.msk [vmem:[#allocation2 + $0x68] sm:$0xff] %vm31_vm0, %v428_v47 }
 0x13b   :  { %v410_v50 = vmul.f32 %v803_v51, %v390_v63 }
 0x13d   :  { %v430_v3 = vadd.f32 %v818_v60, %v410_v50 }
 0x13f   :  { %446 = vst.msk [vmem:[#allocation2 + $0x78] sm:$0xff] %vm31_vm0, %v430_v3 }
 0x140   :  { %459 = dma.vmem_to_hbm [thread:$0]  %s452_s19, 2048, %s454_s22, [#allocation3], %s533_s23, %s533_s23, %s534_s24  }
 0x141   :  { %529 = dma.done.wait [#allocation3], 2048  }
 0x142   :  { %530 = vsyncadd [#allocation3], 4294965248 }
 0x143   :  { %464 = vsyncpa [#allocation3], 1 }

</bundles_post_ra>
